<compile_context>
chip_gen: v6e
topology: v6e:2x2x1
jax: 0.10.0
libtpu: 0.0.40
codegen_flags: <defaults>
</compile_context>

<pallas_src>
import functools

import jax
import jax.numpy as jnp
from jax.experimental import pallas as pl
from jax.experimental.pallas import tpu as pltpu


def _conv3x3_bias_relu_kernel(x_ref, w_ref, b_ref, o_ref, *, H, W, KH, KW):
    """One (batch image, Cout tile): y = relu(conv3x3(x) + b).

    x_ref : (H+KH-1, W+KW-1, Cin)  zero-padded NHWC image (VMEM)
    w_ref : (KH*KW, Cin, tn)       per-tap weight slabs (VMEM)
    b_ref : (1, tn)                bias slice
    o_ref : (H*W, tn)              output tile (rows ordered (h, w))
    """
    cin = x_ref.shape[-1]
    acc = jnp.zeros(o_ref.shape, jnp.float32)
    for kh in range(KH):
        for kw in range(KW):
            # shifted window -> (H, W, Cin) -> (H*W, Cin); W is a multiple of 8
            # so this reshape is a sublane-merge layout no-op.
            lhs = x_ref[kh:kh + H, kw:kw + W, :].reshape(H * W, cin)
            acc = acc + jnp.dot(lhs, w_ref[kh * KW + kw],
                                preferred_element_type=jnp.float32)
    # fused Conv2d bias + nn.ReLU epilogue (single VPU pass, stays f32)
    o_ref[...] = jnp.maximum(acc + b_ref[...], 0.0).astype(o_ref.dtype)


@jax.jit
def feature_extractor_forward(x_nchw, weight, bias):
    """FeatureExtractor.forward: y = ReLU(Conv2d(256->256, 3x3, pad=1)(x)).

    x_nchw : (N, Cin, H, W) float32      (PyTorch NCHW)
    weight : (Cout, Cin, KH, KW) float32 (PyTorch OIHW)
    bias   : (Cout,) float32
    returns: (N, Cout, H, W) float32
    """
    N, Cin, H, W = x_nchw.shape
    Cout, _, KH, KW = weight.shape
    ph, pw = KH // 2, KW // 2

    # TODO(synk): general spatial sizes (e.g. AlexNet's real 13x13) need W padded
    # to a multiple of 8 plus masked partial tiles; here W = 8 suffices.
    assert W % 8 == 0 and Cin % 128 == 0 and Cout % 128 == 0

    # cheap XLA glue: NCHW -> zero-padded NHWC (no 9x im2col blowup any more)
    x_nhwc = jnp.transpose(x_nchw, (0, 2, 3, 1))
    xp = jnp.pad(x_nhwc, ((0, 0), (ph, ph), (pw, pw), (0, 0)))
    Hp, Wp = H + 2 * ph, W + 2 * pw

    # OIHW -> (KH*KW, Cin, Cout): tap-major, matching the in-kernel loop order
    w_taps = jnp.transpose(weight, (2, 3, 1, 0)).reshape(KH * KW, Cin, Cout)
    b_row = bias.reshape(1, Cout)

    tn = 128
    grid = (N, Cout // tn)
    kernel = functools.partial(_conv3x3_bias_relu_kernel, H=H, W=W, KH=KH, KW=KW)

    out_flat = pl.pallas_call(
        kernel,
        out_shape=jax.ShapeDtypeStruct((N, H * W, Cout), x_nchw.dtype),
        grid_spec=pltpu.PrefetchScalarGridSpec(
            num_scalar_prefetch=0,
            grid=grid,
            in_specs=[
                # one padded image per batch index (batch dim squeezed away)
                pl.BlockSpec((None, Hp, Wp, Cin), lambda n, j: (n, 0, 0, 0)),
                # all 9 taps of a 128-wide Cout slice
                pl.BlockSpec((KH * KW, Cin, tn), lambda n, j: (0, 0, j)),
                pl.BlockSpec((1, tn), lambda n, j: (0, j)),
            ],
            out_specs=pl.BlockSpec((None, H * W, tn), lambda n, j: (n, 0, j)),
        ),
        compiler_params=pltpu.CompilerParams(
            dimension_semantics=("parallel", "parallel")),
    )(xp, w_taps, b_row)

    out = out_flat.reshape(N, H, W, Cout)
    return jnp.transpose(out, (0, 3, 1, 2))  # back to NCHW


if __name__ == "__main__":
    # AlexNet features[-3:-1] => Conv2d(256, 256, kernel_size=3, padding=1) + ReLU
    N, Cin, Cout, H, W = 2, 256, 256, 8, 8

    key = jax.random.PRNGKey(0)
    kx, kwt, kb = jax.random.split(key, 3)
    x = jax.random.normal(kx, (N, Cin, H, W), dtype=jnp.float32)
    weight = jax.random.normal(kwt, (Cout, Cin, 3, 3), dtype=jnp.float32) * 0.02
    bias = jax.random.normal(kb, (Cout,), dtype=jnp.float32) * 0.1

    y = feature_extractor_forward(x, weight, bias)
    y = jax.block_until_ready(y)

    # sanity check against XLA's conv (same semantics as torch Conv2d + ReLU)
    ref = jax.lax.conv_general_dilated(
        x, weight, window_strides=(1, 1), padding=((1, 1), (1, 1)),
        dimension_numbers=("NCHW", "OIHW", "NCHW"),
    )
    ref = jnp.maximum(ref + bias.reshape(1, Cout, 1, 1), 0.0)
    assert y.shape == (N, Cout, H, W)
    assert jnp.allclose(y, ref, atol=1e-3, rtol=1e-3)

    print("KERNEL_OK")
</pallas_src>

<mosaic_0001>
module attributes {stable_mosaic.version = 11 : i64} {
  func.func @_conv3x3_bias_relu_kernel(%arg0: i32, %arg1: i32, %arg2: memref<1x10x10x256xf32, #tpu.memory_space<vmem>>, %arg3: memref<9x256x128xf32, #tpu.memory_space<vmem>>, %arg4: memref<1x128xf32, #tpu.memory_space<vmem>>, %arg5: memref<1x64x128xf32, #tpu.memory_space<vmem>>) attributes {dimension_semantics = [#tpu.dimension_semantics<parallel>, #tpu.dimension_semantics<parallel>], iteration_bounds = array<i64: 2, 2>, scalar_prefetch = 0 : i64, scratch_operands = 0 : i64, tpu.core_type = #tpu.core_type<tc>, window_params = [{transform_indices = @transform_0, window_bounds = array<i64: 1, 10, 10, 256>}, {transform_indices = @transform_1, window_bounds = array<i64: 9, 256, 128>}, {transform_indices = @transform_2, window_bounds = array<i64: 1, 128>}, {transform_indices = @transform_3, window_bounds = array<i64: 1, 64, 128>}]} {
    %cst = arith.constant 0.000000e+00 : f32
    %0 = vector.broadcast %cst : f32 to vector<64x128xf32>
    %c0 = arith.constant 0 : index
    %c0_0 = arith.constant 0 : index
    %c0_1 = arith.constant 0 : index
    %c0_2 = arith.constant 0 : index
    %1 = vector.load %arg2[%c0, %c0_0, %c0_1, %c0_2] : memref<1x10x10x256xf32, #tpu.memory_space<vmem>>, vector<1x8x8x256xf32>
    %2 = vector.shape_cast %1 : vector<1x8x8x256xf32> to vector<8x8x256xf32>
    %3 = vector.shape_cast %2 : vector<8x8x256xf32> to vector<64x256xf32>
    %c0_3 = arith.constant 0 : index
    %c0_4 = arith.constant 0 : index
    %c0_5 = arith.constant 0 : index
    %4 = vector.load %arg3[%c0_3, %c0_4, %c0_5] : memref<9x256x128xf32, #tpu.memory_space<vmem>>, vector<1x256x128xf32>
    %5 = vector.shape_cast %4 : vector<1x256x128xf32> to vector<256x128xf32>
    %cst_6 = arith.constant dense<0.000000e+00> : vector<64x128xf32>
    %6 = tpu.matmul %3, %5, %cst_6 {dimension_numbers = #tpu.dot_dimension_numbers<[1], [0], [0], [1], [0, 0, 1, 1], [], []>} : vector<64x256xf32>, vector<256x128xf32>, vector<64x128xf32> -> vector<64x128xf32>
    %7 = arith.addf %0, %6 : vector<64x128xf32>
    %c0_7 = arith.constant 0 : index
    %c0_8 = arith.constant 0 : index
    %c1 = arith.constant 1 : index
    %c0_9 = arith.constant 0 : index
    %8 = vector.load %arg2[%c0_7, %c0_8, %c1, %c0_9] : memref<1x10x10x256xf32, #tpu.memory_space<vmem>>, vector<1x8x8x256xf32>
    %9 = vector.shape_cast %8 : vector<1x8x8x256xf32> to vector<8x8x256xf32>
    %10 = vector.shape_cast %9 : vector<8x8x256xf32> to vector<64x256xf32>
    %c1_10 = arith.constant 1 : index
    %c0_11 = arith.constant 0 : index
    %c0_12 = arith.constant 0 : index
    %11 = vector.load %arg3[%c1_10, %c0_11, %c0_12] : memref<9x256x128xf32, #tpu.memory_space<vmem>>, vector<1x256x128xf32>
    %12 = vector.shape_cast %11 : vector<1x256x128xf32> to vector<256x128xf32>
    %cst_13 = arith.constant dense<0.000000e+00> : vector<64x128xf32>
    %13 = tpu.matmul %10, %12, %cst_13 {dimension_numbers = #tpu.dot_dimension_numbers<[1], [0], [0], [1], [0, 0, 1, 1], [], []>} : vector<64x256xf32>, vector<256x128xf32>, vector<64x128xf32> -> vector<64x128xf32>
    %14 = arith.addf %7, %13 : vector<64x128xf32>
    %c0_14 = arith.constant 0 : index
    %c0_15 = arith.constant 0 : index
    %c2 = arith.constant 2 : index
    %c0_16 = arith.constant 0 : index
    %15 = vector.load %arg2[%c0_14, %c0_15, %c2, %c0_16] : memref<1x10x10x256xf32, #tpu.memory_space<vmem>>, vector<1x8x8x256xf32>
    %16 = vector.shape_cast %15 : vector<1x8x8x256xf32> to vector<8x8x256xf32>
    %17 = vector.shape_cast %16 : vector<8x8x256xf32> to vector<64x256xf32>
    %c2_17 = arith.constant 2 : index
    %c0_18 = arith.constant 0 : index
    %c0_19 = arith.constant 0 : index
    %18 = vector.load %arg3[%c2_17, %c0_18, %c0_19] : memref<9x256x128xf32, #tpu.memory_space<vmem>>, vector<1x256x128xf32>
    %19 = vector.shape_cast %18 : vector<1x256x128xf32> to vector<256x128xf32>
    %cst_20 = arith.constant dense<0.000000e+00> : vector<64x128xf32>
    %20 = tpu.matmul %17, %19, %cst_20 {dimension_numbers = #tpu.dot_dimension_numbers<[1], [0], [0], [1], [0, 0, 1, 1], [], []>} : vector<64x256xf32>, vector<256x128xf32>, vector<64x128xf32> -> vector<64x128xf32>
    %21 = arith.addf %14, %20 : vector<64x128xf32>
    %c0_21 = arith.constant 0 : index
    %c1_22 = arith.constant 1 : index
    %c0_23 = arith.constant 0 : index
    %c0_24 = arith.constant 0 : index
    %22 = vector.load %arg2[%c0_21, %c1_22, %c0_23, %c0_24] : memref<1x10x10x256xf32, #tpu.memory_space<vmem>>, vector<1x8x8x256xf32>
    %23 = vector.shape_cast %22 : vector<1x8x8x256xf32> to vector<8x8x256xf32>
    %24 = vector.shape_cast %23 : vector<8x8x256xf32> to vector<64x256xf32>
    %c3 = arith.constant 3 : index
    %c0_25 = arith.constant 0 : index
    %c0_26 = arith.constant 0 : index
    %25 = vector.load %arg3[%c3, %c0_25, %c0_26] : memref<9x256x128xf32, #tpu.memory_space<vmem>>, vector<1x256x128xf32>
    %26 = vector.shape_cast %25 : vector<1x256x128xf32> to vector<256x128xf32>
    %cst_27 = arith.constant dense<0.000000e+00> : vector<64x128xf32>
    %27 = tpu.matmul %24, %26, %cst_27 {dimension_numbers = #tpu.dot_dimension_numbers<[1], [0], [0], [1], [0, 0, 1, 1], [], []>} : vector<64x256xf32>, vector<256x128xf32>, vector<64x128xf32> -> vector<64x128xf32>
    %28 = arith.addf %21, %27 : vector<64x128xf32>
    %c0_28 = arith.constant 0 : index
    %c1_29 = arith.constant 1 : index
    %c1_30 = arith.constant 1 : index
    %c0_31 = arith.constant 0 : index
    %29 = vector.load %arg2[%c0_28, %c1_29, %c1_30, %c0_31] : memref<1x10x10x256xf32, #tpu.memory_space<vmem>>, vector<1x8x8x256xf32>
    %30 = vector.shape_cast %29 : vector<1x8x8x256xf32> to vector<8x8x256xf32>
    %31 = vector.shape_cast %30 : vector<8x8x256xf32> to vector<64x256xf32>
    %c4 = arith.constant 4 : index
    %c0_32 = arith.constant 0 : index
    %c0_33 = arith.constant 0 : index
    %32 = vector.load %arg3[%c4, %c0_32, %c0_33] : memref<9x256x128xf32, #tpu.memory_space<vmem>>, vector<1x256x128xf32>
    %33 = vector.shape_cast %32 : vector<1x256x128xf32> to vector<256x128xf32>
    %cst_34 = arith.constant dense<0.000000e+00> : vector<64x128xf32>
    %34 = tpu.matmul %31, %33, %cst_34 {dimension_numbers = #tpu.dot_dimension_numbers<[1], [0], [0], [1], [0, 0, 1, 1], [], []>} : vector<64x256xf32>, vector<256x128xf32>, vector<64x128xf32> -> vector<64x128xf32>
    %35 = arith.addf %28, %34 : vector<64x128xf32>
    %c0_35 = arith.constant 0 : index
    %c1_36 = arith.constant 1 : index
    %c2_37 = arith.constant 2 : index
    %c0_38 = arith.constant 0 : index
    %36 = vector.load %arg2[%c0_35, %c1_36, %c2_37, %c0_38] : memref<1x10x10x256xf32, #tpu.memory_space<vmem>>, vector<1x8x8x256xf32>
    %37 = vector.shape_cast %36 : vector<1x8x8x256xf32> to vector<8x8x256xf32>
    %38 = vector.shape_cast %37 : vector<8x8x256xf32> to vector<64x256xf32>
    %c5 = arith.constant 5 : index
    %c0_39 = arith.constant 0 : index
    %c0_40 = arith.constant 0 : index
    %39 = vector.load %arg3[%c5, %c0_39, %c0_40] : memref<9x256x128xf32, #tpu.memory_space<vmem>>, vector<1x256x128xf32>
    %40 = vector.shape_cast %39 : vector<1x256x128xf32> to vector<256x128xf32>
    %cst_41 = arith.constant dense<0.000000e+00> : vector<64x128xf32>
    %41 = tpu.matmul %38, %40, %cst_41 {dimension_numbers = #tpu.dot_dimension_numbers<[1], [0], [0], [1], [0, 0, 1, 1], [], []>} : vector<64x256xf32>, vector<256x128xf32>, vector<64x128xf32> -> vector<64x128xf32>
    %42 = arith.addf %35, %41 : vector<64x128xf32>
    %c0_42 = arith.constant 0 : index
    %c2_43 = arith.constant 2 : index
    %c0_44 = arith.constant 0 : index
    %c0_45 = arith.constant 0 : index
    %43 = vector.load %arg2[%c0_42, %c2_43, %c0_44, %c0_45] : memref<1x10x10x256xf32, #tpu.memory_space<vmem>>, vector<1x8x8x256xf32>
    %44 = vector.shape_cast %43 : vector<1x8x8x256xf32> to vector<8x8x256xf32>
    %45 = vector.shape_cast %44 : vector<8x8x256xf32> to vector<64x256xf32>
    %c6 = arith.constant 6 : index
    %c0_46 = arith.constant 0 : index
    %c0_47 = arith.constant 0 : index
    %46 = vector.load %arg3[%c6, %c0_46, %c0_47] : memref<9x256x128xf32, #tpu.memory_space<vmem>>, vector<1x256x128xf32>
    %47 = vector.shape_cast %46 : vector<1x256x128xf32> to vector<256x128xf32>
    %cst_48 = arith.constant dense<0.000000e+00> : vector<64x128xf32>
    %48 = tpu.matmul %45, %47, %cst_48 {dimension_numbers = #tpu.dot_dimension_numbers<[1], [0], [0], [1], [0, 0, 1, 1], [], []>} : vector<64x256xf32>, vector<256x128xf32>, vector<64x128xf32> -> vector<64x128xf32>
    %49 = arith.addf %42, %48 : vector<64x128xf32>
    %c0_49 = arith.constant 0 : index
    %c2_50 = arith.constant 2 : index
    %c1_51 = arith.constant 1 : index
    %c0_52 = arith.constant 0 : index
    %50 = vector.load %arg2[%c0_49, %c2_50, %c1_51, %c0_52] : memref<1x10x10x256xf32, #tpu.memory_space<vmem>>, vector<1x8x8x256xf32>
    %51 = vector.shape_cast %50 : vector<1x8x8x256xf32> to vector<8x8x256xf32>
    %52 = vector.shape_cast %51 : vector<8x8x256xf32> to vector<64x256xf32>
    %c7 = arith.constant 7 : index
    %c0_53 = arith.constant 0 : index
    %c0_54 = arith.constant 0 : index
    %53 = vector.load %arg3[%c7, %c0_53, %c0_54] : memref<9x256x128xf32, #tpu.memory_space<vmem>>, vector<1x256x128xf32>
    %54 = vector.shape_cast %53 : vector<1x256x128xf32> to vector<256x128xf32>
    %cst_55 = arith.constant dense<0.000000e+00> : vector<64x128xf32>
    %55 = tpu.matmul %52, %54, %cst_55 {dimension_numbers = #tpu.dot_dimension_numbers<[1], [0], [0], [1], [0, 0, 1, 1], [], []>} : vector<64x256xf32>, vector<256x128xf32>, vector<64x128xf32> -> vector<64x128xf32>
    %56 = arith.addf %49, %55 : vector<64x128xf32>
    %c0_56 = arith.constant 0 : index
    %c2_57 = arith.constant 2 : index
    %c2_58 = arith.constant 2 : index
    %c0_59 = arith.constant 0 : index
    %57 = vector.load %arg2[%c0_56, %c2_57, %c2_58, %c0_59] : memref<1x10x10x256xf32, #tpu.memory_space<vmem>>, vector<1x8x8x256xf32>
    %58 = vector.shape_cast %57 : vector<1x8x8x256xf32> to vector<8x8x256xf32>
    %59 = vector.shape_cast %58 : vector<8x8x256xf32> to vector<64x256xf32>
    %c8 = arith.constant 8 : index
    %c0_60 = arith.constant 0 : index
    %c0_61 = arith.constant 0 : index
    %60 = vector.load %arg3[%c8, %c0_60, %c0_61] : memref<9x256x128xf32, #tpu.memory_space<vmem>>, vector<1x256x128xf32>
    %61 = vector.shape_cast %60 : vector<1x256x128xf32> to vector<256x128xf32>
    %cst_62 = arith.constant dense<0.000000e+00> : vector<64x128xf32>
    %62 = tpu.matmul %59, %61, %cst_62 {dimension_numbers = #tpu.dot_dimension_numbers<[1], [0], [0], [1], [0, 0, 1, 1], [], []>} : vector<64x256xf32>, vector<256x128xf32>, vector<64x128xf32> -> vector<64x128xf32>
    %63 = arith.addf %56, %62 : vector<64x128xf32>
    %c0_63 = arith.constant 0 : index
    %c0_64 = arith.constant 0 : index
    %64 = vector.load %arg4[%c0_63, %c0_64] : memref<1x128xf32, #tpu.memory_space<vmem>>, vector<1x128xf32>
    %65 = vector.broadcast %64 : vector<1x128xf32> to vector<64x128xf32>
    %66 = arith.addf %63, %65 : vector<64x128xf32>
    %cst_65 = arith.constant 0.000000e+00 : f32
    %67 = vector.broadcast %cst_65 : f32 to vector<64x128xf32>
    %68 = arith.maximumf %66, %67 : vector<64x128xf32>
    %c0_66 = arith.constant 0 : index
    %c0_67 = arith.constant 0 : index
    %c0_68 = arith.constant 0 : index
    %69 = vector.load %arg5[%c0_66, %c0_67, %c0_68] : memref<1x64x128xf32, #tpu.memory_space<vmem>>, vector<1x64x128xf32>
    %70 = vector.shape_cast %69 : vector<1x64x128xf32> to vector<64x128xf32>
    %71 = vector.shape_cast %68 : vector<64x128xf32> to vector<1x64x128xf32>
    tpu.vector_store %arg5[%c0_66, %c0_67, %c0_68], %71 {strides = array<i32>} : memref<1x64x128xf32, #tpu.memory_space<vmem>>, vector<1x64x128xf32>,
    return
  }
  func.func @transform_0(%arg0: i32, %arg1: i32) -> (i32, i32, i32, i32) {
    %c0_i32 = arith.constant 0 : i32
    %c0_i32_0 = arith.constant 0 : i32
    %c0_i32_1 = arith.constant 0 : i32
    %c0_i32_2 = arith.constant 0 : i32
    return %arg0, %c0_i32, %c0_i32_0, %c0_i32_1 : i32, i32, i32, i32
  }
  func.func @transform_1(%arg0: i32, %arg1: i32) -> (i32, i32, i32) {
    %c0_i32 = arith.constant 0 : i32
    %c0_i32_0 = arith.constant 0 : i32
    %c0_i32_1 = arith.constant 0 : i32
    return %c0_i32, %c0_i32_0, %arg1 : i32, i32, i32
  }
  func.func @transform_2(%arg0: i32, %arg1: i32) -> (i32, i32) {
    %c0_i32 = arith.constant 0 : i32
    %c0_i32_0 = arith.constant 0 : i32
    return %c0_i32, %arg1 : i32, i32
  }
  func.func @transform_3(%arg0: i32, %arg1: i32) -> (i32, i32, i32) {
    %c0_i32 = arith.constant 0 : i32
    %c0_i32_0 = arith.constant 0 : i32
    return %arg0, %c0_i32, %arg1 : i32, i32, i32
  }
}

</mosaic_0001>

<bundles_post_ra>
// kernel: feature_extractor_forward.1
= control target key start
LH: loop header
LB: loop body
LE: loop exit
PB: predicated region body
PF: predicated region fallthrough
CT: control target
= control target key end

     0   :  { %8 = vsyncpa [#allocation4], 0  ;;  %s6462_s0 = inlined_call_operand.vmem [shape: f32[2,10,10,256], index: 0, kind: input, shape index: {}]   ;;  %s6463_s1 = inlined_call_operand.vmem [shape: f32[9,256,256], index: 1, kind: input, shape index: {}]   ;;  %s6464_s2 = inlined_call_operand.vmem [shape: f32[1,256], index: 2, kind: input, shape index: {}]   ;;  %s6465_s3 = inlined_call_operand.hbm [shape: f32[2,64,256], index: 3, kind: output, shape index: {}]  }
   0x1   :  { %10 = vsyncpa [#allocation4 + $0x1], 0  ;;  %s4858_s12 = smov 0   ;;  %s4860_s13 = smov 0  }
   0x2   :  { %s4862_s14 = smov 0   ;;  %s4864_s15 = smov 0  }
   0x3   :  { %s4866_s16 = smov 0   ;;  %s4868_s17 = smov 0  }
   0x4   :  { %s4870_s18 = smov 0   ;;  %s4872_s19 = smov 0  }
   0x5   :  { %s4874_s20 = smov 0   ;;  %s4876_s21 = smov 0  }
   0x6 LB: > { %s3665_s22 = sadd.s32 4294967295, %s4832_s21   ;;  %s3666_s23 = sadd.s32 4294967294, %s4832_s21   ;;  %s4832_s21 = sphi %s4876_s21, %s16_s21   ;;  %s4828_s20 = sphi %s4874_s20, %s6503_s20   ;;  %s4824_s19 = sphi %s4872_s19, %s6502_s19   ;;  %s4820_s18 = sphi %s4870_s18, %s6501_s18   ;;  %s4816_s17 = sphi %s4868_s17, %s6500_s17   ;;  %s4812_s16 = sphi %s4866_s16, %s6499_s16   ;;  %s4808_s15 = sphi %s4864_s15, %s6498_s15   ;;  %s4804_s14 = sphi %s4862_s14, %s6497_s14   ;;  %s4800_s13 = sphi %s4860_s13, %s6496_s13   ;;  %s4796_s12 = sphi %s4858_s12, %s6495_s12  }
   0x7   : > { %s25_s24 = sadd.s32 1, %s4824_s19  ;;  %s28_s25 = sadd.s32 1, %s4828_s20 }
   0x8   : > { %p26_p0 = scmp.ge.s32.totalorder %s25_s24, 2  ;;  %s61_s26 = sadd.s32 1, %s4812_s16 }
   0x9   : > { %p68_p1 = scmp.ne.s32.totalorder %s4812_s16, %s4808_s15  ;;  %p69_p2 = scmp.eq.s32.totalorder %s4832_s21, 0 }
   0xa   : > { %s6505_s24 = smov (%p26_p0, %s25_s24), 0  ;;  %s6507_s25 = smov (!%p26_p0, %s28_s25), %s4828_s20 }
   0xb   : > { %s58_s27 = ssub.s32 %s4824_s19, %s6505_s24  ;;  %p4921_p3 = por %p69_p2, %p68_p1 }
   0xc   : > { %p30_p4 = scmp.ge.s32.totalorder %s6507_s25, 2  ;;  %p59_p5 = scmp.eq.s32.totalorder %s58_s27, 0 }
   0xd   : > { %s115_s29 = sadd.s32 1, %s4804_s14  ;;  %p125_p6 = scmp.ne.s32.totalorder %s4804_s14, %s4800_s13 }
   0xe   : > { %s6509_s25 = smov (%p30_p4, %s6507_s25), 0  ;;  %p126_p7 = scmp.eq.s32.totalorder %s3665_s22, 3 }
   0xf   : > { %s4931_s30 = scalar_select %p59_p5, %s4812_s16, %s61_s26  }
  0x10   : > { %s110_s4 = ssub.s32 %s4828_s20, %s6509_s25  ;;  %p131_p8 = scmp.ne.s32.totalorder %s4800_s13, %s4796_s12 }
  0x11   : > { %s112_s5 = sor.u32 %s110_s4, %s58_s27  ;;  %p4937_p10 = por %p126_p7, %p125_p6 }
  0x12   : > { %p113_p9 = scmp.eq.s32.totalorder %s112_s5, 0  ;;  %p132_p11 = scmp.eq.s32.totalorder %s3666_s23, 3 }
  0x13   : > { %p3668_p13 = scmp.ge.s32.totalorder %s4832_s21, 4 }
  0x14   : > { %s4942_s7 = scalar_select %p113_p9, %s4804_s14, %s115_s29  }
  0x15   : > { %p4944_p12 = por %p132_p11, %p131_p8  ;;  %148 = sbr.rel (%p3668_p13) target bundleno = 174 (0xae), region = 16 }
  0x1a   : > { %159 = sbr.rel (!%p4921_p3) target bundleno = 174 (0xae), region = 24  ;;  %s161_s9 = sand.u32 (%p4921_p3), 1, %s4812_s16  }
  0x1b   : > { %s3669_s10 = sshll.u32 (%p4921_p3), %s4824_s19, 3  ;;  %s4631_s11 = smul.u32 (%p4921_p3), 2304, %s161_s9 }
  0x1c   : > { %s4956_s23 = scalar_lea.vmem (%p4921_p3), %s6463_s1, %s3669_s10 }
  0x1d   : > { %v768_v0 = vld [vmem:[%s4956_s23] sm:$0xff] (%p4921_p3)  ;;  %v770_v1 = vld [vmem:[%s4956_s23 + $0x10] sm:$0xff] (%p4921_p3)  ;;  %s4964_s27 = scalar_lea.vmem (%p4921_p3), [#allocation2], %s4631_s11 }
  0x1e   : > { %v772_v2 = vld [vmem:[%s4956_s23 + $0x20] sm:$0xff] (%p4921_p3)  ;;  %v774_v3 = vld [vmem:[%s4956_s23 + $0x30] sm:$0xff] (%p4921_p3)  ;;  %769 = vst [vmem:[%s4964_s27] sm:$0xff] (%p4921_p3), %v768_v0  ;;  %771 = vst [vmem:[%s4964_s27 + $0x8] sm:$0xff] (%p4921_p3), %v770_v1 }
  0x1f   : > { %v776_v4 = vld [vmem:[%s4956_s23 + $0x40] sm:$0xff]  ;;  %v778_v5 = vld [vmem:[%s4956_s23 + $0x50] sm:$0xff]  ;;  %773 = vst [vmem:[%s4964_s27 + $0x10] sm:$0xff] %v772_v2  ;;  %775 = vst [vmem:[%s4964_s27 + $0x18] sm:$0xff] %v774_v3 }
  0x20   : > { %777 = vst [vmem:[%s4964_s27 + $0x20] sm:$0xff] %v776_v4  ;;  %779 = vst [vmem:[%s4964_s27 + $0x28] sm:$0xff] %v778_v5  ;;  %v780_v6 = vld [vmem:[%s4956_s23 + $0x60] sm:$0xff]  ;;  %v782_v7 = vld [vmem:[%s4956_s23 + $0x70] sm:$0xff] }
  0x21   : > { %v784_v8 = vld [vmem:[%s4956_s23 + $0x80] sm:$0xff]  ;;  %781 = vst [vmem:[%s4964_s27 + $0x30] sm:$0xff] %v780_v6  ;;  %783 = vst [vmem:[%s4964_s27 + $0x38] sm:$0xff] %v782_v7  ;;  %v786_v9 = vld [vmem:[%s4956_s23 + $0x90] sm:$0xff] }
  0x22   : > { %785 = vst [vmem:[%s4964_s27 + $0x40] sm:$0xff] %v784_v8  ;;  %v788_v10 = vld [vmem:[%s4956_s23 + $0xa0] sm:$0xff]  ;;  %v790_v11 = vld [vmem:[%s4956_s23 + $0xb0] sm:$0xff]  ;;  %787 = vst [vmem:[%s4964_s27 + $0x48] sm:$0xff] %v786_v9 }
  0x23   : > { %789 = vst [vmem:[%s4964_s27 + $0x50] sm:$0xff] %v788_v10  ;;  %791 = vst [vmem:[%s4964_s27 + $0x58] sm:$0xff] %v790_v11  ;;  %v792_v12 = vld [vmem:[%s4956_s23 + $0xc0] sm:$0xff]  ;;  %v794_v13 = vld [vmem:[%s4956_s23 + $0xd0] sm:$0xff] }
  0x24   : > { %v796_v14 = vld [vmem:[%s4956_s23 + $0xe0] sm:$0xff]  ;;  %793 = vst [vmem:[%s4964_s27 + $0x60] sm:$0xff] %v792_v12  ;;  %795 = vst [vmem:[%s4964_s27 + $0x68] sm:$0xff] %v794_v13  ;;  %v798_v15 = vld [vmem:[%s4956_s23 + $0xf0] sm:$0xff] }
  0x25   : > { %797 = vst [vmem:[%s4964_s27 + $0x70] sm:$0xff] %v796_v14  ;;  %v800_v16 = vld [vmem:[%s4956_s23 + $0x100] sm:$0xff]  ;;  %v802_v17 = vld [vmem:[%s4956_s23 + $0x110] sm:$0xff]  ;;  %799 = vst [vmem:[%s4964_s27 + $0x78] sm:$0xff] %v798_v15 }
  0x26   : > { %801 = vst [vmem:[%s4964_s27 + $0x80] sm:$0xff] %v800_v16  ;;  %803 = vst [vmem:[%s4964_s27 + $0x88] sm:$0xff] %v802_v17  ;;  %v804_v18 = vld [vmem:[%s4956_s23 + $0x120] sm:$0xff]  ;;  %v806_v19 = vld [vmem:[%s4956_s23 + $0x130] sm:$0xff] }
  0x27   : > { %v808_v20 = vld [vmem:[%s4956_s23 + $0x140] sm:$0xff]  ;;  %805 = vst [vmem:[%s4964_s27 + $0x90] sm:$0xff] %v804_v18  ;;  %807 = vst [vmem:[%s4964_s27 + $0x98] sm:$0xff] %v806_v19  ;;  %v810_v21 = vld [vmem:[%s4956_s23 + $0x150] sm:$0xff] }
  0x28   : > { %809 = vst [vmem:[%s4964_s27 + $0xa0] sm:$0xff] %v808_v20  ;;  %v812_v22 = vld [vmem:[%s4956_s23 + $0x160] sm:$0xff]  ;;  %v814_v23 = vld [vmem:[%s4956_s23 + $0x170] sm:$0xff]  ;;  %811 = vst [vmem:[%s4964_s27 + $0xa8] sm:$0xff] %v810_v21 }
  0x29   : > { %813 = vst [vmem:[%s4964_s27 + $0xb0] sm:$0xff] %v812_v22  ;;  %815 = vst [vmem:[%s4964_s27 + $0xb8] sm:$0xff] %v814_v23  ;;  %v816_v24 = vld [vmem:[%s4956_s23 + $0x180] sm:$0xff]  ;;  %v818_v25 = vld [vmem:[%s4956_s23 + $0x190] sm:$0xff] }
  0x2a   : > { %v820_v26 = vld [vmem:[%s4956_s23 + $0x1a0] sm:$0xff]  ;;  %817 = vst [vmem:[%s4964_s27 + $0xc0] sm:$0xff] %v816_v24  ;;  %819 = vst [vmem:[%s4964_s27 + $0xc8] sm:$0xff] %v818_v25  ;;  %v822_v27 = vld [vmem:[%s4956_s23 + $0x1b0] sm:$0xff] }
  0x2b   : > { %821 = vst [vmem:[%s4964_s27 + $0xd0] sm:$0xff] %v820_v26  ;;  %v824_v28 = vld [vmem:[%s4956_s23 + $0x1c0] sm:$0xff]  ;;  %v826_v29 = vld [vmem:[%s4956_s23 + $0x1d0] sm:$0xff]  ;;  %823 = vst [vmem:[%s4964_s27 + $0xd8] sm:$0xff] %v822_v27 }
  0x2c   : > { %825 = vst [vmem:[%s4964_s27 + $0xe0] sm:$0xff] %v824_v28  ;;  %827 = vst [vmem:[%s4964_s27 + $0xe8] sm:$0xff] %v826_v29  ;;  %v828_v30 = vld [vmem:[%s4956_s23 + $0x1e0] sm:$0xff]  ;;  %v830_v31 = vld [vmem:[%s4956_s23 + $0x1f0] sm:$0xff] }
  0x2d   : > { %v832_v32 = vld [vmem:[%s4956_s23 + $0x200] sm:$0xff]  ;;  %829 = vst [vmem:[%s4964_s27 + $0xf0] sm:$0xff] %v828_v30  ;;  %831 = vst [vmem:[%s4964_s27 + $0xf8] sm:$0xff] %v830_v31  ;;  %v834_v33 = vld [vmem:[%s4956_s23 + $0x210] sm:$0xff] }
  0x2e   : > { %833 = vst [vmem:[%s4964_s27 + $0x100] sm:$0xff] %v832_v32  ;;  %v836_v34 = vld [vmem:[%s4956_s23 + $0x220] sm:$0xff]  ;;  %v838_v35 = vld [vmem:[%s4956_s23 + $0x230] sm:$0xff]  ;;  %835 = vst [vmem:[%s4964_s27 + $0x108] sm:$0xff] %v834_v33 }
  0x2f   : > { %837 = vst [vmem:[%s4964_s27 + $0x110] sm:$0xff] %v836_v34  ;;  %839 = vst [vmem:[%s4964_s27 + $0x118] sm:$0xff] %v838_v35  ;;  %v840_v36 = vld [vmem:[%s4956_s23 + $0x240] sm:$0xff]  ;;  %v842_v37 = vld [vmem:[%s4956_s23 + $0x250] sm:$0xff] }
  0x30   : > { %v844_v38 = vld [vmem:[%s4956_s23 + $0x260] sm:$0xff]  ;;  %841 = vst [vmem:[%s4964_s27 + $0x120] sm:$0xff] %v840_v36  ;;  %843 = vst [vmem:[%s4964_s27 + $0x128] sm:$0xff] %v842_v37  ;;  %v846_v39 = vld [vmem:[%s4956_s23 + $0x270] sm:$0xff] }
  0x31   : > { %845 = vst [vmem:[%s4964_s27 + $0x130] sm:$0xff] %v844_v38  ;;  %v848_v40 = vld [vmem:[%s4956_s23 + $0x280] sm:$0xff]  ;;  %v850_v41 = vld [vmem:[%s4956_s23 + $0x290] sm:$0xff]  ;;  %847 = vst [vmem:[%s4964_s27 + $0x138] sm:$0xff] %v846_v39 }
  0x32   : > { %849 = vst [vmem:[%s4964_s27 + $0x140] sm:$0xff] %v848_v40  ;;  %851 = vst [vmem:[%s4964_s27 + $0x148] sm:$0xff] %v850_v41  ;;  %v852_v42 = vld [vmem:[%s4956_s23 + $0x2a0] sm:$0xff]  ;;  %v854_v43 = vld [vmem:[%s4956_s23 + $0x2b0] sm:$0xff] }
  0x33   : > { %v856_v44 = vld [vmem:[%s4956_s23 + $0x2c0] sm:$0xff]  ;;  %853 = vst [vmem:[%s4964_s27 + $0x150] sm:$0xff] %v852_v42  ;;  %855 = vst [vmem:[%s4964_s27 + $0x158] sm:$0xff] %v854_v43  ;;  %v858_v45 = vld [vmem:[%s4956_s23 + $0x2d0] sm:$0xff] }
  0x34   : > { %857 = vst [vmem:[%s4964_s27 + $0x160] sm:$0xff] %v856_v44  ;;  %v860_v46 = vld [vmem:[%s4956_s23 + $0x2e0] sm:$0xff]  ;;  %v862_v47 = vld [vmem:[%s4956_s23 + $0x2f0] sm:$0xff]  ;;  %859 = vst [vmem:[%s4964_s27 + $0x168] sm:$0xff] %v858_v45 }
  0x35   : > { %861 = vst [vmem:[%s4964_s27 + $0x170] sm:$0xff] %v860_v46  ;;  %863 = vst [vmem:[%s4964_s27 + $0x178] sm:$0xff] %v862_v47  ;;  %v864_v48 = vld [vmem:[%s4956_s23 + $0x300] sm:$0xff]  ;;  %v866_v49 = vld [vmem:[%s4956_s23 + $0x310] sm:$0xff] }
  0x36   : > { %v868_v50 = vld [vmem:[%s4956_s23 + $0x320] sm:$0xff]  ;;  %865 = vst [vmem:[%s4964_s27 + $0x180] sm:$0xff] %v864_v48  ;;  %867 = vst [vmem:[%s4964_s27 + $0x188] sm:$0xff] %v866_v49  ;;  %v870_v51 = vld [vmem:[%s4956_s23 + $0x330] sm:$0xff] }
  0x37   : > { %869 = vst [vmem:[%s4964_s27 + $0x190] sm:$0xff] %v868_v50  ;;  %v872_v52 = vld [vmem:[%s4956_s23 + $0x340] sm:$0xff]  ;;  %v874_v53 = vld [vmem:[%s4956_s23 + $0x350] sm:$0xff]  ;;  %871 = vst [vmem:[%s4964_s27 + $0x198] sm:$0xff] %v870_v51 }
  0x38   : > { %873 = vst [vmem:[%s4964_s27 + $0x1a0] sm:$0xff] %v872_v52  ;;  %875 = vst [vmem:[%s4964_s27 + $0x1a8] sm:$0xff] %v874_v53  ;;  %v876_v54 = vld [vmem:[%s4956_s23 + $0x360] sm:$0xff]  ;;  %v878_v55 = vld [vmem:[%s4956_s23 + $0x370] sm:$0xff] }
  0x39   : > { %v880_v56 = vld [vmem:[%s4956_s23 + $0x380] sm:$0xff]  ;;  %877 = vst [vmem:[%s4964_s27 + $0x1b0] sm:$0xff] %v876_v54  ;;  %879 = vst [vmem:[%s4964_s27 + $0x1b8] sm:$0xff] %v878_v55  ;;  %v882_v57 = vld [vmem:[%s4956_s23 + $0x390] sm:$0xff] }
  0x3a   : > { %881 = vst [vmem:[%s4964_s27 + $0x1c0] sm:$0xff] %v880_v56  ;;  %v884_v58 = vld [vmem:[%s4956_s23 + $0x3a0] sm:$0xff]  ;;  %v886_v59 = vld [vmem:[%s4956_s23 + $0x3b0] sm:$0xff]  ;;  %883 = vst [vmem:[%s4964_s27 + $0x1c8] sm:$0xff] %v882_v57 }
  0x3b   : > { %885 = vst [vmem:[%s4964_s27 + $0x1d0] sm:$0xff] %v884_v58  ;;  %887 = vst [vmem:[%s4964_s27 + $0x1d8] sm:$0xff] %v886_v59  ;;  %v888_v60 = vld [vmem:[%s4956_s23 + $0x3c0] sm:$0xff]  ;;  %v890_v61 = vld [vmem:[%s4956_s23 + $0x3d0] sm:$0xff] }
  0x3c   : > { %v892_v62 = vld [vmem:[%s4956_s23 + $0x3e0] sm:$0xff]  ;;  %889 = vst [vmem:[%s4964_s27 + $0x1e0] sm:$0xff] %v888_v60  ;;  %891 = vst [vmem:[%s4964_s27 + $0x1e8] sm:$0xff] %v890_v61  ;;  %v894_v63 = vld [vmem:[%s4956_s23 + $0x3f0] sm:$0xff] }
  0x3d   : > { %893 = vst [vmem:[%s4964_s27 + $0x1f0] sm:$0xff] %v892_v62  ;;  %v896_v0 = vld [vmem:[%s4956_s23 + $0x400] sm:$0xff]  ;;  %v898_v1 = vld [vmem:[%s4956_s23 + $0x410] sm:$0xff]  ;;  %895 = vst [vmem:[%s4964_s27 + $0x1f8] sm:$0xff] %v894_v63 }
  0x3e   : > { %897 = vst [vmem:[%s4964_s27 + $0x200] sm:$0xff] %v896_v0  ;;  %899 = vst [vmem:[%s4964_s27 + $0x208] sm:$0xff] %v898_v1  ;;  %v900_v2 = vld [vmem:[%s4956_s23 + $0x420] sm:$0xff]  ;;  %v902_v3 = vld [vmem:[%s4956_s23 + $0x430] sm:$0xff] }
  0x3f   : > { %v904_v4 = vld [vmem:[%s4956_s23 + $0x440] sm:$0xff]  ;;  %901 = vst [vmem:[%s4964_s27 + $0x210] sm:$0xff] %v900_v2  ;;  %903 = vst [vmem:[%s4964_s27 + $0x218] sm:$0xff] %v902_v3  ;;  %v906_v5 = vld [vmem:[%s4956_s23 + $0x450] sm:$0xff] }
  0x40   : > { %905 = vst [vmem:[%s4964_s27 + $0x220] sm:$0xff] %v904_v4  ;;  %v908_v6 = vld [vmem:[%s4956_s23 + $0x460] sm:$0xff]  ;;  %v910_v7 = vld [vmem:[%s4956_s23 + $0x470] sm:$0xff]  ;;  %907 = vst [vmem:[%s4964_s27 + $0x228] sm:$0xff] %v906_v5 }
  0x41   : > { %909 = vst [vmem:[%s4964_s27 + $0x230] sm:$0xff] %v908_v6  ;;  %911 = vst [vmem:[%s4964_s27 + $0x238] sm:$0xff] %v910_v7  ;;  %v912_v8 = vld [vmem:[%s4956_s23 + $0x480] sm:$0xff]  ;;  %v914_v9 = vld [vmem:[%s4956_s23 + $0x490] sm:$0xff] }
  0x42   : > { %v916_v10 = vld [vmem:[%s4956_s23 + $0x4a0] sm:$0xff]  ;;  %913 = vst [vmem:[%s4964_s27 + $0x240] sm:$0xff] %v912_v8  ;;  %915 = vst [vmem:[%s4964_s27 + $0x248] sm:$0xff] %v914_v9  ;;  %v918_v11 = vld [vmem:[%s4956_s23 + $0x4b0] sm:$0xff] }
  0x43   : > { %917 = vst [vmem:[%s4964_s27 + $0x250] sm:$0xff] %v916_v10  ;;  %v920_v12 = vld [vmem:[%s4956_s23 + $0x4c0] sm:$0xff]  ;;  %v922_v13 = vld [vmem:[%s4956_s23 + $0x4d0] sm:$0xff]  ;;  %919 = vst [vmem:[%s4964_s27 + $0x258] sm:$0xff] %v918_v11 }
  0x44   : > { %921 = vst [vmem:[%s4964_s27 + $0x260] sm:$0xff] %v920_v12  ;;  %923 = vst [vmem:[%s4964_s27 + $0x268] sm:$0xff] %v922_v13  ;;  %v924_v14 = vld [vmem:[%s4956_s23 + $0x4e0] sm:$0xff]  ;;  %v926_v15 = vld [vmem:[%s4956_s23 + $0x4f0] sm:$0xff] }
  0x45   : > { %v928_v16 = vld [vmem:[%s4956_s23 + $0x500] sm:$0xff]  ;;  %925 = vst [vmem:[%s4964_s27 + $0x270] sm:$0xff] %v924_v14  ;;  %927 = vst [vmem:[%s4964_s27 + $0x278] sm:$0xff] %v926_v15  ;;  %v930_v17 = vld [vmem:[%s4956_s23 + $0x510] sm:$0xff] }
  0x46   : > { %929 = vst [vmem:[%s4964_s27 + $0x280] sm:$0xff] %v928_v16  ;;  %v932_v18 = vld [vmem:[%s4956_s23 + $0x520] sm:$0xff]  ;;  %v934_v19 = vld [vmem:[%s4956_s23 + $0x530] sm:$0xff]  ;;  %931 = vst [vmem:[%s4964_s27 + $0x288] sm:$0xff] %v930_v17 }
  0x47   : > { %933 = vst [vmem:[%s4964_s27 + $0x290] sm:$0xff] %v932_v18  ;;  %935 = vst [vmem:[%s4964_s27 + $0x298] sm:$0xff] %v934_v19  ;;  %v936_v20 = vld [vmem:[%s4956_s23 + $0x540] sm:$0xff]  ;;  %v938_v21 = vld [vmem:[%s4956_s23 + $0x550] sm:$0xff] }
  0x48   : > { %v940_v22 = vld [vmem:[%s4956_s23 + $0x560] sm:$0xff]  ;;  %937 = vst [vmem:[%s4964_s27 + $0x2a0] sm:$0xff] %v936_v20  ;;  %939 = vst [vmem:[%s4964_s27 + $0x2a8] sm:$0xff] %v938_v21  ;;  %v942_v23 = vld [vmem:[%s4956_s23 + $0x570] sm:$0xff] }
  0x49   : > { %941 = vst [vmem:[%s4964_s27 + $0x2b0] sm:$0xff] %v940_v22  ;;  %v944_v24 = vld [vmem:[%s4956_s23 + $0x580] sm:$0xff]  ;;  %v946_v25 = vld [vmem:[%s4956_s23 + $0x590] sm:$0xff]  ;;  %943 = vst [vmem:[%s4964_s27 + $0x2b8] sm:$0xff] %v942_v23 }
  0x4a   : > { %945 = vst [vmem:[%s4964_s27 + $0x2c0] sm:$0xff] %v944_v24  ;;  %947 = vst [vmem:[%s4964_s27 + $0x2c8] sm:$0xff] %v946_v25  ;;  %v948_v26 = vld [vmem:[%s4956_s23 + $0x5a0] sm:$0xff]  ;;  %v950_v27 = vld [vmem:[%s4956_s23 + $0x5b0] sm:$0xff] }
  0x4b   : > { %v952_v28 = vld [vmem:[%s4956_s23 + $0x5c0] sm:$0xff]  ;;  %949 = vst [vmem:[%s4964_s27 + $0x2d0] sm:$0xff] %v948_v26  ;;  %951 = vst [vmem:[%s4964_s27 + $0x2d8] sm:$0xff] %v950_v27  ;;  %v954_v29 = vld [vmem:[%s4956_s23 + $0x5d0] sm:$0xff] }
  0x4c   : > { %953 = vst [vmem:[%s4964_s27 + $0x2e0] sm:$0xff] %v952_v28  ;;  %v956_v30 = vld [vmem:[%s4956_s23 + $0x5e0] sm:$0xff]  ;;  %v958_v31 = vld [vmem:[%s4956_s23 + $0x5f0] sm:$0xff]  ;;  %955 = vst [vmem:[%s4964_s27 + $0x2e8] sm:$0xff] %v954_v29 }
  0x4d   : > { %957 = vst [vmem:[%s4964_s27 + $0x2f0] sm:$0xff] %v956_v30  ;;  %959 = vst [vmem:[%s4964_s27 + $0x2f8] sm:$0xff] %v958_v31  ;;  %v960_v32 = vld [vmem:[%s4956_s23 + $0x600] sm:$0xff]  ;;  %v962_v33 = vld [vmem:[%s4956_s23 + $0x610] sm:$0xff] }
  0x4e   : > { %v964_v34 = vld [vmem:[%s4956_s23 + $0x620] sm:$0xff]  ;;  %961 = vst [vmem:[%s4964_s27 + $0x300] sm:$0xff] %v960_v32  ;;  %963 = vst [vmem:[%s4964_s27 + $0x308] sm:$0xff] %v962_v33  ;;  %v966_v35 = vld [vmem:[%s4956_s23 + $0x630] sm:$0xff] }
  0x4f   : > { %965 = vst [vmem:[%s4964_s27 + $0x310] sm:$0xff] %v964_v34  ;;  %v968_v36 = vld [vmem:[%s4956_s23 + $0x640] sm:$0xff]  ;;  %v970_v37 = vld [vmem:[%s4956_s23 + $0x650] sm:$0xff]  ;;  %967 = vst [vmem:[%s4964_s27 + $0x318] sm:$0xff] %v966_v35 }
  0x50   : > { %969 = vst [vmem:[%s4964_s27 + $0x320] sm:$0xff] %v968_v36  ;;  %971 = vst [vmem:[%s4964_s27 + $0x328] sm:$0xff] %v970_v37  ;;  %v972_v38 = vld [vmem:[%s4956_s23 + $0x660] sm:$0xff]  ;;  %v974_v39 = vld [vmem:[%s4956_s23 + $0x670] sm:$0xff] }
  0x51   : > { %v976_v40 = vld [vmem:[%s4956_s23 + $0x680] sm:$0xff]  ;;  %973 = vst [vmem:[%s4964_s27 + $0x330] sm:$0xff] %v972_v38  ;;  %975 = vst [vmem:[%s4964_s27 + $0x338] sm:$0xff] %v974_v39  ;;  %v978_v41 = vld [vmem:[%s4956_s23 + $0x690] sm:$0xff] }
  0x52   : > { %977 = vst [vmem:[%s4964_s27 + $0x340] sm:$0xff] %v976_v40  ;;  %v980_v42 = vld [vmem:[%s4956_s23 + $0x6a0] sm:$0xff]  ;;  %v982_v43 = vld [vmem:[%s4956_s23 + $0x6b0] sm:$0xff]  ;;  %979 = vst [vmem:[%s4964_s27 + $0x348] sm:$0xff] %v978_v41 }
  0x53   : > { %981 = vst [vmem:[%s4964_s27 + $0x350] sm:$0xff] %v980_v42  ;;  %983 = vst [vmem:[%s4964_s27 + $0x358] sm:$0xff] %v982_v43  ;;  %v984_v44 = vld [vmem:[%s4956_s23 + $0x6c0] sm:$0xff]  ;;  %v986_v45 = vld [vmem:[%s4956_s23 + $0x6d0] sm:$0xff] }
  0x54   : > { %v988_v46 = vld [vmem:[%s4956_s23 + $0x6e0] sm:$0xff]  ;;  %985 = vst [vmem:[%s4964_s27 + $0x360] sm:$0xff] %v984_v44  ;;  %987 = vst [vmem:[%s4964_s27 + $0x368] sm:$0xff] %v986_v45  ;;  %v990_v47 = vld [vmem:[%s4956_s23 + $0x6f0] sm:$0xff] }
  0x55   : > { %989 = vst [vmem:[%s4964_s27 + $0x370] sm:$0xff] %v988_v46  ;;  %v992_v48 = vld [vmem:[%s4956_s23 + $0x700] sm:$0xff]  ;;  %v994_v49 = vld [vmem:[%s4956_s23 + $0x710] sm:$0xff]  ;;  %991 = vst [vmem:[%s4964_s27 + $0x378] sm:$0xff] %v990_v47 }
  0x56   : > { %993 = vst [vmem:[%s4964_s27 + $0x380] sm:$0xff] %v992_v48  ;;  %995 = vst [vmem:[%s4964_s27 + $0x388] sm:$0xff] %v994_v49  ;;  %v996_v50 = vld [vmem:[%s4956_s23 + $0x720] sm:$0xff]  ;;  %v998_v51 = vld [vmem:[%s4956_s23 + $0x730] sm:$0xff] }
  0x57   : > { %v1000_v52 = vld [vmem:[%s4956_s23 + $0x740] sm:$0xff]  ;;  %997 = vst [vmem:[%s4964_s27 + $0x390] sm:$0xff] %v996_v50  ;;  %999 = vst [vmem:[%s4964_s27 + $0x398] sm:$0xff] %v998_v51  ;;  %v1002_v53 = vld [vmem:[%s4956_s23 + $0x750] sm:$0xff] }
  0x58   : > { %1001 = vst [vmem:[%s4964_s27 + $0x3a0] sm:$0xff] %v1000_v52  ;;  %v1004_v54 = vld [vmem:[%s4956_s23 + $0x760] sm:$0xff]  ;;  %v1006_v55 = vld [vmem:[%s4956_s23 + $0x770] sm:$0xff]  ;;  %1003 = vst [vmem:[%s4964_s27 + $0x3a8] sm:$0xff] %v1002_v53 }
  0x59   : > { %1005 = vst [vmem:[%s4964_s27 + $0x3b0] sm:$0xff] %v1004_v54  ;;  %1007 = vst [vmem:[%s4964_s27 + $0x3b8] sm:$0xff] %v1006_v55  ;;  %v1008_v56 = vld [vmem:[%s4956_s23 + $0x780] sm:$0xff]  ;;  %v1010_v57 = vld [vmem:[%s4956_s23 + $0x790] sm:$0xff] }
  0x5a   : > { %v1012_v58 = vld [vmem:[%s4956_s23 + $0x7a0] sm:$0xff]  ;;  %1009 = vst [vmem:[%s4964_s27 + $0x3c0] sm:$0xff] %v1008_v56  ;;  %1011 = vst [vmem:[%s4964_s27 + $0x3c8] sm:$0xff] %v1010_v57  ;;  %v1014_v59 = vld [vmem:[%s4956_s23 + $0x7b0] sm:$0xff] }
  0x5b   : > { %1013 = vst [vmem:[%s4964_s27 + $0x3d0] sm:$0xff] %v1012_v58  ;;  %v1016_v60 = vld [vmem:[%s4956_s23 + $0x7c0] sm:$0xff]  ;;  %v1018_v61 = vld [vmem:[%s4956_s23 + $0x7d0] sm:$0xff]  ;;  %1015 = vst [vmem:[%s4964_s27 + $0x3d8] sm:$0xff] %v1014_v59 }
  0x5c   : > { %1017 = vst [vmem:[%s4964_s27 + $0x3e0] sm:$0xff] %v1016_v60  ;;  %1019 = vst [vmem:[%s4964_s27 + $0x3e8] sm:$0xff] %v1018_v61  ;;  %v1020_v62 = vld [vmem:[%s4956_s23 + $0x7e0] sm:$0xff]  ;;  %v1022_v63 = vld [vmem:[%s4956_s23 + $0x7f0] sm:$0xff] }
  0x5d   : > { %v1024_v0 = vld [vmem:[%s4956_s23 + $0x800] sm:$0xff]  ;;  %1021 = vst [vmem:[%s4964_s27 + $0x3f0] sm:$0xff] %v1020_v62  ;;  %1023 = vst [vmem:[%s4964_s27 + $0x3f8] sm:$0xff] %v1022_v63  ;;  %v1026_v1 = vld [vmem:[%s4956_s23 + $0x810] sm:$0xff] }
  0x5e   : > { %1025 = vst [vmem:[%s4964_s27 + $0x400] sm:$0xff] %v1024_v0  ;;  %v1028_v2 = vld [vmem:[%s4956_s23 + $0x820] sm:$0xff]  ;;  %v1030_v3 = vld [vmem:[%s4956_s23 + $0x830] sm:$0xff]  ;;  %1027 = vst [vmem:[%s4964_s27 + $0x408] sm:$0xff] %v1026_v1 }
  0x5f   : > { %1029 = vst [vmem:[%s4964_s27 + $0x410] sm:$0xff] %v1028_v2  ;;  %1031 = vst [vmem:[%s4964_s27 + $0x418] sm:$0xff] %v1030_v3  ;;  %v1032_v4 = vld [vmem:[%s4956_s23 + $0x840] sm:$0xff]  ;;  %v1034_v5 = vld [vmem:[%s4956_s23 + $0x850] sm:$0xff] }
  0x60   : > { %v1036_v6 = vld [vmem:[%s4956_s23 + $0x860] sm:$0xff]  ;;  %1033 = vst [vmem:[%s4964_s27 + $0x420] sm:$0xff] %v1032_v4  ;;  %1035 = vst [vmem:[%s4964_s27 + $0x428] sm:$0xff] %v1034_v5  ;;  %v1038_v7 = vld [vmem:[%s4956_s23 + $0x870] sm:$0xff] }
  0x61   : > { %1037 = vst [vmem:[%s4964_s27 + $0x430] sm:$0xff] %v1036_v6  ;;  %v1040_v8 = vld [vmem:[%s4956_s23 + $0x880] sm:$0xff]  ;;  %v1042_v9 = vld [vmem:[%s4956_s23 + $0x890] sm:$0xff]  ;;  %1039 = vst [vmem:[%s4964_s27 + $0x438] sm:$0xff] %v1038_v7 }
  0x62   : > { %1041 = vst [vmem:[%s4964_s27 + $0x440] sm:$0xff] %v1040_v8  ;;  %1043 = vst [vmem:[%s4964_s27 + $0x448] sm:$0xff] %v1042_v9  ;;  %v1044_v10 = vld [vmem:[%s4956_s23 + $0x8a0] sm:$0xff]  ;;  %v1046_v11 = vld [vmem:[%s4956_s23 + $0x8b0] sm:$0xff] }
  0x63   : > { %v1048_v12 = vld [vmem:[%s4956_s23 + $0x8c0] sm:$0xff]  ;;  %1045 = vst [vmem:[%s4964_s27 + $0x450] sm:$0xff] %v1044_v10  ;;  %1047 = vst [vmem:[%s4964_s27 + $0x458] sm:$0xff] %v1046_v11  ;;  %v1050_v13 = vld [vmem:[%s4956_s23 + $0x8d0] sm:$0xff] }
  0x64   : > { %1049 = vst [vmem:[%s4964_s27 + $0x460] sm:$0xff] %v1048_v12  ;;  %v1052_v14 = vld [vmem:[%s4956_s23 + $0x8e0] sm:$0xff]  ;;  %v1054_v15 = vld [vmem:[%s4956_s23 + $0x8f0] sm:$0xff]  ;;  %1051 = vst [vmem:[%s4964_s27 + $0x468] sm:$0xff] %v1050_v13 }
  0x65   : > { %1053 = vst [vmem:[%s4964_s27 + $0x470] sm:$0xff] %v1052_v14  ;;  %1055 = vst [vmem:[%s4964_s27 + $0x478] sm:$0xff] %v1054_v15  ;;  %v1056_v16 = vld [vmem:[%s4956_s23 + $0x900] sm:$0xff]  ;;  %v1058_v17 = vld [vmem:[%s4956_s23 + $0x910] sm:$0xff] }
  0x66   : > { %v1060_v18 = vld [vmem:[%s4956_s23 + $0x920] sm:$0xff]  ;;  %1057 = vst [vmem:[%s4964_s27 + $0x480] sm:$0xff] %v1056_v16  ;;  %1059 = vst [vmem:[%s4964_s27 + $0x488] sm:$0xff] %v1058_v17  ;;  %v1062_v19 = vld [vmem:[%s4956_s23 + $0x930] sm:$0xff] }
  0x67   : > { %1061 = vst [vmem:[%s4964_s27 + $0x490] sm:$0xff] %v1060_v18  ;;  %v1064_v20 = vld [vmem:[%s4956_s23 + $0x940] sm:$0xff]  ;;  %v1066_v21 = vld [vmem:[%s4956_s23 + $0x950] sm:$0xff]  ;;  %1063 = vst [vmem:[%s4964_s27 + $0x498] sm:$0xff] %v1062_v19 }
  0x68   : > { %1065 = vst [vmem:[%s4964_s27 + $0x4a0] sm:$0xff] %v1064_v20  ;;  %1067 = vst [vmem:[%s4964_s27 + $0x4a8] sm:$0xff] %v1066_v21  ;;  %v1068_v22 = vld [vmem:[%s4956_s23 + $0x960] sm:$0xff]  ;;  %v1070_v23 = vld [vmem:[%s4956_s23 + $0x970] sm:$0xff] }
  0x69   : > { %v1072_v24 = vld [vmem:[%s4956_s23 + $0x980] sm:$0xff]  ;;  %1069 = vst [vmem:[%s4964_s27 + $0x4b0] sm:$0xff] %v1068_v22  ;;  %1071 = vst [vmem:[%s4964_s27 + $0x4b8] sm:$0xff] %v1070_v23  ;;  %v1074_v25 = vld [vmem:[%s4956_s23 + $0x990] sm:$0xff] }
  0x6a   : > { %1073 = vst [vmem:[%s4964_s27 + $0x4c0] sm:$0xff] %v1072_v24  ;;  %v1076_v26 = vld [vmem:[%s4956_s23 + $0x9a0] sm:$0xff]  ;;  %v1078_v27 = vld [vmem:[%s4956_s23 + $0x9b0] sm:$0xff]  ;;  %1075 = vst [vmem:[%s4964_s27 + $0x4c8] sm:$0xff] %v1074_v25 }
  0x6b   : > { %1077 = vst [vmem:[%s4964_s27 + $0x4d0] sm:$0xff] %v1076_v26  ;;  %1079 = vst [vmem:[%s4964_s27 + $0x4d8] sm:$0xff] %v1078_v27  ;;  %v1080_v28 = vld [vmem:[%s4956_s23 + $0x9c0] sm:$0xff]  ;;  %v1082_v29 = vld [vmem:[%s4956_s23 + $0x9d0] sm:$0xff] }
  0x6c   : > { %v1084_v30 = vld [vmem:[%s4956_s23 + $0x9e0] sm:$0xff]  ;;  %1081 = vst [vmem:[%s4964_s27 + $0x4e0] sm:$0xff] %v1080_v28  ;;  %1083 = vst [vmem:[%s4964_s27 + $0x4e8] sm:$0xff] %v1082_v29  ;;  %v1086_v31 = vld [vmem:[%s4956_s23 + $0x9f0] sm:$0xff] }
  0x6d   : > { %1085 = vst [vmem:[%s4964_s27 + $0x4f0] sm:$0xff] %v1084_v30  ;;  %v1088_v32 = vld [vmem:[%s4956_s23 + $0xa00] sm:$0xff]  ;;  %v1090_v33 = vld [vmem:[%s4956_s23 + $0xa10] sm:$0xff]  ;;  %1087 = vst [vmem:[%s4964_s27 + $0x4f8] sm:$0xff] %v1086_v31 }
  0x6e   : > { %1089 = vst [vmem:[%s4964_s27 + $0x500] sm:$0xff] %v1088_v32  ;;  %1091 = vst [vmem:[%s4964_s27 + $0x508] sm:$0xff] %v1090_v33  ;;  %v1092_v34 = vld [vmem:[%s4956_s23 + $0xa20] sm:$0xff]  ;;  %v1094_v35 = vld [vmem:[%s4956_s23 + $0xa30] sm:$0xff] }
  0x6f   : > { %v1096_v36 = vld [vmem:[%s4956_s23 + $0xa40] sm:$0xff]  ;;  %1093 = vst [vmem:[%s4964_s27 + $0x510] sm:$0xff] %v1092_v34  ;;  %1095 = vst [vmem:[%s4964_s27 + $0x518] sm:$0xff] %v1094_v35  ;;  %v1098_v37 = vld [vmem:[%s4956_s23 + $0xa50] sm:$0xff] }
  0x70   : > { %1097 = vst [vmem:[%s4964_s27 + $0x520] sm:$0xff] %v1096_v36  ;;  %v1100_v38 = vld [vmem:[%s4956_s23 + $0xa60] sm:$0xff]  ;;  %v1102_v39 = vld [vmem:[%s4956_s23 + $0xa70] sm:$0xff]  ;;  %1099 = vst [vmem:[%s4964_s27 + $0x528] sm:$0xff] %v1098_v37 }
  0x71   : > { %1101 = vst [vmem:[%s4964_s27 + $0x530] sm:$0xff] %v1100_v38  ;;  %1103 = vst [vmem:[%s4964_s27 + $0x538] sm:$0xff] %v1102_v39  ;;  %v1104_v40 = vld [vmem:[%s4956_s23 + $0xa80] sm:$0xff]  ;;  %v1106_v41 = vld [vmem:[%s4956_s23 + $0xa90] sm:$0xff] }
  0x72   : > { %v1108_v42 = vld [vmem:[%s4956_s23 + $0xaa0] sm:$0xff]  ;;  %1105 = vst [vmem:[%s4964_s27 + $0x540] sm:$0xff] %v1104_v40  ;;  %1107 = vst [vmem:[%s4964_s27 + $0x548] sm:$0xff] %v1106_v41  ;;  %v1110_v43 = vld [vmem:[%s4956_s23 + $0xab0] sm:$0xff] }
  0x73   : > { %1109 = vst [vmem:[%s4964_s27 + $0x550] sm:$0xff] %v1108_v42  ;;  %v1112_v44 = vld [vmem:[%s4956_s23 + $0xac0] sm:$0xff]  ;;  %v1114_v45 = vld [vmem:[%s4956_s23 + $0xad0] sm:$0xff]  ;;  %1111 = vst [vmem:[%s4964_s27 + $0x558] sm:$0xff] %v1110_v43 }
  0x74   : > { %1113 = vst [vmem:[%s4964_s27 + $0x560] sm:$0xff] %v1112_v44  ;;  %1115 = vst [vmem:[%s4964_s27 + $0x568] sm:$0xff] %v1114_v45  ;;  %v1116_v46 = vld [vmem:[%s4956_s23 + $0xae0] sm:$0xff]  ;;  %v1118_v47 = vld [vmem:[%s4956_s23 + $0xaf0] sm:$0xff] }
  0x75   : > { %v1120_v48 = vld [vmem:[%s4956_s23 + $0xb00] sm:$0xff]  ;;  %1117 = vst [vmem:[%s4964_s27 + $0x570] sm:$0xff] %v1116_v46  ;;  %1119 = vst [vmem:[%s4964_s27 + $0x578] sm:$0xff] %v1118_v47  ;;  %v1122_v49 = vld [vmem:[%s4956_s23 + $0xb10] sm:$0xff] }
  0x76   : > { %1121 = vst [vmem:[%s4964_s27 + $0x580] sm:$0xff] %v1120_v48  ;;  %v1124_v50 = vld [vmem:[%s4956_s23 + $0xb20] sm:$0xff]  ;;  %v1126_v51 = vld [vmem:[%s4956_s23 + $0xb30] sm:$0xff]  ;;  %1123 = vst [vmem:[%s4964_s27 + $0x588] sm:$0xff] %v1122_v49 }
  0x77   : > { %1125 = vst [vmem:[%s4964_s27 + $0x590] sm:$0xff] %v1124_v50  ;;  %1127 = vst [vmem:[%s4964_s27 + $0x598] sm:$0xff] %v1126_v51  ;;  %v1128_v52 = vld [vmem:[%s4956_s23 + $0xb40] sm:$0xff]  ;;  %v1130_v53 = vld [vmem:[%s4956_s23 + $0xb50] sm:$0xff] }
  0x78   : > { %v1132_v54 = vld [vmem:[%s4956_s23 + $0xb60] sm:$0xff]  ;;  %1129 = vst [vmem:[%s4964_s27 + $0x5a0] sm:$0xff] %v1128_v52  ;;  %1131 = vst [vmem:[%s4964_s27 + $0x5a8] sm:$0xff] %v1130_v53  ;;  %v1134_v55 = vld [vmem:[%s4956_s23 + $0xb70] sm:$0xff] }
  0x79   : > { %1133 = vst [vmem:[%s4964_s27 + $0x5b0] sm:$0xff] %v1132_v54  ;;  %v1136_v56 = vld [vmem:[%s4956_s23 + $0xb80] sm:$0xff]  ;;  %v1138_v57 = vld [vmem:[%s4956_s23 + $0xb90] sm:$0xff]  ;;  %1135 = vst [vmem:[%s4964_s27 + $0x5b8] sm:$0xff] %v1134_v55 }
  0x7a   : > { %1137 = vst [vmem:[%s4964_s27 + $0x5c0] sm:$0xff] %v1136_v56  ;;  %1139 = vst [vmem:[%s4964_s27 + $0x5c8] sm:$0xff] %v1138_v57  ;;  %v1140_v58 = vld [vmem:[%s4956_s23 + $0xba0] sm:$0xff]  ;;  %v1142_v59 = vld [vmem:[%s4956_s23 + $0xbb0] sm:$0xff] }
  0x7b   : > { %v1144_v60 = vld [vmem:[%s4956_s23 + $0xbc0] sm:$0xff]  ;;  %1141 = vst [vmem:[%s4964_s27 + $0x5d0] sm:$0xff] %v1140_v58  ;;  %1143 = vst [vmem:[%s4964_s27 + $0x5d8] sm:$0xff] %v1142_v59  ;;  %v1146_v61 = vld [vmem:[%s4956_s23 + $0xbd0] sm:$0xff] }
  0x7c   : > { %1145 = vst [vmem:[%s4964_s27 + $0x5e0] sm:$0xff] %v1144_v60  ;;  %v1148_v62 = vld [vmem:[%s4956_s23 + $0xbe0] sm:$0xff]  ;;  %v1150_v63 = vld [vmem:[%s4956_s23 + $0xbf0] sm:$0xff]  ;;  %1147 = vst [vmem:[%s4964_s27 + $0x5e8] sm:$0xff] %v1146_v61 }
  0x7d   : > { %1149 = vst [vmem:[%s4964_s27 + $0x5f0] sm:$0xff] %v1148_v62  ;;  %1151 = vst [vmem:[%s4964_s27 + $0x5f8] sm:$0xff] %v1150_v63  ;;  %v1152_v0 = vld [vmem:[%s4956_s23 + $0xc00] sm:$0xff]  ;;  %v1154_v1 = vld [vmem:[%s4956_s23 + $0xc10] sm:$0xff] }
  0x7e   : > { %v1156_v2 = vld [vmem:[%s4956_s23 + $0xc20] sm:$0xff]  ;;  %1153 = vst [vmem:[%s4964_s27 + $0x600] sm:$0xff] %v1152_v0  ;;  %1155 = vst [vmem:[%s4964_s27 + $0x608] sm:$0xff] %v1154_v1  ;;  %v1158_v3 = vld [vmem:[%s4956_s23 + $0xc30] sm:$0xff] }
  0x7f   : > { %1157 = vst [vmem:[%s4964_s27 + $0x610] sm:$0xff] %v1156_v2  ;;  %v1160_v4 = vld [vmem:[%s4956_s23 + $0xc40] sm:$0xff]  ;;  %v1162_v5 = vld [vmem:[%s4956_s23 + $0xc50] sm:$0xff]  ;;  %1159 = vst [vmem:[%s4964_s27 + $0x618] sm:$0xff] %v1158_v3 }
  0x80   : > { %1161 = vst [vmem:[%s4964_s27 + $0x620] sm:$0xff] %v1160_v4  ;;  %1163 = vst [vmem:[%s4964_s27 + $0x628] sm:$0xff] %v1162_v5  ;;  %v1164_v6 = vld [vmem:[%s4956_s23 + $0xc60] sm:$0xff]  ;;  %v1166_v7 = vld [vmem:[%s4956_s23 + $0xc70] sm:$0xff] }
  0x81   : > { %v1168_v8 = vld [vmem:[%s4956_s23 + $0xc80] sm:$0xff]  ;;  %1165 = vst [vmem:[%s4964_s27 + $0x630] sm:$0xff] %v1164_v6  ;;  %1167 = vst [vmem:[%s4964_s27 + $0x638] sm:$0xff] %v1166_v7  ;;  %v1170_v9 = vld [vmem:[%s4956_s23 + $0xc90] sm:$0xff] }
  0x82   : > { %1169 = vst [vmem:[%s4964_s27 + $0x640] sm:$0xff] %v1168_v8  ;;  %v1172_v10 = vld [vmem:[%s4956_s23 + $0xca0] sm:$0xff]  ;;  %v1174_v11 = vld [vmem:[%s4956_s23 + $0xcb0] sm:$0xff]  ;;  %1171 = vst [vmem:[%s4964_s27 + $0x648] sm:$0xff] %v1170_v9 }
  0x83   : > { %1173 = vst [vmem:[%s4964_s27 + $0x650] sm:$0xff] %v1172_v10  ;;  %1175 = vst [vmem:[%s4964_s27 + $0x658] sm:$0xff] %v1174_v11  ;;  %v1176_v12 = vld [vmem:[%s4956_s23 + $0xcc0] sm:$0xff]  ;;  %v1178_v13 = vld [vmem:[%s4956_s23 + $0xcd0] sm:$0xff] }
  0x84   : > { %v1180_v14 = vld [vmem:[%s4956_s23 + $0xce0] sm:$0xff]  ;;  %1177 = vst [vmem:[%s4964_s27 + $0x660] sm:$0xff] %v1176_v12  ;;  %1179 = vst [vmem:[%s4964_s27 + $0x668] sm:$0xff] %v1178_v13  ;;  %v1182_v15 = vld [vmem:[%s4956_s23 + $0xcf0] sm:$0xff] }
  0x85   : > { %1181 = vst [vmem:[%s4964_s27 + $0x670] sm:$0xff] %v1180_v14  ;;  %v1184_v16 = vld [vmem:[%s4956_s23 + $0xd00] sm:$0xff]  ;;  %v1186_v17 = vld [vmem:[%s4956_s23 + $0xd10] sm:$0xff]  ;;  %1183 = vst [vmem:[%s4964_s27 + $0x678] sm:$0xff] %v1182_v15 }
  0x86   : > { %1185 = vst [vmem:[%s4964_s27 + $0x680] sm:$0xff] %v1184_v16  ;;  %1187 = vst [vmem:[%s4964_s27 + $0x688] sm:$0xff] %v1186_v17  ;;  %v1188_v18 = vld [vmem:[%s4956_s23 + $0xd20] sm:$0xff]  ;;  %v1190_v19 = vld [vmem:[%s4956_s23 + $0xd30] sm:$0xff] }
  0x87   : > { %v1192_v20 = vld [vmem:[%s4956_s23 + $0xd40] sm:$0xff]  ;;  %1189 = vst [vmem:[%s4964_s27 + $0x690] sm:$0xff] %v1188_v18  ;;  %1191 = vst [vmem:[%s4964_s27 + $0x698] sm:$0xff] %v1190_v19  ;;  %v1194_v21 = vld [vmem:[%s4956_s23 + $0xd50] sm:$0xff] }
  0x88   : > { %1193 = vst [vmem:[%s4964_s27 + $0x6a0] sm:$0xff] %v1192_v20  ;;  %v1196_v22 = vld [vmem:[%s4956_s23 + $0xd60] sm:$0xff]  ;;  %v1198_v23 = vld [vmem:[%s4956_s23 + $0xd70] sm:$0xff]  ;;  %1195 = vst [vmem:[%s4964_s27 + $0x6a8] sm:$0xff] %v1194_v21 }
  0x89   : > { %1197 = vst [vmem:[%s4964_s27 + $0x6b0] sm:$0xff] %v1196_v22  ;;  %1199 = vst [vmem:[%s4964_s27 + $0x6b8] sm:$0xff] %v1198_v23  ;;  %v1200_v24 = vld [vmem:[%s4956_s23 + $0xd80] sm:$0xff]  ;;  %v1202_v25 = vld [vmem:[%s4956_s23 + $0xd90] sm:$0xff] }
  0x8a   : > { %v1204_v26 = vld [vmem:[%s4956_s23 + $0xda0] sm:$0xff]  ;;  %1201 = vst [vmem:[%s4964_s27 + $0x6c0] sm:$0xff] %v1200_v24  ;;  %1203 = vst [vmem:[%s4964_s27 + $0x6c8] sm:$0xff] %v1202_v25  ;;  %v1206_v27 = vld [vmem:[%s4956_s23 + $0xdb0] sm:$0xff] }
  0x8b   : > { %1205 = vst [vmem:[%s4964_s27 + $0x6d0] sm:$0xff] %v1204_v26  ;;  %v1208_v28 = vld [vmem:[%s4956_s23 + $0xdc0] sm:$0xff]  ;;  %v1210_v29 = vld [vmem:[%s4956_s23 + $0xdd0] sm:$0xff]  ;;  %1207 = vst [vmem:[%s4964_s27 + $0x6d8] sm:$0xff] %v1206_v27 }
  0x8c   : > { %1209 = vst [vmem:[%s4964_s27 + $0x6e0] sm:$0xff] %v1208_v28  ;;  %1211 = vst [vmem:[%s4964_s27 + $0x6e8] sm:$0xff] %v1210_v29  ;;  %v1212_v30 = vld [vmem:[%s4956_s23 + $0xde0] sm:$0xff]  ;;  %v1214_v31 = vld [vmem:[%s4956_s23 + $0xdf0] sm:$0xff] }
  0x8d   : > { %v1216_v32 = vld [vmem:[%s4956_s23 + $0xe00] sm:$0xff]  ;;  %1213 = vst [vmem:[%s4964_s27 + $0x6f0] sm:$0xff] %v1212_v30  ;;  %1215 = vst [vmem:[%s4964_s27 + $0x6f8] sm:$0xff] %v1214_v31  ;;  %v1218_v33 = vld [vmem:[%s4956_s23 + $0xe10] sm:$0xff] }
  0x8e   : > { %1217 = vst [vmem:[%s4964_s27 + $0x700] sm:$0xff] %v1216_v32  ;;  %v1220_v34 = vld [vmem:[%s4956_s23 + $0xe20] sm:$0xff]  ;;  %v1222_v35 = vld [vmem:[%s4956_s23 + $0xe30] sm:$0xff]  ;;  %1219 = vst [vmem:[%s4964_s27 + $0x708] sm:$0xff] %v1218_v33 }
  0x8f   : > { %1221 = vst [vmem:[%s4964_s27 + $0x710] sm:$0xff] %v1220_v34  ;;  %1223 = vst [vmem:[%s4964_s27 + $0x718] sm:$0xff] %v1222_v35  ;;  %v1224_v36 = vld [vmem:[%s4956_s23 + $0xe40] sm:$0xff]  ;;  %v1226_v37 = vld [vmem:[%s4956_s23 + $0xe50] sm:$0xff] }
  0x90   : > { %v1228_v38 = vld [vmem:[%s4956_s23 + $0xe60] sm:$0xff]  ;;  %1225 = vst [vmem:[%s4964_s27 + $0x720] sm:$0xff] %v1224_v36  ;;  %1227 = vst [vmem:[%s4964_s27 + $0x728] sm:$0xff] %v1226_v37  ;;  %v1230_v39 = vld [vmem:[%s4956_s23 + $0xe70] sm:$0xff] }
  0x91   : > { %1229 = vst [vmem:[%s4964_s27 + $0x730] sm:$0xff] %v1228_v38  ;;  %v1232_v40 = vld [vmem:[%s4956_s23 + $0xe80] sm:$0xff]  ;;  %v1234_v41 = vld [vmem:[%s4956_s23 + $0xe90] sm:$0xff]  ;;  %1231 = vst [vmem:[%s4964_s27 + $0x738] sm:$0xff] %v1230_v39 }
  0x92   : > { %1233 = vst [vmem:[%s4964_s27 + $0x740] sm:$0xff] %v1232_v40  ;;  %1235 = vst [vmem:[%s4964_s27 + $0x748] sm:$0xff] %v1234_v41  ;;  %v1236_v42 = vld [vmem:[%s4956_s23 + $0xea0] sm:$0xff]  ;;  %v1238_v43 = vld [vmem:[%s4956_s23 + $0xeb0] sm:$0xff] }
  0x93   : > { %v1240_v44 = vld [vmem:[%s4956_s23 + $0xec0] sm:$0xff]  ;;  %1237 = vst [vmem:[%s4964_s27 + $0x750] sm:$0xff] %v1236_v42  ;;  %1239 = vst [vmem:[%s4964_s27 + $0x758] sm:$0xff] %v1238_v43  ;;  %v1242_v45 = vld [vmem:[%s4956_s23 + $0xed0] sm:$0xff] }
  0x94   : > { %1241 = vst [vmem:[%s4964_s27 + $0x760] sm:$0xff] %v1240_v44  ;;  %v1244_v46 = vld [vmem:[%s4956_s23 + $0xee0] sm:$0xff]  ;;  %v1246_v47 = vld [vmem:[%s4956_s23 + $0xef0] sm:$0xff]  ;;  %1243 = vst [vmem:[%s4964_s27 + $0x768] sm:$0xff] %v1242_v45 }
  0x95   : > { %1245 = vst [vmem:[%s4964_s27 + $0x770] sm:$0xff] %v1244_v46  ;;  %1247 = vst [vmem:[%s4964_s27 + $0x778] sm:$0xff] %v1246_v47  ;;  %v1248_v48 = vld [vmem:[%s4956_s23 + $0xf00] sm:$0xff]  ;;  %v1250_v49 = vld [vmem:[%s4956_s23 + $0xf10] sm:$0xff] }
  0x96   : > { %v1252_v50 = vld [vmem:[%s4956_s23 + $0xf20] sm:$0xff]  ;;  %1249 = vst [vmem:[%s4964_s27 + $0x780] sm:$0xff] %v1248_v48  ;;  %1251 = vst [vmem:[%s4964_s27 + $0x788] sm:$0xff] %v1250_v49  ;;  %v1254_v51 = vld [vmem:[%s4956_s23 + $0xf30] sm:$0xff] }
  0x97   : > { %1253 = vst [vmem:[%s4964_s27 + $0x790] sm:$0xff] %v1252_v50  ;;  %v1256_v52 = vld [vmem:[%s4956_s23 + $0xf40] sm:$0xff]  ;;  %v1258_v53 = vld [vmem:[%s4956_s23 + $0xf50] sm:$0xff]  ;;  %1255 = vst [vmem:[%s4964_s27 + $0x798] sm:$0xff] %v1254_v51 }
  0x98   : > { %1257 = vst [vmem:[%s4964_s27 + $0x7a0] sm:$0xff] %v1256_v52  ;;  %1259 = vst [vmem:[%s4964_s27 + $0x7a8] sm:$0xff] %v1258_v53  ;;  %v1260_v54 = vld [vmem:[%s4956_s23 + $0xf60] sm:$0xff]  ;;  %v1262_v55 = vld [vmem:[%s4956_s23 + $0xf70] sm:$0xff] }
  0x99   : > { %v1264_v56 = vld [vmem:[%s4956_s23 + $0xf80] sm:$0xff]  ;;  %1261 = vst [vmem:[%s4964_s27 + $0x7b0] sm:$0xff] %v1260_v54  ;;  %1263 = vst [vmem:[%s4964_s27 + $0x7b8] sm:$0xff] %v1262_v55  ;;  %v1266_v57 = vld [vmem:[%s4956_s23 + $0xf90] sm:$0xff] }
  0x9a   : > { %1265 = vst [vmem:[%s4964_s27 + $0x7c0] sm:$0xff] %v1264_v56  ;;  %v1268_v58 = vld [vmem:[%s4956_s23 + $0xfa0] sm:$0xff]  ;;  %v1270_v59 = vld [vmem:[%s4956_s23 + $0xfb0] sm:$0xff]  ;;  %1267 = vst [vmem:[%s4964_s27 + $0x7c8] sm:$0xff] %v1266_v57 }
  0x9b   : > { %1269 = vst [vmem:[%s4964_s27 + $0x7d0] sm:$0xff] %v1268_v58  ;;  %1271 = vst [vmem:[%s4964_s27 + $0x7d8] sm:$0xff] %v1270_v59  ;;  %v1272_v60 = vld [vmem:[%s4956_s23 + $0xfc0] sm:$0xff]  ;;  %v1274_v61 = vld [vmem:[%s4956_s23 + $0xfd0] sm:$0xff] }
  0x9c   : > { %v1276_v62 = vld [vmem:[%s4956_s23 + $0xfe0] sm:$0xff]  ;;  %1273 = vst [vmem:[%s4964_s27 + $0x7e0] sm:$0xff] %v1272_v60  ;;  %1275 = vst [vmem:[%s4964_s27 + $0x7e8] sm:$0xff] %v1274_v61  ;;  %v1278_v63 = vld [vmem:[%s4956_s23 + $0xff0] sm:$0xff] }
  0x9d   : > { %1277 = vst [vmem:[%s4964_s27 + $0x7f0] sm:$0xff] %v1276_v62  ;;  %v1280_v0 = vld [vmem:[%s4956_s23 + $0x1000] sm:$0xff]  ;;  %v1282_v1 = vld [vmem:[%s4956_s23 + $0x1010] sm:$0xff]  ;;  %1279 = vst [vmem:[%s4964_s27 + $0x7f8] sm:$0xff] %v1278_v63 }
  0x9e   : > { %1281 = vst [vmem:[%s4964_s27 + $0x800] sm:$0xff] %v1280_v0  ;;  %1283 = vst [vmem:[%s4964_s27 + $0x808] sm:$0xff] %v1282_v1  ;;  %v1284_v2 = vld [vmem:[%s4956_s23 + $0x1020] sm:$0xff]  ;;  %v1286_v3 = vld [vmem:[%s4956_s23 + $0x1030] sm:$0xff] }
  0x9f   : > { %v1288_v4 = vld [vmem:[%s4956_s23 + $0x1040] sm:$0xff]  ;;  %1285 = vst [vmem:[%s4964_s27 + $0x810] sm:$0xff] %v1284_v2  ;;  %1287 = vst [vmem:[%s4964_s27 + $0x818] sm:$0xff] %v1286_v3  ;;  %v1290_v5 = vld [vmem:[%s4956_s23 + $0x1050] sm:$0xff] }
  0xa0   : > { %1289 = vst [vmem:[%s4964_s27 + $0x820] sm:$0xff] %v1288_v4  ;;  %v1292_v6 = vld [vmem:[%s4956_s23 + $0x1060] sm:$0xff]  ;;  %v1294_v7 = vld [vmem:[%s4956_s23 + $0x1070] sm:$0xff]  ;;  %1291 = vst [vmem:[%s4964_s27 + $0x828] sm:$0xff] %v1290_v5 }
  0xa1   : > { %1293 = vst [vmem:[%s4964_s27 + $0x830] sm:$0xff] %v1292_v6  ;;  %1295 = vst [vmem:[%s4964_s27 + $0x838] sm:$0xff] %v1294_v7  ;;  %v1296_v8 = vld [vmem:[%s4956_s23 + $0x1080] sm:$0xff]  ;;  %v1298_v9 = vld [vmem:[%s4956_s23 + $0x1090] sm:$0xff] }
  0xa2   : > { %v1300_v10 = vld [vmem:[%s4956_s23 + $0x10a0] sm:$0xff]  ;;  %1297 = vst [vmem:[%s4964_s27 + $0x840] sm:$0xff] %v1296_v8  ;;  %1299 = vst [vmem:[%s4964_s27 + $0x848] sm:$0xff] %v1298_v9  ;;  %v1302_v11 = vld [vmem:[%s4956_s23 + $0x10b0] sm:$0xff] }
  0xa3   : > { %1301 = vst [vmem:[%s4964_s27 + $0x850] sm:$0xff] %v1300_v10  ;;  %v1304_v12 = vld [vmem:[%s4956_s23 + $0x10c0] sm:$0xff]  ;;  %v1306_v13 = vld [vmem:[%s4956_s23 + $0x10d0] sm:$0xff]  ;;  %1303 = vst [vmem:[%s4964_s27 + $0x858] sm:$0xff] %v1302_v11 }
  0xa4   : > { %1305 = vst [vmem:[%s4964_s27 + $0x860] sm:$0xff] %v1304_v12  ;;  %1307 = vst [vmem:[%s4964_s27 + $0x868] sm:$0xff] %v1306_v13  ;;  %v1308_v14 = vld [vmem:[%s4956_s23 + $0x10e0] sm:$0xff]  ;;  %v1310_v15 = vld [vmem:[%s4956_s23 + $0x10f0] sm:$0xff] }
  0xa5   : > { %v1312_v16 = vld [vmem:[%s4956_s23 + $0x1100] sm:$0xff]  ;;  %1309 = vst [vmem:[%s4964_s27 + $0x870] sm:$0xff] %v1308_v14  ;;  %1311 = vst [vmem:[%s4964_s27 + $0x878] sm:$0xff] %v1310_v15  ;;  %v1314_v17 = vld [vmem:[%s4956_s23 + $0x1110] sm:$0xff] }
  0xa6   : > { %1313 = vst [vmem:[%s4964_s27 + $0x880] sm:$0xff] %v1312_v16  ;;  %v1316_v18 = vld [vmem:[%s4956_s23 + $0x1120] sm:$0xff]  ;;  %v1318_v19 = vld [vmem:[%s4956_s23 + $0x1130] sm:$0xff]  ;;  %1315 = vst [vmem:[%s4964_s27 + $0x888] sm:$0xff] %v1314_v17 }
  0xa7   : > { %1317 = vst [vmem:[%s4964_s27 + $0x890] sm:$0xff] %v1316_v18  ;;  %1319 = vst [vmem:[%s4964_s27 + $0x898] sm:$0xff] %v1318_v19  ;;  %v1320_v20 = vld [vmem:[%s4956_s23 + $0x1140] sm:$0xff]  ;;  %v1322_v21 = vld [vmem:[%s4956_s23 + $0x1150] sm:$0xff] }
  0xa8   : > { %v1324_v22 = vld [vmem:[%s4956_s23 + $0x1160] sm:$0xff]  ;;  %1321 = vst [vmem:[%s4964_s27 + $0x8a0] sm:$0xff] %v1320_v20  ;;  %1323 = vst [vmem:[%s4964_s27 + $0x8a8] sm:$0xff] %v1322_v21  ;;  %v1326_v23 = vld [vmem:[%s4956_s23 + $0x1170] sm:$0xff] }
  0xa9   : > { %1325 = vst [vmem:[%s4964_s27 + $0x8b0] sm:$0xff] %v1324_v22  ;;  %v1328_v24 = vld [vmem:[%s4956_s23 + $0x1180] sm:$0xff]  ;;  %v1330_v25 = vld [vmem:[%s4956_s23 + $0x1190] sm:$0xff]  ;;  %1327 = vst [vmem:[%s4964_s27 + $0x8b8] sm:$0xff] %v1326_v23 }
  0xaa   : > { %1329 = vst [vmem:[%s4964_s27 + $0x8c0] sm:$0xff] %v1328_v24  ;;  %1331 = vst [vmem:[%s4964_s27 + $0x8c8] sm:$0xff] %v1330_v25  ;;  %v1332_v26 = vld [vmem:[%s4956_s23 + $0x11a0] sm:$0xff]  ;;  %v1334_v27 = vld [vmem:[%s4956_s23 + $0x11b0] sm:$0xff] }
  0xab   : > { %v1336_v28 = vld [vmem:[%s4956_s23 + $0x11c0] sm:$0xff]  ;;  %1333 = vst [vmem:[%s4964_s27 + $0x8d0] sm:$0xff] %v1332_v26  ;;  %1335 = vst [vmem:[%s4964_s27 + $0x8d8] sm:$0xff] %v1334_v27  ;;  %v1338_v29 = vld [vmem:[%s4956_s23 + $0x11d0] sm:$0xff] }
  0xac   : > { %1337 = vst [vmem:[%s4964_s27 + $0x8e0] sm:$0xff] %v1336_v28  ;;  %v1340_v30 = vld [vmem:[%s4956_s23 + $0x11e0] sm:$0xff]  ;;  %v1342_v31 = vld [vmem:[%s4956_s23 + $0x11f0] sm:$0xff]  ;;  %1339 = vst [vmem:[%s4964_s27 + $0x8e8] sm:$0xff] %v1338_v29 }
  0xad   : > { %1341 = vst [vmem:[%s4964_s27 + $0x8f0] sm:$0xff] %v1340_v30  ;;  %1343 = vst [vmem:[%s4964_s27 + $0x8f8] sm:$0xff] %v1342_v31 }
  0xae PF: > { %p3670_p0 = scmp.ge.s32.totalorder %s4832_s21, 1  ;;  %p1354_p1 = scmp.lt.s32.totalorder %s4832_s21, 5 }
  0xb0   : > { %p1355_p2 = pnand %p3670_p0, %p1354_p1 }
  0xb2   : > { %1358 = sbr.rel (%p1355_p2) target bundleno = 645 (0x285), region = 66 }
  0xb7   : > { %s1361_s28 = sand.u32 1, %s4808_s15   ;;  %p1392_p3 = scmp.lt.s32.totalorder %s4820_s18, 1  ;;  %vm1512_vm0 = vcmask 1046528   ;;  %vm1884_vm1 = vcmask 1045504  }
  0xb8   : > { %s4632_s29 = smul.u32 2304, %s1361_s28  ;;  %p1397_p4 = scmp.lt.s32.totalorder %s4816_s17, 1 }
  0xb9   : > { %s5573_s15 = scalar_select %p1392_p3, %s4820_s18, 1 }
  0xba   : > { %s5539_s4 = scalar_lea.vmem [#allocation2], %s4632_s29  ;;  %s1389_s28 = sand.u32 1, %s4800_s13  }
  0xbb   : > { %v3704_v32 = vld [vmem:[%s5539_s4 + $0x1f8] sm:$0xff]  ;;  %v3703_v36 = vld [vmem:[%s5539_s4 + $0x1f0] sm:$0xff]  ;;  %v3702_v40 = vld [vmem:[%s5539_s4 + $0x1e8] sm:$0xff]  ;;  %s4633_s5 = smul.u32 320, %s5573_s15  ;;  %s3671_s29 = sshll.u32 %s1389_s28, 6 }
  0xbc   : > { %v1447_v33 = vld [vmem:[%s5539_s4 + $0xf8] sm:$0xff]  ;;  %4095 = vmatprep.subr.mxu0 %v3704_v32  ;;  %v1446_v37 = vld [vmem:[%s5539_s4 + $0xf0] sm:$0xff]  ;;  %v1445_v41 = vld [vmem:[%s5539_s4 + $0xe8] sm:$0xff]  ;;  %s6336_s22 = scalar_select %p1397_p4, %s4816_s17, 1 }
  0xbd   : > { %v3688_v34 = vld [vmem:[%s5539_s4 + $0x178] sm:$0xff]  ;;  %4151 = vmatprep.subr.mxu1 %v1447_v33  ;;  %v3687_v38 = vld [vmem:[%s5539_s4 + $0x170] sm:$0xff]  ;;  %v3686_v42 = vld [vmem:[%s5539_s4 + $0x168] sm:$0xff]  ;;  %s5595_s11 = scalar_lea.vmem %s6462_s0, %s4633_s5  ;;  %s4091_s15 = sshll.u32 %s4820_s18, 4 }
  0xbe   : > { %v1431_v35 = vld [vmem:[%s5539_s4 + $0x78] sm:$0xff]  ;;  %4096 = vmatpush3.msra.mxu0 %v3688_v34  ;;  %v1430_v39 = vld [vmem:[%s5539_s4 + $0x70] sm:$0xff]  ;;  %v1429_v43 = vld [vmem:[%s5539_s4 + $0x68] sm:$0xff]  ;;  %s1399_s27 = scalar_lea.vmem %s6464_s2, %s6336_s22  ;;  %s3560_s18 = sadd.s32 %s4816_s17, %s4091_s15 }
  0xbf   : > { %4152 = vmatpush3.msra.mxu1 %v1431_v35  ;;  %4097 = vmatprep.subr.mxu0 %v3703_v36  ;;  %v3701_v44 = vld [vmem:[%s5539_s4 + $0x1e0] sm:$0xff]  ;;  %v3700_v48 = vld [vmem:[%s5539_s4 + $0x1d8] sm:$0xff]  ;;  %v3699_v52 = vld [vmem:[%s5539_s4 + $0x1d0] sm:$0xff]  ;;  %s4092_s9 = sshll.u32 %s3560_s18, 7  ;;  %s6405_s22 = scalar_lea.sflag [#allocation4], %s1389_s28 }
  0xc0   : > { %4153 = vmatprep.subr.mxu1 %v1446_v37  ;;  %4098 = vmatpush3.msra.mxu0 %v3687_v38  ;;  %v1444_v45 = vld [vmem:[%s5539_s4 + $0xe0] sm:$0xff]  ;;  %v1443_v49 = vld [vmem:[%s5539_s4 + $0xd8] sm:$0xff]  ;;  %v1442_v53 = vld [vmem:[%s5539_s4 + $0xd0] sm:$0xff]  ;;  %s4834_s23 = smov [#allocation3]  }
  0xc1   : > { %4154 = vmatpush3.msra.mxu1 %v1430_v39  ;;  %4099 = vmatprep.subr.mxu0 %v3702_v40  ;;  %v3685_v46 = vld [vmem:[%s5539_s4 + $0x160] sm:$0xff]  ;;  %v3684_v50 = vld [vmem:[%s5539_s4 + $0x158] sm:$0xff]  ;;  %v3683_v54 = vld [vmem:[%s5539_s4 + $0x150] sm:$0xff] }
  0xc2   : > { %4155 = vmatprep.subr.mxu1 %v1445_v41  ;;  %v1428_v47 = vld [vmem:[%s5539_s4 + $0x60] sm:$0xff]  ;;  %4100 = vmatpush3.msra.mxu0 %v3686_v42  ;;  %v1427_v51 = vld [vmem:[%s5539_s4 + $0x58] sm:$0xff]  ;;  %v1426_v55 = vld [vmem:[%s5539_s4 + $0x50] sm:$0xff] }
  0xc3   : > { %4156 = vmatpush3.msra.mxu1 %v1429_v43  ;;  %4101 = vmatprep.subr.mxu0 %v3701_v44  ;;  %v3698_v56 = vld [vmem:[%s5539_s4 + $0x1c8] sm:$0xff]  ;;  %v3697_v60 = vld [vmem:[%s5539_s4 + $0x1c0] sm:$0xff]  ;;  %v3696_v0 = vld [vmem:[%s5539_s4 + $0x1b8] sm:$0xff] }
  0xc4   : > { %4157 = vmatprep.subr.mxu1 %v1444_v45  ;;  %4102 = vmatpush3.msra.mxu0 %v3685_v46  ;;  %v1441_v57 = vld [vmem:[%s5539_s4 + $0xc8] sm:$0xff]  ;;  %v1440_v61 = vld [vmem:[%s5539_s4 + $0xc0] sm:$0xff]  ;;  %v1439_v1 = vld [vmem:[%s5539_s4 + $0xb8] sm:$0xff] }
  0xc5   : > { %4158 = vmatpush3.msra.mxu1 %v1428_v47  ;;  %4103 = vmatprep.subr.mxu0 %v3700_v48  ;;  %v3682_v58 = vld [vmem:[%s5539_s4 + $0x148] sm:$0xff]  ;;  %v3681_v62 = vld [vmem:[%s5539_s4 + $0x140] sm:$0xff]  ;;  %v3680_v2 = vld [vmem:[%s5539_s4 + $0x138] sm:$0xff] }
  0xc6   : > { %4159 = vmatprep.subr.mxu1 %v1443_v49  ;;  %4104 = vmatpush3.msra.mxu0 %v3684_v50  ;;  %v1425_v59 = vld [vmem:[%s5539_s4 + $0x48] sm:$0xff]  ;;  %v1424_v63 = vld [vmem:[%s5539_s4 + $0x40] sm:$0xff]  ;;  %v1423_v3 = vld [vmem:[%s5539_s4 + $0x38] sm:$0xff] }
  0xc7   : > { %4160 = vmatpush3.msra.mxu1 %v1427_v51  ;;  %4105 = vmatprep.subr.mxu0 %v3699_v52  ;;  %v3695_v4 = vld [vmem:[%s5539_s4 + $0x1b0] sm:$0xff]  ;;  %v3694_v8 = vld [vmem:[%s5539_s4 + $0x1a8] sm:$0xff]  ;;  %v3693_v12 = vld [vmem:[%s5539_s4 + $0x1a0] sm:$0xff] }
  0xc8   : > { %4161 = vmatprep.subr.mxu1 %v1442_v53  ;;  %4106 = vmatpush3.msra.mxu0 %v3683_v54  ;;  %v1438_v5 = vld [vmem:[%s5539_s4 + $0xb0] sm:$0xff]  ;;  %v1437_v9 = vld [vmem:[%s5539_s4 + $0xa8] sm:$0xff]  ;;  %v1436_v13 = vld [vmem:[%s5539_s4 + $0xa0] sm:$0xff] }
  0xc9   : > { %4162 = vmatpush3.msra.mxu1 %v1426_v55  ;;  %4107 = vmatprep.subr.mxu0 %v3698_v56  ;;  %v3679_v6 = vld [vmem:[%s5539_s4 + $0x130] sm:$0xff]  ;;  %v3678_v10 = vld [vmem:[%s5539_s4 + $0x128] sm:$0xff]  ;;  %v3677_v14 = vld [vmem:[%s5539_s4 + $0x120] sm:$0xff] }
  0xca   : > { %4163 = vmatprep.subr.mxu1 %v1441_v57  ;;  %4108 = vmatpush3.msra.mxu0 %v3682_v58  ;;  %v1422_v7 = vld [vmem:[%s5539_s4 + $0x30] sm:$0xff]  ;;  %v1421_v11 = vld [vmem:[%s5539_s4 + $0x28] sm:$0xff]  ;;  %v1420_v15 = vld [vmem:[%s5539_s4 + $0x20] sm:$0xff] }
  0xcb   : > { %4164 = vmatpush3.msra.mxu1 %v1425_v59  ;;  %4109 = vmatprep.subr.mxu0 %v3697_v60  ;;  %v3692_v16 = vld [vmem:[%s5539_s4 + $0x198] sm:$0xff]  ;;  %v1449_v18 = vld [vmem:[%s5595_s11 + $0x8] sm:$0xfe]  ;;  %v3691_v22 = vld [vmem:[%s5539_s4 + $0x190] sm:$0xff] }
  0xcc   : > { %4165 = vmatprep.subr.mxu1 %v1440_v61  ;;  %4110 = vmatpush3.msra.mxu0 %v3681_v62  ;;  %v1435_v17 = vld [vmem:[%s5539_s4 + $0x98] sm:$0xff]  ;;  %v1434_v23 = vld [vmem:[%s5539_s4 + $0x90] sm:$0xff]  ;;  %v1448_v24 = vld [vmem:[%s5595_s11] sm:$0xfe]  ;;  %v1516_v28 = vrot.slane %v1449_v18, 1 }
  0xcd   : > { %4166 = vmatpush3.msra.mxu1 %v1424_v63  ;;  %4111 = vmatprep.subr.mxu0 %v3696_v0  ;;  %v1451_v19 = vld [vmem:[%s5595_s11 + $0x18] sm:$0x1]  ;;  %v1450_v25 = vld [vmem:[%s5595_s11 + $0x10] sm:$0x1]  ;;  %v3690_v30 = vld [vmem:[%s5539_s4 + $0x188] sm:$0xff]  ;;  %v1513_v35 = vrot.slane %v1448_v24, 1 }
  0xce   : > { %4167 = vmatprep.subr.mxu1 %v1439_v1  ;;  %4112 = vmatpush3.msra.mxu0 %v3680_v2  ;;  %v3676_v20 = vld [vmem:[%s5539_s4 + $0x118] sm:$0xff]  ;;  %v3675_v26 = vld [vmem:[%s5539_s4 + $0x110] sm:$0xff]  ;;  %v1517_v29 = vrot.slane %v1451_v19, 1  ;;  %v1433_v31 = vld [vmem:[%s5539_s4 + $0x88] sm:$0xff]  ;;  %v1514_v36 = vrot.slane %v1450_v25, 1 }
  0xcf   : > { %4168 = vmatpush3.msra.mxu1 %v1423_v3  ;;  %4113 = vmatprep.subr.mxu0 %v3695_v4  ;;  %v1419_v21 = vld [vmem:[%s5539_s4 + $0x18] sm:$0xff]  ;;  %v1418_v27 = vld [vmem:[%s5539_s4 + $0x10] sm:$0xff]  ;;  %v3674_v32 = vld [vmem:[%s5539_s4 + $0x108] sm:$0xff] }
  0xd0   : > { %4169 = vmatprep.subr.mxu1 %v1438_v5  ;;  %4114 = vmatpush3.msra.mxu0 %v3679_v6  ;;  %v1417_v33 = vld [vmem:[%s5539_s4 + $0x8] sm:$0xff]  ;;  %v3689_v34 = vld [vmem:[%s5539_s4 + $0x180] sm:$0xff]  ;;  %v1455_v39 = vld [vmem:[%s5595_s11 + $0x38] sm:$0x1]  ;;  %v1518_v41 = vsel %vm1512_vm0, %v1516_v28, %v1517_v29  ;;  %v1515_v46 = vsel %vm1512_vm0, %v1513_v35, %v1514_v36 }
  0xd1   : > { %4170 = vmatpush3.msra.mxu1 %v1422_v7  ;;  %4115 = vmatprep.subr.mxu0 %v3694_v8  ;;  %v1432_v37 = vld [vmem:[%s5539_s4 + $0x80] sm:$0xff]  ;;  %v1453_v38 = vld [vmem:[%s5595_s11 + $0x28] sm:$0xfe]  ;;  %v1454_v45 = vld [vmem:[%s5595_s11 + $0x30] sm:$0x1]  ;;  %v1523_v49 = vrot.slane %v1455_v39, 1 }
  0xd2   : > { %4171 = vmatprep.subr.mxu1 %v1437_v9  ;;  %4116 = vmatpush3.msra.mxu0 %v3678_v10  ;;  %v3673_v40 = vld [vmem:[%s5539_s4 + $0x100] sm:$0xff]  ;;  %v1401_v43 = vld [vmem:[%s5595_s11 + $0x8] sm:$0xff]  ;;  %v1522_v48 = vrot.slane %v1453_v38, 1  ;;  %v3736_v50 = vld [vmem:[%s5539_s4 + $0x2f8] sm:$0xff]  ;;  %v1520_v56 = vrot.slane %v1454_v45, 1 }
  0xd3   : > { %4172 = vmatpush3.msra.mxu1 %v1421_v11  ;;  %4117 = vmatprep.subr.mxu0 %v3693_v12  ;;  %v1416_v42 = vld [vmem:[%s5539_s4] sm:$0xff]  ;;  %v3784_v51 = vld [vmem:[%s5539_s4 + $0x3f8] sm:$0xff]  ;;  %v3735_v54 = vld [vmem:[%s5539_s4 + $0x2f0] sm:$0xff] }
  0xd4   : > { %4173 = vmatprep.subr.mxu1 %v1436_v13  ;;  %4118 = vmatpush3.msra.mxu0 %v3677_v14  ;;  %v1452_v44 = vld [vmem:[%s5595_s11 + $0x20] sm:$0xfe]  ;;  %v3720_v52 = vld [vmem:[%s5539_s4 + $0x278] sm:$0xff]  ;;  %v3783_v57 = vld [vmem:[%s5539_s4 + $0x3f0] sm:$0xff]  ;;  %v1524_v60 = vsel %vm1512_vm0, %v1522_v48, %v1523_v49 }
  0xd5   : > { %4174 = vmatpush3.msra.mxu1 %v1420_v15  ;;  %4119 = vmatprep.subr.mxu0 %v3692_v16  ;;  %v1400_v47 = vld [vmem:[%s5595_s11] sm:$0xff]  ;;  %v3768_v53 = vld [vmem:[%s5539_s4 + $0x378] sm:$0xff]  ;;  %v1519_v55 = vrot.slane %v1452_v44, 1  ;;  %v1457_v58 = vld [vmem:[%s5595_s11 + $0x48] sm:$0xfe] }
  0xd6   : > { %4175 = vmatprep.subr.mxu1 %v1435_v17  ;;  %4120 = vmatpush3.msra.mxu0 %v3676_v20  ;;  %v1459_v59 = vld [vmem:[%s5595_s11 + $0x58] sm:$0x1]  ;;  %v5639_v61 = vld [vmem:[%s5595_s11 + $0x28] sm:$0xff]  ;;  %v3719_v62 = vld [vmem:[%s5539_s4 + $0x270] sm:$0xff]  ;;  %v1528_v4 = vrot.slane %v1457_v58, 1 }
  0xd7   : > { %4176 = vmatpush3.msra.mxu1 %v1419_v21  ;;  %4121 = vmatprep.subr.mxu0 %v3691_v22  ;;  %v3767_v63 = vld [vmem:[%s5539_s4 + $0x370] sm:$0xff]  ;;  %v1456_v0 = vld [vmem:[%s5595_s11 + $0x40] sm:$0xfe]  ;;  %v1521_v2 = vsel %vm1512_vm0, %v1519_v55, %v1520_v56  ;;  %v1529_v5 = vrot.slane %v1459_v59, 1  ;;  %v3734_v6 = vld [vmem:[%s5539_s4 + $0x2e8] sm:$0xff] }
  0xd8   : > { %4177 = vmatprep.subr.mxu1 %v1434_v23  ;;  %4122 = vmatpush3.msra.mxu0 %v3675_v26  ;;  %v1458_v1 = vld [vmem:[%s5595_s11 + $0x50] sm:$0x1]  ;;  %v5647_v3 = vld [vmem:[%s5595_s11 + $0x20] sm:$0xff]  ;;  %v3782_v7 = vld [vmem:[%s5539_s4 + $0x3e8] sm:$0xff]  ;;  %v1525_v11 = vrot.slane %v1456_v0, 1 }
  0xd9   : > { %4178 = vmatpush3.msra.mxu1 %v1418_v27  ;;  %4123 = vmatprep.subr.mxu0 %v3690_v30  ;;  %v3718_v8 = vld [vmem:[%s5539_s4 + $0x268] sm:$0xff]  ;;  %v3733_v10 = vld [vmem:[%s5539_s4 + $0x2e0] sm:$0xff]  ;;  %v1526_v12 = vrot.slane %v1458_v1, 1  ;;  %v1463_v15 = vld [vmem:[%s5595_s11 + $0x78] sm:$0x1]  ;;  %v1530_v16 = vsel %vm1512_vm0, %v1528_v4, %v1529_v5 }
  0xda   : > { %4179 = vmatprep.subr.mxu1 %v1433_v31  ;;  %4124 = vmatpush3.msra.mxu0 %v3674_v32  ;;  %v3766_v9 = vld [vmem:[%s5539_s4 + $0x368] sm:$0xff]  ;;  %v3781_v13 = vld [vmem:[%s5539_s4 + $0x3e0] sm:$0xff]  ;;  %v1462_v21 = vld [vmem:[%s5595_s11 + $0x70] sm:$0x1]  ;;  %v1535_v25 = vrot.slane %v1463_v15, 1 }
  0xdb   : > { %4180 = vmatpush3.msra.mxu1 %v1417_v33  ;;  %4125 = vmatprep.subr.mxu0 %v3689_v34  ;;  %v1461_v14 = vld [vmem:[%s5595_s11 + $0x68] sm:$0xfe]  ;;  %v3717_v18 = vld [vmem:[%s5539_s4 + $0x260] sm:$0xff]  ;;  %v1527_v22 = vsel %vm1512_vm0, %v1525_v11, %v1526_v12  ;;  %v3732_v26 = vld [vmem:[%s5539_s4 + $0x2d8] sm:$0xff]  ;;  %v1532_v32 = vrot.slane %v1462_v21, 1 }
  0xdc   : > { %4181 = vmatprep.subr.mxu1 %v1432_v37  ;;  %4126 = vmatpush3.msra.mxu0 %v3673_v40  ;;  %v5661_v17 = vld [vmem:[%s5595_s11 + $0x48] sm:$0xff]  ;;  %v3765_v19 = vld [vmem:[%s5539_s4 + $0x360] sm:$0xff]  ;;  %v1534_v24 = vrot.slane %v1461_v14, 1  ;;  %v3780_v27 = vld [vmem:[%s5539_s4 + $0x3d8] sm:$0xff] }
  0xdd   : > { %1674 = vmatprep.mubr.f32.mxu0 %v1518_v41  ;;  %4182 = vmatpush3.msra.mxu1 %v1416_v42  ;;  %v1460_v20 = vld [vmem:[%s5595_s11 + $0x60] sm:$0xfe]  ;;  %v3716_v28 = vld [vmem:[%s5539_s4 + $0x258] sm:$0xff]  ;;  %v3731_v30 = vld [vmem:[%s5539_s4 + $0x2d0] sm:$0xff] }
  0xde   : > { %1779 = vmatprep.mubr.f32.mxu1 %v1401_v43  ;;  %1675 = vmatmul.mubr.f32.vlgmr.msra.gmra.mxu0 %v1515_v46  ;;  %v5669_v23 = vld [vmem:[%s5595_s11 + $0x40] sm:$0xff]  ;;  %v3764_v29 = vld [vmem:[%s5539_s4 + $0x358] sm:$0xff]  ;;  %v1531_v31 = vrot.slane %v1460_v20, 1  ;;  %v3779_v33 = vld [vmem:[%s5539_s4 + $0x3d0] sm:$0xff]  ;;  %v1536_v36 = vsel %vm1512_vm0, %v1534_v24, %v1535_v25 }
  0xdf   : > { %1780 = vmatmul.mubr.f32.vlgmr.msra.gmra.mxu1 %v1400_v47  ;;  %4207 = vmatprep.subr.mxu0 %v3736_v50  ;;  %v1465_v34 = vld [vmem:[%s5595_s11 + $0x88] sm:$0xfe]  ;;  %v1467_v35 = vld [vmem:[%s5595_s11 + $0x98] sm:$0x1]  ;;  %v3715_v38 = vld [vmem:[%s5539_s4 + $0x250] sm:$0xff] }
  0xe0   : > { %4263 = vmatprep.subr.mxu1 %v3784_v51  ;;  %4208 = vmatpush3.msra.mxu0 %v3720_v52  ;;  %v5683_v37 = vld [vmem:[%s5595_s11 + $0x68] sm:$0xff]  ;;  %v3763_v39 = vld [vmem:[%s5539_s4 + $0x350] sm:$0xff]  ;;  %v1464_v40 = vld [vmem:[%s5595_s11 + $0x80] sm:$0xfe]  ;;  %v1533_v42 = vsel %vm1512_vm0, %v1531_v31, %v1532_v32  ;;  %v1540_v44 = vrot.slane %v1465_v34, 1  ;;  %v1541_v45 = vrot.slane %v1467_v35, 1 }
  0xe1   : > { %4264 = vmatpush3.msra.mxu1 %v3768_v53  ;;  %4209 = vmatprep.subr.mxu0 %v3735_v54  ;;  %v1466_v41 = vld [vmem:[%s5595_s11 + $0x90] sm:$0x1]  ;;  %v5691_v43 = vld [vmem:[%s5595_s11 + $0x60] sm:$0xff]  ;;  %v3730_v46 = vld [vmem:[%s5539_s4 + $0x2c8] sm:$0xff]  ;;  %v1537_v51 = vrot.slane %v1464_v40, 1 }
  0xe2   : > { %4265 = vmatprep.subr.mxu1 %v3783_v57  ;;  %1679 = vmatprep.mubr.f32.mxu0 %v1524_v60  ;;  %v3778_v47 = vld [vmem:[%s5539_s4 + $0x3c8] sm:$0xff]  ;;  %v3729_v50 = vld [vmem:[%s5539_s4 + $0x2c0] sm:$0xff]  ;;  %v1538_v52 = vrot.slane %v1466_v41, 1  ;;  %v1471_v55 = vld [vmem:[%s5595_s11 + $0xb8] sm:$0x1]  ;;  %v1542_v56 = vsel %vm1512_vm0, %v1540_v44, %v1541_v45 }
  0xe3   : > { %1784 = vmatprep.mubr.f32.mxu1 %v5639_v61  ;;  %4210 = vmatpush3.msra.mxu0 %v3719_v62  ;;  %v3714_v48 = vld [vmem:[%s5539_s4 + $0x248] sm:$0xff]  ;;  %v3777_v53 = vld [vmem:[%s5539_s4 + $0x3c0] sm:$0xff]  ;;  %v1470_v62 = vld [vmem:[%s5595_s11 + $0xb0] sm:$0x1] }
  0xe4   : > { %4266 = vmatpush3.msra.mxu1 %v3767_v63  ;;  %1680 = vmatmul.mubr.f32.gmra.mxu0 %v1521_v2  ;;  %v3762_v49 = vld [vmem:[%s5539_s4 + $0x348] sm:$0xff]  ;;  %v3713_v58 = vld [vmem:[%s5539_s4 + $0x240] sm:$0xff]  ;;  %v1539_v63 = vsel %vm1512_vm0, %v1537_v51, %v1538_v52  ;;  %v1547_v2 = vrot.slane %v1471_v55, 1  ;;  %v3728_v4 = vld [vmem:[%s5539_s4 + $0x2b8] sm:$0xff] }
  0xe5   : > { %1785 = vmatmul.mubr.f32.gmra.mxu1 %v5647_v3  ;;  %4211 = vmatprep.subr.mxu0 %v3734_v6  ;;  %v1469_v54 = vld [vmem:[%s5595_s11 + $0xa8] sm:$0xfe]  ;;  %v3761_v59 = vld [vmem:[%s5539_s4 + $0x340] sm:$0xff]  ;;  %v3776_v5 = vld [vmem:[%s5539_s4 + $0x3b8] sm:$0xff] }
  0xe6   : > { %4267 = vmatprep.subr.mxu1 %v3782_v7  ;;  %4212 = vmatpush3.msra.mxu0 %v3718_v8  ;;  %v5705_v57 = vld [vmem:[%s5595_s11 + $0x88] sm:$0xff]  ;;  %v1468_v60 = vld [vmem:[%s5595_s11 + $0xa0] sm:$0xfe]  ;;  %v1546_v1 = vrot.slane %v1469_v54, 1  ;;  %v3712_v6 = vld [vmem:[%s5539_s4 + $0x238] sm:$0xff] }
  0xe7   : > { %4268 = vmatpush3.msra.mxu1 %v3766_v9  ;;  %4213 = vmatprep.subr.mxu0 %v3733_v10  ;;  %v5713_v0 = vld [vmem:[%s5595_s11 + $0x80] sm:$0xff]  ;;  %v3760_v7 = vld [vmem:[%s5539_s4 + $0x338] sm:$0xff]  ;;  %v3727_v8 = vld [vmem:[%s5539_s4 + $0x2b0] sm:$0xff]  ;;  %v1543_v9 = vrot.slane %v1468_v60, 1  ;;  %v1544_v10 = vrot.slane %v1470_v62, 1 }
  0xe8   : > { %4269 = vmatprep.subr.mxu1 %v3781_v13  ;;  %1684 = vmatprep.mubr.f32.mxu0 %v1530_v16  ;;  %v3775_v11 = vld [vmem:[%s5539_s4 + $0x3b0] sm:$0xff]  ;;  %v1473_v12 = vld [vmem:[%s5595_s11 + $0xc8] sm:$0xfe]  ;;  %v1475_v13 = vld [vmem:[%s5595_s11 + $0xd8] sm:$0x1]  ;;  %v1548_v14 = vsel %vm1512_vm0, %v1546_v1, %v1547_v2 }
  0xe9   : > { %1789 = vmatprep.mubr.f32.mxu1 %v5661_v17  ;;  %4214 = vmatpush3.msra.mxu0 %v3717_v18  ;;  %v5727_v15 = vld [vmem:[%s5595_s11 + $0xa8] sm:$0xff]  ;;  %v3711_v16 = vld [vmem:[%s5539_s4 + $0x230] sm:$0xff]  ;;  %v1545_v21 = vsel %vm1512_vm0, %v1543_v9, %v1544_v10  ;;  %v1552_v24 = vrot.slane %v1473_v12, 1  ;;  %v1553_v25 = vrot.slane %v1475_v13, 1  ;;  %v1479_v35 = vld [vmem:[%s5595_s11 + $0xf8] sm:$0x1] }
  0xea   : > { %4270 = vmatpush3.msra.mxu1 %v3765_v19  ;;  %1685 = vmatmul.mubr.f32.gmra.mxu0 %v1527_v22  ;;  %v3759_v18 = vld [vmem:[%s5539_s4 + $0x330] sm:$0xff]  ;;  %v1472_v19 = vld [vmem:[%s5595_s11 + $0xc0] sm:$0xfe]  ;;  %v1477_v34 = vld [vmem:[%s5595_s11 + $0xe8] sm:$0xfe] }
  0xeb   : > { %1790 = vmatmul.mubr.f32.gmra.mxu1 %v5669_v23  ;;  %4215 = vmatprep.subr.mxu0 %v3732_v26  ;;  %v1474_v20 = vld [vmem:[%s5595_s11 + $0xd0] sm:$0x1]  ;;  %v5735_v22 = vld [vmem:[%s5595_s11 + $0xa0] sm:$0xff]  ;;  %v3726_v26 = vld [vmem:[%s5539_s4 + $0x2a8] sm:$0xff]  ;;  %v1549_v31 = vrot.slane %v1472_v19, 1 }
  0xec   : > { %4271 = vmatprep.subr.mxu1 %v3780_v27  ;;  %4216 = vmatpush3.msra.mxu0 %v3716_v28  ;;  %v3774_v27 = vld [vmem:[%s5539_s4 + $0x3a8] sm:$0xff]  ;;  %v1550_v32 = vrot.slane %v1474_v20, 1  ;;  %v3757_v40 = vld [vmem:[%s5539_s4 + $0x320] sm:$0xff]  ;;  %v3756_v51 = vld [vmem:[%s5539_s4 + $0x318] sm:$0xff] }
  0xed   : > { %4272 = vmatpush3.msra.mxu1 %v3764_v29  ;;  %4217 = vmatprep.subr.mxu0 %v3731_v30  ;;  %v3710_v28 = vld [vmem:[%s5539_s4 + $0x228] sm:$0xff]  ;;  %v3725_v30 = vld [vmem:[%s5539_s4 + $0x2a0] sm:$0xff]  ;;  %v3723_v52 = vld [vmem:[%s5539_s4 + $0x290] sm:$0xff] }
  0xee   : > { %4273 = vmatprep.subr.mxu1 %v3779_v33  ;;  %1689 = vmatprep.mubr.f32.mxu0 %v1536_v36  ;;  %v3758_v29 = vld [vmem:[%s5539_s4 + $0x328] sm:$0xff]  ;;  %v3773_v33 = vld [vmem:[%s5539_s4 + $0x3a0] sm:$0xff]  ;;  %v1554_v36 = vsel %vm1512_vm0, %v1552_v24, %v1553_v25  ;;  %v1551_v44 = vsel %vm1512_vm0, %v1549_v31, %v1550_v32  ;;  %v3771_v55 = vld [vmem:[%s5539_s4 + $0x390] sm:$0xff] }
  0xef   : > { %1794 = vmatprep.mubr.f32.mxu1 %v5683_v37  ;;  %4218 = vmatpush3.msra.mxu0 %v3715_v38  ;;  %v5749_v38 = vld [vmem:[%s5595_s11 + $0xc8] sm:$0xff]  ;;  %v1476_v41 = vld [vmem:[%s5595_s11 + $0xe0] sm:$0xfe]  ;;  %v3707_v62 = vld [vmem:[%s5539_s4 + $0x210] sm:$0xff] }
  0xf0   : > { %4274 = vmatpush3.msra.mxu1 %v3763_v39  ;;  %1690 = vmatmul.mubr.f32.gmra.mxu0 %v1533_v42  ;;  %v3709_v39 = vld [vmem:[%s5539_s4 + $0x220] sm:$0xff]  ;;  %v1478_v42 = vld [vmem:[%s5595_s11 + $0xf0] sm:$0x1]  ;;  %v5771_v60 = vld [vmem:[%s5595_s11 + $0xe8] sm:$0xff] }
  0xf1   : > { %1795 = vmatmul.mubr.f32.gmra.mxu1 %v5691_v43  ;;  %4219 = vmatprep.subr.mxu0 %v3730_v46  ;;  %v5757_v45 = vld [vmem:[%s5595_s11 + $0xc0] sm:$0xff]  ;;  %v1558_v46 = vrot.slane %v1477_v34, 1  ;;  %v1556_v54 = vrot.slane %v1478_v42, 1  ;;  %v1822_v2 = vld [vmem:[%s5595_s11 + $0x10] sm:$0x3]  ;;  %v3770_v9 = vld [vmem:[%s5539_s4 + $0x388] sm:$0xff] }
  0xf2   : > { %4275 = vmatprep.subr.mxu1 %v3778_v47  ;;  %4220 = vmatpush3.msra.mxu0 %v3714_v48  ;;  %v1559_v47 = vrot.slane %v1479_v35, 1  ;;  %v3724_v48 = vld [vmem:[%s5539_s4 + $0x298] sm:$0xff]  ;;  %v1820_v1 = vld [vmem:[%s5595_s11] sm:$0xfc]  ;;  %v3706_v10 = vld [vmem:[%s5539_s4 + $0x208] sm:$0xff] }
  0xf3   : > { %4276 = vmatpush3.msra.mxu1 %v3762_v49  ;;  %4221 = vmatprep.subr.mxu0 %v3729_v50  ;;  %v3772_v49 = vld [vmem:[%s5539_s4 + $0x398] sm:$0xff]  ;;  %v3721_v12 = vld [vmem:[%s5539_s4 + $0x280] sm:$0xff]  ;;  %v1885_v13 = vrot.slane %v1820_v1, 2  ;;  %v3847_v34 = vld [vmem:[%s5539_s4 + $0x4f0] sm:$0xff] }
  0xf4   : > { %4277 = vmatprep.subr.mxu1 %v3777_v53  ;;  %1694 = vmatprep.mubr.f32.mxu0 %v1542_v56  ;;  %v3708_v50 = vld [vmem:[%s5539_s4 + $0x218] sm:$0xff]  ;;  %v1555_v53 = vrot.slane %v1476_v41, 1  ;;  %v1821_v56 = vld [vmem:[%s5595_s11 + $0x8] sm:$0xfc]  ;;  %v3705_v20 = vld [vmem:[%s5539_s4 + $0x200] sm:$0xff] }
  0xf5   : > { %1799 = vmatprep.mubr.f32.mxu1 %v5705_v57  ;;  %4222 = vmatpush3.msra.mxu0 %v3713_v58  ;;  %v1823_v58 = vld [vmem:[%s5595_s11 + $0x18] sm:$0x3]  ;;  %v3753_v24 = vld [vmem:[%s5539_s4 + $0x300] sm:$0xff]  ;;  %v3831_v42 = vld [vmem:[%s5539_s4 + $0x470] sm:$0xff] }
  0xf6   : > { %4278 = vmatpush3.msra.mxu1 %v3761_v59  ;;  %1695 = vmatmul.mubr.f32.gmra.mxu0 %v1539_v63  ;;  %v1560_v59 = vsel %vm1512_vm0, %v1558_v46, %v1559_v47  ;;  %v3755_v63 = vld [vmem:[%s5539_s4 + $0x310] sm:$0xff]  ;;  %v1827_v19 = vld [vmem:[%s5595_s11 + $0x38] sm:$0x3]  ;;  %v1824_v25 = vld [vmem:[%s5595_s11 + $0x20] sm:$0xfc] }
  0xf7   : > { %1800 = vmatmul.mubr.f32.gmra.mxu1 %v5713_v0  ;;  %4223 = vmatprep.subr.mxu0 %v3728_v4  ;;  %v1557_v4 = vsel %vm1512_vm0, %v1555_v53, %v1556_v54  ;;  %v3912_v31 = vld [vmem:[%s5539_s4 + $0x5f8] sm:$0xff]  ;;  %v1891_v35 = vrot.slane %v1824_v25, 2  ;;  %v1828_v46 = vld [vmem:[%s5595_s11 + $0x40] sm:$0xfc]  ;;  %v1830_v47 = vld [vmem:[%s5595_s11 + $0x50] sm:$0x3] }
  0xf8   : > { %4279 = vmatprep.subr.mxu1 %v3776_v5  ;;  %4224 = vmatpush3.msra.mxu0 %v3712_v6  ;;  %v5779_v5 = vld [vmem:[%s5595_s11 + $0xe0] sm:$0xff]  ;;  %v1888_v6 = vrot.slane %v1821_v56, 2  ;;  %v3832_v32 = vld [vmem:[%s5539_s4 + $0x478] sm:$0xff]  ;;  %v3894_v53 = vld [vmem:[%s5539_s4 + $0x568] sm:$0xff]  ;;  %v1898_v56 = vrot.slane %v1830_v47, 2 }
  0xf9   : > { %4280 = vmatpush3.msra.mxu1 %v3760_v7  ;;  %4225 = vmatprep.subr.mxu0 %v3727_v8  ;;  %v1889_v7 = vrot.slane %v1823_v58, 2  ;;  %v3722_v8 = vld [vmem:[%s5539_s4 + $0x288] sm:$0xff]  ;;  %v1831_v41 = vld [vmem:[%s5595_s11 + $0x58] sm:$0x3]  ;;  %v3845_v54 = vld [vmem:[%s5539_s4 + $0x4e0] sm:$0xff] }
  0xfa   : > { %4281 = vmatprep.subr.mxu1 %v3775_v11  ;;  %1699 = vmatprep.mubr.f32.mxu0 %v1548_v14  ;;  %v3754_v11 = vld [vmem:[%s5539_s4 + $0x308] sm:$0xff]  ;;  %v1886_v14 = vrot.slane %v1822_v2, 2  ;;  %v3909_v58 = vld [vmem:[%s5539_s4 + $0x5e0] sm:$0xff]  ;;  %v1838_v25 = vld [vmem:[%s5595_s11 + $0x90] sm:$0x3] }
  0xfb   : > { %1804 = vmatprep.mubr.f32.mxu1 %v5727_v15  ;;  %4226 = vmatpush3.msra.mxu0 %v3711_v16  ;;  %v3769_v16 = vld [vmem:[%s5539_s4 + $0x380] sm:$0xff]  ;;  %v3840_v47 = vld [vmem:[%s5539_s4 + $0x4b8] sm:$0xff] }
  0xfc   : > { %4282 = vmatpush3.msra.mxu1 %v3759_v18  ;;  %1700 = vmatmul.mubr.f32.gmra.mxu0 %v1545_v21  ;;  %v1825_v18 = vld [vmem:[%s5595_s11 + $0x28] sm:$0xfc]  ;;  %v1890_v21 = vsel %vm1884_vm1, %v1888_v6, %v1889_v7  ;;  %v3893_v1 = vld [vmem:[%s5539_s4 + $0x560] sm:$0xff] }
  0xfd   : > { %1805 = vmatmul.mubr.f32.gmra.mxu1 %v5735_v22  ;;  %4227 = vmatprep.subr.mxu0 %v3726_v26  ;;  %v1826_v26 = vld [vmem:[%s5595_s11 + $0x30] sm:$0x3]  ;;  %v1832_v2 = vld [vmem:[%s5595_s11 + $0x60] sm:$0xfc] }
  0xfe   : > { %4283 = vmatprep.subr.mxu1 %v3774_v27  ;;  %4228 = vmatpush3.msra.mxu0 %v3710_v28  ;;  %v1887_v27 = vsel %vm1884_vm1, %v1885_v13, %v1886_v14  ;;  %v1894_v28 = vrot.slane %v1825_v18, 2  ;;  %v1903_v13 = vrot.slane %v1832_v2, 2  ;;  %v1837_v18 = vld [vmem:[%s5595_s11 + $0x88] sm:$0xfc] }
  0xff   : > { %4284 = vmatpush3.msra.mxu1 %v3758_v29  ;;  %4229 = vmatprep.subr.mxu0 %v3725_v30  ;;  %v1895_v29 = vrot.slane %v1827_v19, 2  ;;  %v3848_v30 = vld [vmem:[%s5539_s4 + $0x4f8] sm:$0xff]  ;;  %v3902_v2 = vld [vmem:[%s5539_s4 + $0x5a8] sm:$0xff] }
 0x100   : > { %4285 = vmatprep.subr.mxu1 %v3773_v33  ;;  %1704 = vmatprep.mubr.f32.mxu0 %v1554_v36  ;;  %v3896_v33 = vld [vmem:[%s5539_s4 + $0x578] sm:$0xff]  ;;  %v1892_v36 = vrot.slane %v1826_v26, 2  ;;  %v1912_v26 = vrot.slane %v1837_v18, 2 }
 0x101   : > { %1809 = vmatprep.mubr.f32.mxu1 %v5749_v38  ;;  %4230 = vmatpush3.msra.mxu0 %v3709_v39  ;;  %v3911_v39 = vld [vmem:[%s5539_s4 + $0x5f0] sm:$0xff]  ;;  %v1839_v19 = vld [vmem:[%s5595_s11 + $0x98] sm:$0x3] }
 0x102   : > { %4286 = vmatpush3.msra.mxu1 %v3757_v40  ;;  %1705 = vmatmul.mubr.f32.gmra.mxu0 %v1551_v44  ;;  %v1829_v40 = vld [vmem:[%s5595_s11 + $0x48] sm:$0xfc]  ;;  %v3895_v44 = vld [vmem:[%s5539_s4 + $0x570] sm:$0xff]  ;;  %v3836_v18 = vld [vmem:[%s5539_s4 + $0x498] sm:$0xff] }
 0x103   : > { %1810 = vmatmul.mubr.f32.gmra.mxu1 %v5757_v45  ;;  %4231 = vmatprep.subr.mxu0 %v3724_v48  ;;  %v1900_v48 = vrot.slane %v1829_v40, 2  ;;  %v3825_v40 = vld [vmem:[%s5539_s4 + $0x440] sm:$0xff] }
 0x104   : > { %4287 = vmatprep.subr.mxu1 %v3772_v49  ;;  %4232 = vmatpush3.msra.mxu0 %v3708_v50  ;;  %v1901_v49 = vrot.slane %v1831_v41, 2  ;;  %v3846_v50 = vld [vmem:[%s5539_s4 + $0x4e8] sm:$0xff]  ;;  %v3889_v41 = vld [vmem:[%s5539_s4 + $0x540] sm:$0xff] }
 0x105   : > { %4288 = vmatpush3.msra.mxu1 %v3756_v51  ;;  %4233 = vmatprep.subr.mxu0 %v3723_v52  ;;  %v3910_v51 = vld [vmem:[%s5539_s4 + $0x5e8] sm:$0xff] }
 0x106   : > { %4289 = vmatprep.subr.mxu1 %v3771_v55  ;;  %1709 = vmatprep.mubr.f32.mxu0 %v1560_v59  ;;  %v3830_v52 = vld [vmem:[%s5539_s4 + $0x468] sm:$0xff]  ;;  %v1897_v55 = vrot.slane %v1828_v46, 2 }
 0x107   : > { %1814 = vmatprep.mubr.f32.mxu1 %v5771_v60  ;;  %4234 = vmatpush3.msra.mxu0 %v3707_v62  ;;  %v1833_v59 = vld [vmem:[%s5595_s11 + $0x68] sm:$0xfc]  ;;  %v1835_v62 = vld [vmem:[%s5595_s11 + $0x78] sm:$0x3] }
 0x108   : > { %4290 = vmatpush3.msra.mxu1 %v3755_v63  ;;  %1710 = vmatmul.mubr.f32.gmra.mxu0 %v1557_v4  ;;  %v3829_v63 = vld [vmem:[%s5539_s4 + $0x460] sm:$0xff]  ;;  %v1834_v4 = vld [vmem:[%s5595_s11 + $0x70] sm:$0x3]  ;;  %v1906_v6 = vrot.slane %v1833_v59, 2  ;;  %v1907_v7 = vrot.slane %v1835_v62, 2 }
 0x109   : > { %1815 = vmatmul.mubr.f32.gmra.mxu1 %v5779_v5  ;;  %4235 = vmatprep.subr.mxu0 %v3722_v8  ;;  %v3844_v8 = vld [vmem:[%s5539_s4 + $0x4d8] sm:$0xff]  ;;  %v1904_v14 = vrot.slane %v1834_v4, 2  ;;  %v1844_v59 = vld [vmem:[%s5595_s11 + $0xc0] sm:$0xfc]  ;;  %v1846_v62 = vld [vmem:[%s5595_s11 + $0xd0] sm:$0x3] }
 0x10a   : > { %4291 = vmatprep.subr.mxu1 %v3770_v9  ;;  %4236 = vmatpush3.msra.mxu0 %v3706_v10  ;;  %v3908_v9 = vld [vmem:[%s5539_s4 + $0x5d8] sm:$0xff]  ;;  %v3822_v4 = vld [vmem:[%s5539_s4 + $0x428] sm:$0xff] }
 0x10b   : > { %4292 = vmatpush3.msra.mxu1 %v3754_v11  ;;  %4237 = vmatprep.subr.mxu0 %v3721_v12  ;;  %v3828_v10 = vld [vmem:[%s5539_s4 + $0x458] sm:$0xff]  ;;  %v3843_v12 = vld [vmem:[%s5539_s4 + $0x4d0] sm:$0xff] }
 0x10c   : > { %4293 = vmatprep.subr.mxu1 %v3769_v16  ;;  %4238 = vmatpush3.msra.mxu0 %v3705_v20  ;;  %v3892_v11 = vld [vmem:[%s5539_s4 + $0x558] sm:$0xff]  ;;  %v3907_v16 = vld [vmem:[%s5539_s4 + $0x5d0] sm:$0xff] }
 0x10d   : > { %2046 = vmatprep.mubr.f32.mxu0 %v1890_v21  ;;  %4294 = vmatpush3.msra.mxu1 %v3753_v24  ;;  %v3827_v20 = vld [vmem:[%s5539_s4 + $0x450] sm:$0xff]  ;;  %v1836_v24 = vld [vmem:[%s5595_s11 + $0x80] sm:$0xfc] }
 0x10e   : > { %2209 = vmatprep.mubr.f32.mxu1 %v5639_v61  ;;  %2047 = vmatmul.mubr.f32.vlgmr.msra.gmra.mxu0 %v1887_v27  ;;  %v1896_v61 = vsel %vm1884_vm1, %v1894_v28, %v1895_v29  ;;  %v3891_v21 = vld [vmem:[%s5539_s4 + $0x550] sm:$0xff]  ;;  %v1913_v27 = vrot.slane %v1839_v19, 2  ;;  %v3842_v28 = vld [vmem:[%s5539_s4 + $0x4c8] sm:$0xff]  ;;  %v3900_v19 = vld [vmem:[%s5539_s4 + $0x598] sm:$0xff] }
 0x10f   : > { %2210 = vmatmul.mubr.f32.vlgmr.msra.gmra.mxu1 %v5647_v3  ;;  %4319 = vmatprep.subr.mxu0 %v3848_v30  ;;  %v1893_v3 = vsel %vm1884_vm1, %v1891_v35, %v1892_v36  ;;  %v3906_v29 = vld [vmem:[%s5539_s4 + $0x5c8] sm:$0xff]  ;;  %v3905_v35 = vld [vmem:[%s5539_s4 + $0x5c0] sm:$0xff] }
 0x110   : > { %4375 = vmatprep.subr.mxu1 %v3912_v31  ;;  %4320 = vmatpush3.msra.mxu0 %v3832_v32  ;;  %v3826_v30 = vld [vmem:[%s5539_s4 + $0x448] sm:$0xff]  ;;  %v3841_v32 = vld [vmem:[%s5539_s4 + $0x4c0] sm:$0xff] }
 0x111   : > { %4376 = vmatpush3.msra.mxu1 %v3896_v33  ;;  %4321 = vmatprep.subr.mxu0 %v3847_v34  ;;  %v3890_v31 = vld [vmem:[%s5539_s4 + $0x548] sm:$0xff]  ;;  %v1909_v33 = vrot.slane %v1836_v24, 2  ;;  %v1910_v34 = vrot.slane %v1838_v25, 2  ;;  %v3884_v24 = vld [vmem:[%s5539_s4 + $0x518] sm:$0xff]  ;;  %v3835_v25 = vld [vmem:[%s5539_s4 + $0x490] sm:$0xff] }
 0x112   : > { %4377 = vmatprep.subr.mxu1 %v3911_v39  ;;  %2051 = vmatprep.mubr.f32.mxu0 %v1896_v61  ;;  %v1841_v36 = vld [vmem:[%s5595_s11 + $0xa8] sm:$0xfc]  ;;  %v1843_v39 = vld [vmem:[%s5595_s11 + $0xb8] sm:$0x3]  ;;  %v1840_v61 = vld [vmem:[%s5595_s11 + $0xa0] sm:$0xfc] }
 0x113   : > { %2214 = vmatprep.mubr.f32.mxu1 %v5661_v17  ;;  %4322 = vmatpush3.msra.mxu0 %v3831_v42  ;;  %v1902_v17 = vsel %vm1884_vm1, %v1900_v48, %v1901_v49  ;;  %v1842_v42 = vld [vmem:[%s5595_s11 + $0xb0] sm:$0x3]  ;;  %v1919_v46 = vrot.slane %v1843_v39, 2  ;;  %v3824_v48 = vld [vmem:[%s5539_s4 + $0x438] sm:$0xff]  ;;  %v3849_v39 = vld [vmem:[%s5595_s11 + $0x20] sm:$0xfc] }
 0x114   : > { %4378 = vmatpush3.msra.mxu1 %v3895_v44  ;;  %2052 = vmatmul.mubr.f32.gmra.mxu0 %v1893_v3  ;;  %v1918_v44 = vrot.slane %v1841_v36, 2  ;;  %v3904_v3 = vld [vmem:[%s5539_s4 + $0x5b8] sm:$0xff]  ;;  %v3787_v36 = vld [vmem:[%s5595_s11 + $0x30] sm:$0x1] }
 0x115   : > { %2215 = vmatmul.mubr.f32.gmra.mxu1 %v5669_v23  ;;  %4323 = vmatprep.subr.mxu0 %v3846_v50  ;;  %v1899_v23 = vsel %vm1884_vm1, %v1897_v55, %v1898_v56  ;;  %v3888_v49 = vld [vmem:[%s5539_s4 + $0x538] sm:$0xff]  ;;  %v3839_v50 = vld [vmem:[%s5539_s4 + $0x4b0] sm:$0xff] }
 0x116   : > { %4379 = vmatprep.subr.mxu1 %v3910_v51  ;;  %4324 = vmatpush3.msra.mxu0 %v3830_v52  ;;  %v1915_v51 = vrot.slane %v1840_v61, 2  ;;  %v1916_v52 = vrot.slane %v1842_v42, 2  ;;  %v1847_v55 = vld [vmem:[%s5595_s11 + $0xd8] sm:$0x3]  ;;  %v3823_v56 = vld [vmem:[%s5539_s4 + $0x430] sm:$0xff]  ;;  %v3898_v61 = vld [vmem:[%s5539_s4 + $0x588] sm:$0xff] }
 0x117   : > { %4380 = vmatpush3.msra.mxu1 %v3894_v53  ;;  %4325 = vmatprep.subr.mxu0 %v3845_v54  ;;  %v3903_v53 = vld [vmem:[%s5539_s4 + $0x5b0] sm:$0xff]  ;;  %v1845_v54 = vld [vmem:[%s5595_s11 + $0xc8] sm:$0xfc] }
 0x118   : > { %4381 = vmatprep.subr.mxu1 %v3909_v58  ;;  %2056 = vmatprep.mubr.f32.mxu0 %v1902_v17  ;;  %v3887_v58 = vld [vmem:[%s5539_s4 + $0x530] sm:$0xff]  ;;  %v1924_v17 = vrot.slane %v1845_v54, 2  ;;  %v3818_v42 = vld [vmem:[%s5539_s4 + $0x408] sm:$0xff]  ;;  %v3817_v54 = vld [vmem:[%s5539_s4 + $0x400] sm:$0xff] }
 0x119   : > { %2219 = vmatprep.mubr.f32.mxu1 %v5683_v37  ;;  %4326 = vmatpush3.msra.mxu0 %v3829_v63  ;;  %v1908_v37 = vsel %vm1884_vm1, %v1906_v6, %v1907_v7  ;;  %v1925_v63 = vrot.slane %v1847_v55, 2  ;;  %v3837_v6 = vld [vmem:[%s5539_s4 + $0x4a0] sm:$0xff]  ;;  %v1921_v7 = vrot.slane %v1844_v59, 2  ;;  %v3790_v55 = vld [vmem:[%s5595_s11 + $0x48] sm:$0xfe] }
 0x11a   : > { %4382 = vmatpush3.msra.mxu1 %v3893_v1  ;;  %2057 = vmatmul.mubr.f32.gmra.mxu0 %v1899_v23  ;;  %v3838_v1 = vld [vmem:[%s5539_s4 + $0x4a8] sm:$0xff]  ;;  %v3789_v59 = vld [vmem:[%s5595_s11 + $0x40] sm:$0xfe] }
 0x11b   : > { %2220 = vmatmul.mubr.f32.gmra.mxu1 %v5691_v43  ;;  %4327 = vmatprep.subr.mxu0 %v3844_v8  ;;  %v1905_v43 = vsel %vm1884_vm1, %v1903_v13, %v1904_v14  ;;  %v3886_v23 = vld [vmem:[%s5539_s4 + $0x528] sm:$0xff]  ;;  %v1922_v8 = vrot.slane %v1846_v62, 2  ;;  %v1850_v13 = vld [vmem:[%s5595_s11 + $0xf0] sm:$0x3]  ;;  %v3821_v14 = vld [vmem:[%s5539_s4 + $0x420] sm:$0xff] }
 0x11c   : > { %4383 = vmatprep.subr.mxu1 %v3908_v9  ;;  %4328 = vmatpush3.msra.mxu0 %v3828_v10  ;;  %v3901_v9 = vld [vmem:[%s5539_s4 + $0x5a0] sm:$0xff]  ;;  %v1851_v10 = vld [vmem:[%s5595_s11 + $0xf8] sm:$0x3] }
 0x11d   : > { %4384 = vmatpush3.msra.mxu1 %v3892_v11  ;;  %4329 = vmatprep.subr.mxu0 %v3843_v12  ;;  %v1926_v11 = vsel %vm1884_vm1, %v1924_v17, %v1925_v63  ;;  %v1848_v12 = vld [vmem:[%s5595_s11 + $0xe0] sm:$0xfc]  ;;  %v3855_v63 = vld [vmem:[%s5595_s11 + $0x50] sm:$0x3] }
 0x11e   : > { %4385 = vmatprep.subr.mxu1 %v3907_v16  ;;  %2061 = vmatprep.mubr.f32.mxu0 %v1908_v37  ;;  %v3885_v16 = vld [vmem:[%s5539_s4 + $0x520] sm:$0xff]  ;;  %v3820_v37 = vld [vmem:[%s5539_s4 + $0x418] sm:$0xff] }
 0x11f   : > { %2224 = vmatprep.mubr.f32.mxu1 %v5705_v57  ;;  %4330 = vmatpush3.msra.mxu0 %v3827_v20  ;;  %v1914_v57 = vsel %vm1884_vm1, %v1912_v26, %v1913_v27  ;;  %v1927_v26 = vrot.slane %v1848_v12, 2  ;;  %v1928_v27 = vrot.slane %v1850_v13, 2  ;;  %v3853_v17 = vld [vmem:[%s5595_s11 + $0x40] sm:$0xfc]  ;;  %v4008_v12 = vld [vmem:[%s5539_s4 + $0x778] sm:$0xff]  ;;  %v3959_v13 = vld [vmem:[%s5539_s4 + $0x6f0] sm:$0xff] }
 0x120   : > { %4386 = vmatpush3.msra.mxu1 %v3891_v21  ;;  %2062 = vmatmul.mubr.f32.gmra.mxu0 %v1905_v43  ;;  %v1931_v21 = vrot.slane %v1851_v10, 2  ;;  %v3899_v43 = vld [vmem:[%s5539_s4 + $0x590] sm:$0xff] }
 0x121   : > { %2225 = vmatmul.mubr.f32.gmra.mxu1 %v5713_v0  ;;  %4331 = vmatprep.subr.mxu0 %v3842_v28  ;;  %v1911_v0 = vsel %vm1884_vm1, %v1909_v33, %v1910_v34  ;;  %v3752_v28 = vld [vmem:[%s5595_s11 + $0x108] sm:$0xff]  ;;  %v3852_v33 = vld [vmem:[%s5595_s11 + $0x38] sm:$0x3]  ;;  %v3785_v34 = vld [vmem:[%s5595_s11 + $0x20] sm:$0xfe] }
 0x122   : > { %4387 = vmatprep.subr.mxu1 %v3906_v29  ;;  %4332 = vmatpush3.msra.mxu0 %v3826_v30  ;;  %v3786_v29 = vld [vmem:[%s5595_s11 + $0x28] sm:$0xfe]  ;;  %v3788_v30 = vld [vmem:[%s5595_s11 + $0x38] sm:$0x1] }
 0x123   : > { %4388 = vmatpush3.msra.mxu1 %v3890_v31  ;;  %4333 = vmatprep.subr.mxu0 %v3841_v32  ;;  %v3883_v31 = vld [vmem:[%s5539_s4 + $0x510] sm:$0xff]  ;;  %v3850_v32 = vld [vmem:[%s5595_s11 + $0x28] sm:$0xfc] }
 0x124   : > { %4389 = vmatprep.subr.mxu1 %v3905_v35  ;;  %2066 = vmatprep.mubr.f32.mxu0 %v1914_v57  ;;  %v3851_v57 = vld [vmem:[%s5595_s11 + $0x30] sm:$0x3] }
 0x125   : > { %2229 = vmatprep.mubr.f32.mxu1 %v5727_v15  ;;  %4334 = vmatpush3.msra.mxu0 %v3825_v40  ;;  %v1920_v15 = vsel %vm1884_vm1, %v1918_v44, %v1919_v46  ;;  %v3751_v40 = vld [vmem:[%s5595_s11 + $0x100] sm:$0xff]  ;;  %v2325_v44 = vrot.slane %v3786_v29, 1  ;;  %v2326_v46 = vrot.slane %v3788_v30, 1  ;;  %v3859_v29 = vld [vmem:[%s5595_s11 + $0x70] sm:$0x3] }
 0x126   : > { %4390 = vmatpush3.msra.mxu1 %v3889_v41  ;;  %2067 = vmatmul.mubr.f32.gmra.mxu0 %v1911_v0  ;;  %v3834_v41 = vld [vmem:[%s5539_s4 + $0x488] sm:$0xff]  ;;  %v3943_v30 = vld [vmem:[%s5539_s4 + $0x670] sm:$0xff] }
 0x127   : > { %2230 = vmatmul.mubr.f32.gmra.mxu1 %v5735_v22  ;;  %4335 = vmatprep.subr.mxu0 %v3840_v47  ;;  %v1917_v22 = vsel %vm1884_vm1, %v1915_v51, %v1916_v52  ;;  %v3882_v0 = vld [vmem:[%s5539_s4 + $0x508] sm:$0xff]  ;;  %v2599_v47 = vrot.slane %v3850_v32, 2  ;;  %v2323_v51 = vrot.slane %v3787_v36, 1  ;;  %v2596_v52 = vrot.slane %v3849_v39, 2 }
 0x128   : > { %4391 = vmatprep.subr.mxu1 %v3904_v3  ;;  %4336 = vmatpush3.msra.mxu0 %v3824_v48  ;;  %v2600_v3 = vrot.slane %v3852_v33, 2  ;;  %v3833_v48 = vld [vmem:[%s5539_s4 + $0x480] sm:$0xff]  ;;  %v2327_v62 = vsel %vm1512_vm0, %v2325_v44, %v2326_v46  ;;  %v3958_v33 = vld [vmem:[%s5539_s4 + $0x6e8] sm:$0xff]  ;;  %v2609_v44 = vrot.slane %v3859_v29, 2 }
 0x129   : > { %4392 = vmatpush3.msra.mxu1 %v3888_v49  ;;  %4337 = vmatprep.subr.mxu0 %v3839_v50  ;;  %v3897_v49 = vld [vmem:[%s5539_s4 + $0x580] sm:$0xff]  ;;  %v2322_v50 = vrot.slane %v3785_v34, 1  ;;  %v4022_v34 = vld [vmem:[%s5539_s4 + $0x7e8] sm:$0xff] }
 0x12a   : > { %4393 = vmatprep.subr.mxu1 %v3903_v53  ;;  %2071 = vmatprep.mubr.f32.mxu0 %v1920_v15  ;;  %v2597_v53 = vrot.slane %v3851_v57, 2  ;;  %v3792_v15 = vld [vmem:[%s5595_s11 + $0x58] sm:$0x1]  ;;  %v4021_v46 = vld [vmem:[%s5539_s4 + $0x7e0] sm:$0xff] }
 0x12b   : > { %2234 = vmatprep.mubr.f32.mxu1 %v5749_v38  ;;  %4338 = vmatpush3.msra.mxu0 %v3823_v56  ;;  %v1849_v38 = vld [vmem:[%s5595_s11 + $0xe8] sm:$0xfc] }
 0x12c   : > { %4394 = vmatpush3.msra.mxu1 %v3887_v58  ;;  %2072 = vmatmul.mubr.f32.gmra.mxu0 %v1917_v22  ;;  %v1930_v20 = vrot.slane %v1849_v38, 2  ;;  %v3854_v56 = vld [vmem:[%s5595_s11 + $0x48] sm:$0xfc]  ;;  %v3856_v58 = vld [vmem:[%s5595_s11 + $0x58] sm:$0x3]  ;;  %v2332_v38 = vrot.slane %v3792_v15, 1 }
 0x12d   : > { %2235 = vmatmul.mubr.f32.gmra.mxu1 %v5757_v45  ;;  %4339 = vmatprep.subr.mxu0 %v3838_v1  ;;  %v1923_v45 = vsel %vm1884_vm1, %v1921_v7, %v1922_v8  ;;  %v3791_v22 = vld [vmem:[%s5595_s11 + $0x50] sm:$0x1]  ;;  %v3881_v1 = vld [vmem:[%s5539_s4 + $0x500] sm:$0xff]  ;;  %v4024_v7 = vld [vmem:[%s5539_s4 + $0x7f8] sm:$0xff]  ;;  %v2605_v10 = vrot.slane %v3854_v56, 2 }
 0x12e   : > { %4395 = vmatprep.subr.mxu1 %v3902_v2  ;;  %4340 = vmatpush3.msra.mxu0 %v3822_v4  ;;  %v1932_v35 = vsel %vm1884_vm1, %v1930_v20, %v1931_v21  ;;  %v2601_v2 = vsel %vm1884_vm1, %v2599_v47, %v2600_v3  ;;  %v2324_v4 = vsel %vm1512_vm0, %v2322_v50, %v2323_v51  ;;  %v3944_v8 = vld [vmem:[%s5539_s4 + $0x678] sm:$0xff]  ;;  %v3858_v21 = vld [vmem:[%s5595_s11 + $0x68] sm:$0xfc]  ;;  %v3797_v50 = vld [vmem:[%s5595_s11 + $0x80] sm:$0xfe] }
 0x12f   : > { %4396 = vmatpush3.msra.mxu1 %v3886_v23  ;;  %4341 = vmatprep.subr.mxu0 %v3837_v6  ;;  %v2598_v23 = vsel %vm1884_vm1, %v2596_v52, %v2597_v53  ;;  %v3960_v6 = vld [vmem:[%s5539_s4 + $0x6f8] sm:$0xff]  ;;  %v2611_v57 = vrot.slane %v3858_v21, 2  ;;  %v3798_v47 = vld [vmem:[%s5595_s11 + $0x88] sm:$0xfe]  ;;  %v3799_v53 = vld [vmem:[%s5595_s11 + $0x90] sm:$0x1] }
 0x130   : > { %4397 = vmatprep.subr.mxu1 %v3901_v9  ;;  %2076 = vmatprep.mubr.f32.mxu0 %v1926_v11  ;;  %v2331_v9 = vrot.slane %v3790_v55, 1  ;;  %v2606_v11 = vrot.slane %v3856_v58, 2  ;;  %v3796_v20 = vld [vmem:[%s5595_s11 + $0x78] sm:$0x1]  ;;  %v3863_v55 = vld [vmem:[%s5595_s11 + $0x90] sm:$0x3] }
 0x131   : > { %2239 = vmatprep.mubr.f32.mxu1 %v5771_v60  ;;  %4342 = vmatpush3.msra.mxu0 %v3821_v14  ;;  %v3819_v60 = vld [vmem:[%s5539_s4 + $0x410] sm:$0xff]  ;;  %v2328_v14 = vrot.slane %v3789_v59, 1  ;;  %v2338_v39 = vrot.slane %v3796_v20, 1  ;;  %v3800_v3 = vld [vmem:[%s5595_s11 + $0x98] sm:$0x1]  ;;  %v3941_v15 = vld [vmem:[%s5539_s4 + $0x660] sm:$0xff] }
 0x132   : > { %4398 = vmatpush3.msra.mxu1 %v3885_v16  ;;  %2077 = vmatmul.mubr.f32.gmra.mxu0 %v1923_v45  ;;  %v2329_v16 = vrot.slane %v3791_v22, 1  ;;  %v2602_v45 = vrot.slane %v3853_v17, 2  ;;  %v4005_v56 = vld [vmem:[%s5539_s4 + $0x760] sm:$0xff]  ;;  %v4020_v22 = vld [vmem:[%s5539_s4 + $0x7d8] sm:$0xff]  ;;  %v3867_v20 = vld [vmem:[%s5595_s11 + $0xb0] sm:$0x3] }
 0x133   : > { %2240 = vmatmul.mubr.f32.gmra.mxu1 %v5779_v5  ;;  %4343 = vmatprep.subr.mxu0 %v3836_v18  ;;  %v1929_v5 = vsel %vm1884_vm1, %v1927_v26, %v1928_v27  ;;  %v2603_v18 = vrot.slane %v3855_v63, 2  ;;  %v2607_v26 = vsel %vm1884_vm1, %v2605_v10, %v2606_v11  ;;  %v3795_v27 = vld [vmem:[%s5595_s11 + $0x70] sm:$0x1]  ;;  %v3940_v17 = vld [vmem:[%s5539_s4 + $0x658] sm:$0xff]  ;;  %v2343_v63 = vrot.slane %v3798_v47, 1 }
 0x134   : > { %4399 = vmatprep.subr.mxu1 %v3900_v19  ;;  %4344 = vmatpush3.msra.mxu0 %v3820_v37  ;;  %v4023_v19 = vld [vmem:[%s5539_s4 + $0x7f0] sm:$0xff]  ;;  %v3794_v37 = vld [vmem:[%s5595_s11 + $0x68] sm:$0xfe]  ;;  %v3869_v47 = vld [vmem:[%s5595_s11 + $0xc0] sm:$0xfc] }
 0x135   : > { %4400 = vmatpush3.msra.mxu1 %v3884_v24  ;;  %4345 = vmatprep.subr.mxu0 %v3835_v25  ;;  %v3860_v24 = vld [vmem:[%s5595_s11 + $0x78] sm:$0x3]  ;;  %v3793_v25 = vld [vmem:[%s5595_s11 + $0x60] sm:$0xfe]  ;;  %v2604_v32 = vsel %vm1884_vm1, %v2602_v45, %v2603_v18  ;;  %v2337_v36 = vrot.slane %v3794_v37, 1  ;;  %v4019_v10 = vld [vmem:[%s5539_s4 + $0x7d0] sm:$0xff] }
 0x136   : > { %4401 = vmatprep.subr.mxu1 %v3899_v43  ;;  %2081 = vmatprep.mubr.f32.mxu0 %v1932_v35  ;;  %v2333_v43 = vsel %vm1512_vm0, %v2331_v9, %v2332_v38  ;;  %v3942_v35 = vld [vmem:[%s5539_s4 + $0x668] sm:$0xff]  ;;  %v2615_v38 = vrot.slane %v3863_v55, 2  ;;  %v3865_v37 = vld [vmem:[%s5595_s11 + $0xa0] sm:$0xfc]  ;;  %v3939_v21 = vld [vmem:[%s5539_s4 + $0x650] sm:$0xff] }
 0x137   : > { %2244 = vmatprep.mubr.f32.mxu1 %v3752_v28  ;;  %4346 = vmatpush3.msra.mxu0 %v3819_v60  ;;  %v3857_v28 = vld [vmem:[%s5595_s11 + $0x60] sm:$0xfc]  ;;  %v4007_v60 = vld [vmem:[%s5539_s4 + $0x770] sm:$0xff]  ;;  %v2339_v51 = vsel %vm1512_vm0, %v2337_v36, %v2338_v39  ;;  %v3802_v11 = vld [vmem:[%s5595_s11 + $0xa8] sm:$0xfe]  ;;  %v2620_v36 = vrot.slane %v3865_v37, 2 }
 0x138   : > { %4402 = vmatpush3.msra.mxu1 %v3883_v31  ;;  %2082 = vmatmul.mubr.f32.gmra.mxu0 %v1929_v5  ;;  %v2330_v31 = vsel %vm1512_vm0, %v2328_v14, %v2329_v16  ;;  %v2612_v5 = vrot.slane %v3860_v24, 2  ;;  %v3868_v14 = vld [vmem:[%s5595_s11 + $0xb8] sm:$0x3]  ;;  %v3801_v16 = vld [vmem:[%s5595_s11 + $0xa0] sm:$0xfe]  ;;  %v4003_v24 = vld [vmem:[%s5539_s4 + $0x750] sm:$0xff] }
 0x139   : > { %2245 = vmatmul.mubr.f32.gmra.mxu1 %v3751_v40  ;;  %4347 = vmatprep.subr.mxu0 %v3834_v41  ;;  %v4006_v40 = vld [vmem:[%s5539_s4 + $0x768] sm:$0xff]  ;;  %v3957_v41 = vld [vmem:[%s5539_s4 + $0x6e0] sm:$0xff]  ;;  %v2349_v29 = vrot.slane %v3802_v11, 1  ;;  %v2621_v39 = vrot.slane %v3867_v20, 2 }
 0x13a   : > { %4403 = vmatprep.subr.mxu1 %v3898_v61  ;;  %4348 = vmatpush3.msra.mxu0 %v3818_v42  ;;  %v2334_v61 = vrot.slane %v3793_v25, 1  ;;  %v2335_v42 = vrot.slane %v3795_v27, 1  ;;  %v2613_v52 = vsel %vm1884_vm1, %v2611_v57, %v2612_v5  ;;  %v4018_v27 = vld [vmem:[%s5539_s4 + $0x7c8] sm:$0xff]  ;;  %v4017_v57 = vld [vmem:[%s5539_s4 + $0x7c0] sm:$0xff] }
 0x13b   : > { %4404 = vmatpush3.msra.mxu1 %v3882_v0  ;;  %4349 = vmatprep.subr.mxu0 %v3833_v48  ;;  %v2608_v0 = vrot.slane %v3857_v28, 2  ;;  %v3862_v48 = vld [vmem:[%s5595_s11 + $0x88] sm:$0xfc]  ;;  %v3873_v11 = vld [vmem:[%s5595_s11 + $0xe0] sm:$0xfc] }
 0x13c   : > { %4405 = vmatprep.subr.mxu1 %v3897_v49  ;;  %4350 = vmatpush3.msra.mxu0 %v3817_v54  ;;  %v3864_v49 = vld [vmem:[%s5595_s11 + $0x98] sm:$0x3]  ;;  %v3861_v54 = vld [vmem:[%s5595_s11 + $0x80] sm:$0xfc]  ;;  %v2336_v58 = vsel %vm1512_vm0, %v2334_v61, %v2335_v42  ;;  %v3938_v28 = vld [vmem:[%s5539_s4 + $0x648] sm:$0xff] }
 0x13d   : > { %2483 = vmatprep.mubr.f32.mxu0 %v2327_v62  ;;  %4406 = vmatpush3.msra.mxu1 %v3881_v1  ;;  %v2610_v59 = vsel %vm1884_vm1, %v2608_v0, %v2609_v44  ;;  %v3956_v62 = vld [vmem:[%s5539_s4 + $0x6d8] sm:$0xff]  ;;  %v2344_v1 = vrot.slane %v3800_v3, 1  ;;  %v2614_v9 = vrot.slane %v3861_v54, 2  ;;  %v3806_v5 = vld [vmem:[%s5595_s11 + $0xc8] sm:$0xfe] }
 0x13e   : > { %2757 = vmatprep.mubr.f32.mxu1 %v2601_v2  ;;  %2484 = vmatmul.mubr.f32.vlgmr.msra.gmra.mxu0 %v2324_v4  ;;  %v2617_v2 = vrot.slane %v3862_v48, 2  ;;  %v2618_v4 = vrot.slane %v3864_v49, 2  ;;  %v3872_v61 = vld [vmem:[%s5595_s11 + $0xd8] sm:$0x3]  ;;  %v3805_v42 = vld [vmem:[%s5595_s11 + $0xc0] sm:$0xfe] }
 0x13f   : > { %2758 = vmatmul.mubr.f32.vlgmr.msra.gmra.mxu1 %v2598_v23  ;;  %4431 = vmatprep.subr.mxu0 %v3960_v6  ;;  %v4004_v23 = vld [vmem:[%s5539_s4 + $0x758] sm:$0xff]  ;;  %v3955_v6 = vld [vmem:[%s5539_s4 + $0x6d0] sm:$0xff]  ;;  %v2345_v45 = vsel %vm1512_vm0, %v2343_v63, %v2344_v1  ;;  %v3937_v48 = vld [vmem:[%s5539_s4 + $0x640] sm:$0xff]  ;;  %v2355_v55 = vrot.slane %v3806_v5, 1  ;;  %v2626_v63 = vrot.slane %v3869_v47, 2 }
 0x140   : > { %4487 = vmatprep.subr.mxu1 %v4024_v7  ;;  %4432 = vmatpush3.msra.mxu0 %v3944_v8  ;;  %v2340_v7 = vrot.slane %v3797_v50, 1  ;;  %v2341_v8 = vrot.slane %v3799_v53, 1  ;;  %v2619_v18 = vsel %vm1884_vm1, %v2617_v2, %v2618_v4  ;;  %v3871_v3 = vld [vmem:[%s5595_s11 + $0xd0] sm:$0x3]  ;;  %v4001_v49 = vld [vmem:[%s5539_s4 + $0x740] sm:$0xff]  ;;  %v4016_v53 = vld [vmem:[%s5539_s4 + $0x7b8] sm:$0xff] }
 0x141   : > { %4488 = vmatpush3.msra.mxu1 %v4008_v12  ;;  %4433 = vmatprep.subr.mxu0 %v3959_v13  ;;  %v3804_v12 = vld [vmem:[%s5595_s11 + $0xb8] sm:$0x1]  ;;  %v3866_v13 = vld [vmem:[%s5595_s11 + $0xa8] sm:$0xfc]  ;;  %v2627_v1 = vrot.slane %v3871_v3, 2  ;;  %v4015_v2 = vld [vmem:[%s5539_s4 + $0x7b0] sm:$0xff] }
 0x142   : > { %4489 = vmatprep.subr.mxu1 %v4023_v19  ;;  %2488 = vmatprep.mubr.f32.mxu0 %v2333_v43  ;;  %v3803_v19 = vld [vmem:[%s5595_s11 + $0xb0] sm:$0x1]  ;;  %v2342_v25 = vsel %vm1512_vm0, %v2340_v7, %v2341_v8  ;;  %v2616_v43 = vsel %vm1884_vm1, %v2614_v9, %v2615_v38  ;;  %v3936_v54 = vld [vmem:[%s5539_s4 + $0x638] sm:$0xff]  ;;  %v3810_v4 = vld [vmem:[%s5595_s11 + $0xe8] sm:$0xfe] }
 0x143   : > { %2762 = vmatprep.mubr.f32.mxu1 %v2607_v26  ;;  %4434 = vmatpush3.msra.mxu0 %v3943_v30  ;;  %v3954_v26 = vld [vmem:[%s5539_s4 + $0x6c8] sm:$0xff]  ;;  %v2350_v30 = vrot.slane %v3804_v12, 1  ;;  %v3876_v7 = vld [vmem:[%s5595_s11 + $0xf8] sm:$0x3]  ;;  %v3809_v8 = vld [vmem:[%s5595_s11 + $0xe0] sm:$0xfe] }
 0x144   : > { %4490 = vmatpush3.msra.mxu1 %v4007_v60  ;;  %2489 = vmatmul.mubr.f32.gmra.mxu0 %v2330_v31  ;;  %v2623_v60 = vrot.slane %v3866_v13, 2  ;;  %v2624_v31 = vrot.slane %v3868_v14, 2  ;;  %v3875_v12 = vld [vmem:[%s5595_s11 + $0xf0] sm:$0x3]  ;;  %v2361_v37 = vrot.slane %v3810_v4, 1 }
 0x145   : > { %2763 = vmatmul.mubr.f32.gmra.mxu1 %v2604_v32  ;;  %4435 = vmatprep.subr.mxu0 %v3958_v33  ;;  %v4002_v32 = vld [vmem:[%s5539_s4 + $0x748] sm:$0xff]  ;;  %v3953_v33 = vld [vmem:[%s5539_s4 + $0x6c0] sm:$0xff]  ;;  %v2351_v0 = vsel %vm1512_vm0, %v2349_v29, %v2350_v30  ;;  %v3935_v13 = vld [vmem:[%s5539_s4 + $0x630] sm:$0xff]  ;;  %v2633_v29 = vrot.slane %v3875_v12, 2 }
 0x146   : > { %4491 = vmatprep.subr.mxu1 %v4022_v34  ;;  %4436 = vmatpush3.msra.mxu0 %v3942_v35  ;;  %v2346_v34 = vrot.slane %v3801_v16, 1  ;;  %v2347_v35 = vrot.slane %v3803_v19, 1  ;;  %v2625_v44 = vsel %vm1884_vm1, %v2623_v60, %v2624_v31  ;;  %v3999_v14 = vld [vmem:[%s5539_s4 + $0x730] sm:$0xff]  ;;  %v4014_v19 = vld [vmem:[%s5539_s4 + $0x7a8] sm:$0xff]  ;;  %v3949_v30 = vld [vmem:[%s5539_s4 + $0x6a0] sm:$0xff] }
 0x147   : > { %4492 = vmatpush3.msra.mxu1 %v4006_v40  ;;  %4437 = vmatprep.subr.mxu0 %v3957_v41  ;;  %v3808_v40 = vld [vmem:[%s5595_s11 + $0xd8] sm:$0x1]  ;;  %v3870_v41 = vld [vmem:[%s5595_s11 + $0xc8] sm:$0xfc]  ;;  %v4013_v60 = vld [vmem:[%s5539_s4 + $0x7a0] sm:$0xff] }
 0x148   : > { %4493 = vmatprep.subr.mxu1 %v4021_v46  ;;  %2493 = vmatprep.mubr.f32.mxu0 %v2339_v51  ;;  %v3807_v46 = vld [vmem:[%s5595_s11 + $0xd0] sm:$0x1]  ;;  %v2348_v50 = vsel %vm1512_vm0, %v2346_v34, %v2347_v35  ;;  %v2622_v51 = vsel %vm1884_vm1, %v2620_v36, %v2621_v39  ;;  %v3814_v31 = vld [vmem:[%s5595_s11 + $0x108] sm:$0xfe]  ;;  %v3880_v34 = vld [vmem:[%s5595_s11 + $0x118] sm:$0x3] }
 0x149   : > { %2767 = vmatprep.mubr.f32.mxu1 %v2613_v52  ;;  %4438 = vmatpush3.msra.mxu0 %v3941_v15  ;;  %v3952_v52 = vld [vmem:[%s5539_s4 + $0x6b8] sm:$0xff]  ;;  %v2356_v15 = vrot.slane %v3808_v40, 1  ;;  %v3933_v39 = vld [vmem:[%s5539_s4 + $0x620] sm:$0xff]  ;;  %v2642_v3 = vrot.slane %v3880_v34, 2  ;;  %v3916_v34 = vld [vmem:[%s5595_s11 + $0x68] sm:$0xff] }
 0x14a   : > { %4494 = vmatpush3.msra.mxu1 %v4005_v56  ;;  %2494 = vmatmul.mubr.f32.gmra.mxu0 %v2336_v58  ;;  %v2629_v56 = vrot.slane %v3870_v41, 2  ;;  %v2630_v58 = vrot.slane %v3872_v61, 2  ;;  %v3813_v5 = vld [vmem:[%s5595_s11 + $0x100] sm:$0xfe]  ;;  %v3815_v61 = vld [vmem:[%s5595_s11 + $0x110] sm:$0x1] }
 0x14b   : > { %2768 = vmatmul.mubr.f32.gmra.mxu1 %v2610_v59  ;;  %4439 = vmatprep.subr.mxu0 %v3956_v62  ;;  %v4000_v59 = vld [vmem:[%s5539_s4 + $0x738] sm:$0xff]  ;;  %v3951_v62 = vld [vmem:[%s5539_s4 + $0x6b0] sm:$0xff]  ;;  %v2357_v9 = vsel %vm1512_vm0, %v2355_v55, %v2356_v15 }
 0x14c   : > { %4495 = vmatprep.subr.mxu1 %v4020_v22  ;;  %4440 = vmatpush3.msra.mxu0 %v3940_v17  ;;  %v2352_v22 = vrot.slane %v3805_v42, 1  ;;  %v2353_v17 = vrot.slane %v3807_v46, 1  ;;  %v2631_v38 = vsel %vm1884_vm1, %v2629_v56, %v2630_v58  ;;  %v3877_v42 = vld [vmem:[%s5595_s11 + $0x100] sm:$0xfc]  ;;  %v3947_v15 = vld [vmem:[%s5539_s4 + $0x690] sm:$0xff] }
 0x14d   : > { %4496 = vmatpush3.msra.mxu1 %v4004_v23  ;;  %4441 = vmatprep.subr.mxu0 %v3955_v6  ;;  %v3812_v23 = vld [vmem:[%s5595_s11 + $0xf8] sm:$0x1]  ;;  %v3874_v6 = vld [vmem:[%s5595_s11 + $0xe8] sm:$0xfc]  ;;  %v4011_v56 = vld [vmem:[%s5539_s4 + $0x790] sm:$0xff] }
 0x14e   : > { %4497 = vmatprep.subr.mxu1 %v4019_v10  ;;  %2498 = vmatprep.mubr.f32.mxu0 %v2345_v45  ;;  %v3811_v10 = vld [vmem:[%s5595_s11 + $0xf0] sm:$0x1]  ;;  %v2354_v16 = vsel %vm1512_vm0, %v2352_v22, %v2353_v17  ;;  %v2628_v45 = vsel %vm1884_vm1, %v2626_v63, %v2627_v1  ;;  %v2362_v20 = vrot.slane %v3812_v23, 1  ;;  %v3962_v22 = vld [vmem:[%s5595_s11 + $0x48] sm:$0xfe] }
 0x14f   : > { %2772 = vmatprep.mubr.f32.mxu1 %v2619_v18  ;;  %4442 = vmatpush3.msra.mxu0 %v3939_v21  ;;  %v3950_v18 = vld [vmem:[%s5539_s4 + $0x6a8] sm:$0xff]  ;;  %v2635_v21 = vrot.slane %v3874_v6, 2  ;;  %v3964_v17 = vld [vmem:[%s5595_s11 + $0x58] sm:$0x1]  ;;  %v3995_v63 = vld [vmem:[%s5539_s4 + $0x710] sm:$0xff] }
 0x150   : > { %4498 = vmatpush3.msra.mxu1 %v4003_v24  ;;  %2499 = vmatmul.mubr.f32.gmra.mxu0 %v2342_v25  ;;  %v2636_v24 = vrot.slane %v3876_v7, 2  ;;  %v3934_v25 = vld [vmem:[%s5539_s4 + $0x628] sm:$0xff]  ;;  %v2363_v35 = vsel %vm1512_vm0, %v2361_v37, %v2362_v20  ;;  %v3961_v1 = vld [vmem:[%s5595_s11 + $0x40] sm:$0xfe] }
 0x151   : > { %2773 = vmatmul.mubr.f32.gmra.mxu1 %v2616_v43  ;;  %4443 = vmatprep.subr.mxu0 %v3954_v26  ;;  %v3998_v43 = vld [vmem:[%s5539_s4 + $0x728] sm:$0xff]  ;;  %v2358_v26 = vrot.slane %v3809_v8, 1  ;;  %v3036_v8 = vrot.slane %v3962_v22, 1  ;;  %v3033_v12 = vrot.slane %v3961_v1, 1  ;;  %v3993_v37 = vld [vmem:[%s5539_s4 + $0x700] sm:$0xff] }
 0x152   : > { %4499 = vmatprep.subr.mxu1 %v4018_v27  ;;  %4444 = vmatpush3.msra.mxu0 %v3938_v28  ;;  %v2359_v27 = vrot.slane %v3811_v10, 1  ;;  %v2632_v28 = vrot.slane %v3873_v11, 2  ;;  %v2637_v36 = vsel %vm1884_vm1, %v2635_v21, %v2636_v24  ;;  %v3946_v6 = vld [vmem:[%s5539_s4 + $0x688] sm:$0xff]  ;;  %v3945_v11 = vld [vmem:[%s5539_s4 + $0x680] sm:$0xff]  ;;  %v3967_v24 = vld [vmem:[%s5595_s11 + $0x70] sm:$0x1] }
 0x153   : > { %4500 = vmatpush3.msra.mxu1 %v4002_v32  ;;  %4445 = vmatprep.subr.mxu0 %v3953_v33  ;;  %v3816_v32 = vld [vmem:[%s5595_s11 + $0x118] sm:$0x1]  ;;  %v3878_v33 = vld [vmem:[%s5595_s11 + $0x108] sm:$0xfc]  ;;  %v3965_v21 = vld [vmem:[%s5595_s11 + $0x60] sm:$0xfe] }
 0x154   : > { %4501 = vmatprep.subr.mxu1 %v4017_v57  ;;  %2503 = vmatprep.mubr.f32.mxu0 %v2351_v0  ;;  %v3997_v57 = vld [vmem:[%s5539_s4 + $0x720] sm:$0xff]  ;;  %v2360_v40 = vsel %vm1512_vm0, %v2358_v26, %v2359_v27  ;;  %v2634_v41 = vsel %vm1884_vm1, %v2632_v28, %v2633_v29  ;;  %v3879_v0 = vld [vmem:[%s5595_s11 + $0x110] sm:$0x3]  ;;  %v2368_v46 = vrot.slane %v3816_v32, 1  ;;  %v2641_v47 = vrot.slane %v3878_v33, 2  ;;  %v4010_v7 = vld [vmem:[%s5539_s4 + $0x788] sm:$0xff] }
 0x155   : > { %2777 = vmatprep.mubr.f32.mxu1 %v2625_v44  ;;  %4446 = vmatpush3.msra.mxu0 %v3937_v48  ;;  %v2367_v44 = vrot.slane %v3814_v31, 1  ;;  %v3948_v48 = vld [vmem:[%s5539_s4 + $0x698] sm:$0xff]  ;;  %v2639_v55 = vrot.slane %v3879_v0, 2  ;;  %v3994_v10 = vld [vmem:[%s5539_s4 + $0x708] sm:$0xff]  ;;  %v4087_v31 = vld [vmem:[%s5539_s4 + $0x8f0] sm:$0xff] }
 0x156   : > { %4502 = vmatpush3.msra.mxu1 %v4001_v49  ;;  %2504 = vmatmul.mubr.f32.gmra.mxu0 %v2348_v50  ;;  %v4012_v49 = vld [vmem:[%s5539_s4 + $0x798] sm:$0xff]  ;;  %v3970_v32 = vld [vmem:[%s5595_s11 + $0x88] sm:$0xfe] }
 0x157   : > { %2778 = vmatmul.mubr.f32.gmra.mxu1 %v2622_v51  ;;  %4447 = vmatprep.subr.mxu0 %v3952_v52  ;;  %v3932_v50 = vld [vmem:[%s5539_s4 + $0x618] sm:$0xff]  ;;  %v2364_v52 = vrot.slane %v3813_v5, 1  ;;  %v2369_v58 = vsel %vm1512_vm0, %v2367_v44, %v2368_v46  ;;  %v3915_v5 = vld [vmem:[%s5595_s11 + $0x60] sm:$0xff]  ;;  %v4070_v0 = vld [vmem:[%s5539_s4 + $0x868] sm:$0xff] }
 0x158   : > { %4503 = vmatprep.subr.mxu1 %v4016_v53  ;;  %4448 = vmatpush3.msra.mxu0 %v3936_v54  ;;  %v3996_v51 = vld [vmem:[%s5539_s4 + $0x718] sm:$0xff]  ;;  %v2365_v53 = vrot.slane %v3815_v61, 1  ;;  %v2638_v54 = vrot.slane %v3877_v42, 2  ;;  %v4086_v42 = vld [vmem:[%s5539_s4 + $0x8e8] sm:$0xff] }
 0x159   : > { %4504 = vmatpush3.msra.mxu1 %v4000_v59  ;;  %4449 = vmatprep.subr.mxu0 %v3951_v62  ;;  %v2643_v59 = vsel %vm1884_vm1, %v2641_v47, %v2642_v3  ;;  %v3931_v62 = vld [vmem:[%s5539_s4 + $0x610] sm:$0xff]  ;;  %v4088_v28 = vld [vmem:[%s5539_s4 + $0x8f8] sm:$0xff]  ;;  %v4085_v47 = vld [vmem:[%s5539_s4 + $0x8e0] sm:$0xff] }
 0x15a   : > { %4505 = vmatprep.subr.mxu1 %v4015_v2  ;;  %2508 = vmatprep.mubr.f32.mxu0 %v2357_v9  ;;  %v3963_v2 = vld [vmem:[%s5595_s11 + $0x50] sm:$0x1]  ;;  %v2366_v4 = vsel %vm1512_vm0, %v2364_v52, %v2365_v53  ;;  %v2640_v23 = vsel %vm1884_vm1, %v2638_v54, %v2639_v55  ;;  %v3037_v9 = vrot.slane %v3964_v17, 1  ;;  %v4072_v29 = vld [vmem:[%s5539_s4 + $0x878] sm:$0xff]  ;;  %v3974_v3 = vld [vmem:[%s5595_s11 + $0xa8] sm:$0xfe] }
 0x15b   : > { %2782 = vmatprep.mubr.f32.mxu1 %v2631_v38  ;;  %4450 = vmatpush3.msra.mxu0 %v3935_v13  ;;  %v3930_v38 = vld [vmem:[%s5539_s4 + $0x608] sm:$0xff]  ;;  %v3034_v13 = vrot.slane %v3963_v2, 1  ;;  %v3972_v33 = vld [vmem:[%s5595_s11 + $0x98] sm:$0x1]  ;;  %v3973_v52 = vld [vmem:[%s5595_s11 + $0xa0] sm:$0xfe] }
 0x15c   : > { %4506 = vmatpush3.msra.mxu1 %v3999_v14  ;;  %2509 = vmatmul.mubr.f32.gmra.mxu0 %v2354_v16  ;;  %v4009_v14 = vld [vmem:[%s5539_s4 + $0x780] sm:$0xff]  ;;  %v3966_v16 = vld [vmem:[%s5595_s11 + $0x68] sm:$0xfe]  ;;  %v3038_v20 = vsel %vm1512_vm0, %v3036_v8, %v3037_v9  ;;  %v3049_v61 = vrot.slane %v3972_v33, 1  ;;  %v3975_v53 = vld [vmem:[%s5595_s11 + $0xb0] sm:$0x1] }
 0x15d   : > { %2783 = vmatmul.mubr.f32.gmra.mxu1 %v2628_v45  ;;  %4451 = vmatprep.subr.mxu0 %v3950_v18  ;;  %v3968_v45 = vld [vmem:[%s5595_s11 + $0x78] sm:$0x1]  ;;  %v3929_v18 = vld [vmem:[%s5539_s4 + $0x600] sm:$0xff]  ;;  %v3042_v26 = vrot.slane %v3966_v16, 1  ;;  %v3052_v22 = vrot.slane %v3975_v53, 1  ;;  %v4083_v17 = vld [vmem:[%s5539_s4 + $0x8d0] sm:$0xff] }
 0x15e   : > { %4507 = vmatprep.subr.mxu1 %v4014_v19  ;;  %4452 = vmatpush3.msra.mxu0 %v3934_v25  ;;  %v3914_v19 = vld [vmem:[%s5595_s11 + $0x48] sm:$0xff]  ;;  %v3913_v25 = vld [vmem:[%s5595_s11 + $0x40] sm:$0xff]  ;;  %v3043_v27 = vrot.slane %v3968_v45, 1  ;;  %v3980_v1 = vld [vmem:[%s5595_s11 + $0xd8] sm:$0x1] }
 0x15f   : > { %4508 = vmatpush3.msra.mxu1 %v3998_v43  ;;  %4453 = vmatprep.subr.mxu0 %v3949_v30  ;;  %v3035_v43 = vsel %vm1512_vm0, %v3033_v12, %v3034_v13  ;;  %v3039_v30 = vrot.slane %v3965_v21, 1  ;;  %v3917_v54 = vld [vmem:[%s5595_s11 + $0x80] sm:$0xff]  ;;  %v3920_v2 = vld [vmem:[%s5595_s11 + $0xa8] sm:$0xff]  ;;  %v3988_v33 = vld [vmem:[%s5595_s11 + $0x118] sm:$0x1] }
 0x160   : > { %4509 = vmatprep.subr.mxu1 %v4013_v60  ;;  %2513 = vmatprep.mubr.f32.mxu0 %v2363_v35  ;;  %v3040_v60 = vrot.slane %v3967_v24, 1  ;;  %v3044_v35 = vsel %vm1512_vm0, %v3042_v26, %v3043_v27  ;;  %v3919_v8 = vld [vmem:[%s5595_s11 + $0xa0] sm:$0xff]  ;;  %v4066_v12 = vld [vmem:[%s5539_s4 + $0x848] sm:$0xff]  ;;  %v3983_v24 = vld [vmem:[%s5595_s11 + $0xf0] sm:$0x1] }
 0x161   : > { %2787 = vmatprep.mubr.f32.mxu1 %v2637_v36  ;;  %4454 = vmatpush3.msra.mxu0 %v3933_v39  ;;  %v4071_v36 = vld [vmem:[%s5539_s4 + $0x870] sm:$0xff]  ;;  %v3969_v39 = vld [vmem:[%s5595_s11 + $0x80] sm:$0xfe]  ;;  %v3982_v45 = vld [vmem:[%s5595_s11 + $0xe8] sm:$0xfe] }
 0x162   : > { %4510 = vmatpush3.msra.mxu1 %v3997_v57  ;;  %2514 = vmatmul.mubr.f32.gmra.mxu0 %v2360_v40  ;;  %v3971_v57 = vld [vmem:[%s5595_s11 + $0x90] sm:$0x1]  ;;  %v3041_v40 = vsel %vm1512_vm0, %v3039_v30, %v3040_v60  ;;  %v3045_v44 = vrot.slane %v3969_v39, 1  ;;  %v4081_v16 = vld [vmem:[%s5539_s4 + $0x8c0] sm:$0xff]  ;;  %v3066_v26 = vrot.slane %v3982_v45, 1  ;;  %v3064_v60 = vrot.slane %v3983_v24, 1 }
 0x163   : > { %2788 = vmatmul.mubr.f32.gmra.mxu1 %v2634_v41  ;;  %4455 = vmatprep.subr.mxu0 %v3948_v48  ;;  %v3048_v41 = vrot.slane %v3970_v32, 1  ;;  %v3046_v46 = vrot.slane %v3971_v57, 1  ;;  %v3976_v48 = vld [vmem:[%s5595_s11 + $0xb8] sm:$0x1]  ;;  %v3981_v21 = vld [vmem:[%s5595_s11 + $0xe0] sm:$0xfe] }
 0x164   : > { %4511 = vmatprep.subr.mxu1 %v4012_v49  ;;  %4456 = vmatpush3.msra.mxu0 %v3932_v50  ;;  %v3918_v49 = vld [vmem:[%s5595_s11 + $0x88] sm:$0xff]  ;;  %v3063_v30 = vrot.slane %v3981_v21, 1  ;;  %v3985_v39 = vld [vmem:[%s5595_s11 + $0x100] sm:$0xfe]  ;;  %v3987_v57 = vld [vmem:[%s5595_s11 + $0x110] sm:$0x1] }
 0x165   : > { %4512 = vmatpush3.msra.mxu1 %v3996_v51  ;;  %4457 = vmatprep.subr.mxu0 %v3947_v15  ;;  %v3050_v50 = vsel %vm1512_vm0, %v3048_v41, %v3049_v61  ;;  %v4069_v51 = vld [vmem:[%s5539_s4 + $0x860] sm:$0xff]  ;;  %v3047_v55 = vsel %vm1512_vm0, %v3045_v44, %v3046_v46  ;;  %v3054_v15 = vrot.slane %v3974_v3, 1  ;;  %v3986_v32 = vld [vmem:[%s5595_s11 + $0x108] sm:$0xfe]  ;;  %v3073_v61 = vrot.slane %v3988_v33, 1 }
 0x166   : > { %4513 = vmatprep.subr.mxu1 %v4011_v56  ;;  %2518 = vmatprep.mubr.f32.mxu0 %v2369_v58  ;;  %v3055_v56 = vrot.slane %v3976_v48, 1  ;;  %v4084_v58 = vld [vmem:[%s5539_s4 + $0x8d8] sm:$0xff]  ;;  %v3072_v41 = vrot.slane %v3986_v32, 1  ;;  %v3069_v44 = vrot.slane %v3985_v39, 1  ;;  %v3070_v46 = vrot.slane %v3987_v57, 1  ;;  %v4077_v48 = vld [vmem:[%s5539_s4 + $0x8a0] sm:$0xff] }
 0x167   : > { %2792 = vmatprep.mubr.f32.mxu1 %v2643_v59  ;;  %4458 = vmatpush3.msra.mxu0 %v3931_v62  ;;  %v4068_v59 = vld [vmem:[%s5539_s4 + $0x858] sm:$0xff]  ;;  %v3051_v62 = vrot.slane %v3973_v52, 1  ;;  %v4061_v53 = vld [vmem:[%s5539_s4 + $0x820] sm:$0xff]  ;;  %v4074_v45 = vld [vmem:[%s5539_s4 + $0x888] sm:$0xff] }
 0x168   : > { %4514 = vmatpush3.msra.mxu1 %v3995_v63  ;;  %2519 = vmatmul.mubr.f32.gmra.mxu0 %v2366_v4  ;;  %v3978_v63 = vld [vmem:[%s5595_s11 + $0xc8] sm:$0xfe]  ;;  %v3056_v4 = vsel %vm1512_vm0, %v3054_v15, %v3055_v56  ;;  %v3992_v3 = vld [vmem:[%s5595_s11 + $0x138] sm:$0x1]  ;;  %v3074_v52 = vsel %vm1512_vm0, %v3072_v41, %v3073_v61  ;;  %v4073_v33 = vld [vmem:[%s5539_s4 + $0x880] sm:$0xff] }
 0x169   : > { %2793 = vmatmul.mubr.f32.gmra.mxu1 %v2640_v23  ;;  %4459 = vmatprep.subr.mxu0 %v3946_v6  ;;  %v4067_v23 = vld [vmem:[%s5539_s4 + $0x850] sm:$0xff]  ;;  %v3977_v6 = vld [vmem:[%s5595_s11 + $0xc0] sm:$0xfe]  ;;  %v3053_v9 = vsel %vm1512_vm0, %v3051_v62, %v3052_v22  ;;  %v3079_v56 = vrot.slane %v3992_v3, 1  ;;  %v4030_v21 = vld [vmem:[%s5595_s11 + $0x68] sm:$0xfc] }
 0x16a   : > { %4515 = vmatprep.subr.mxu1 %v4010_v7  ;;  %4460 = vmatpush3.msra.mxu0 %v3930_v38  ;;  %v3979_v7 = vld [vmem:[%s5595_s11 + $0xd0] sm:$0x1]  ;;  %v3060_v38 = vrot.slane %v3978_v63, 1  ;;  %v3057_v13 = vrot.slane %v3977_v6, 1  ;;  %v4028_v63 = vld [vmem:[%s5595_s11 + $0x58] sm:$0x3] }
 0x16b   : > { %4516 = vmatpush3.msra.mxu1 %v3994_v10  ;;  %4461 = vmatprep.subr.mxu0 %v3945_v11  ;;  %v3061_v10 = vrot.slane %v3980_v1, 1  ;;  %v4082_v11 = vld [vmem:[%s5539_s4 + $0x8c8] sm:$0xff]  ;;  %v6172_v6 = vld [vmem:[%s5595_s11 + $0xc0] sm:$0xfc]  ;;  %v4036_v32 = vld [vmem:[%s5595_s11 + $0x98] sm:$0x3] }
 0x16c   : > { %4517 = vmatprep.subr.mxu1 %v4009_v14  ;;  %4462 = vmatpush3.msra.mxu0 %v3929_v18  ;;  %v3058_v14 = vrot.slane %v3979_v7, 1  ;;  %v3984_v18 = vld [vmem:[%s5595_s11 + $0xf8] sm:$0x1]  ;;  %v4042_v1 = vld [vmem:[%s5595_s11 + $0xc8] sm:$0xfc]  ;;  %v3323_v3 = vrot.slane %v4036_v32, 2 }
 0x16d   : > { %2920 = vmatprep.mubr.f32.mxu0 %v3914_v19  ;;  %4518 = vmatpush3.msra.mxu1 %v3993_v37  ;;  %v3922_v19 = vld [vmem:[%s5595_s11 + $0xc8] sm:$0xff]  ;;  %v3062_v37 = vsel %vm1512_vm0, %v3060_v38, %v3061_v10  ;;  %v3067_v27 = vrot.slane %v3984_v18, 1  ;;  %v6175_v7 = vld [vmem:[%s5595_s11 + $0xd0] sm:$0x3] }
 0x16e   : > { %3194 = vmatprep.mubr.f32.mxu1 %v3038_v20  ;;  %2921 = vmatmul.mubr.f32.vlgmr.msra.gmra.mxu0 %v3913_v25  ;;  %v4065_v20 = vld [vmem:[%s5539_s4 + $0x840] sm:$0xff]  ;;  %v4059_v10 = vld [vmem:[%s5539_s4 + $0x810] sm:$0xff] }
 0x16f   : > { %3195 = vmatmul.mubr.f32.vlgmr.msra.gmra.mxu1 %v3035_v43  ;;  %4543 = vmatprep.subr.mxu0 %v4088_v28  ;;  %v3921_v25 = vld [vmem:[%s5595_s11 + $0xc0] sm:$0xff]  ;;  %v3059_v43 = vsel %vm1512_vm0, %v3057_v13, %v3058_v14  ;;  %v3311_v13 = vrot.slane %v4028_v63, 2  ;;  %v3334_v14 = vrot.slane %v4042_v1, 2 }
 0x170   : > { %4599 = vmatprep.subr.mxu1 %v4088_v28  ;;  %4544 = vmatpush3.msra.mxu0 %v4072_v29  ;;  %v4080_v28 = vld [vmem:[%s5539_s4 + $0x8b8] sm:$0xff] }
 0x171   : > { %4615 = vmatpush3.msra.mxu1 %v4072_v29  ;;  %4545 = vmatprep.subr.mxu0 %v4087_v31  ;;  %v4064_v29 = vld [vmem:[%s5539_s4 + $0x838] sm:$0xff] }
 0x172   : > { %4600 = vmatprep.subr.mxu1 %v4087_v31  ;;  %2925 = vmatprep.mubr.f32.mxu0 %v3916_v34  ;;  %v4079_v31 = vld [vmem:[%s5539_s4 + $0x8b0] sm:$0xff]  ;;  %v3924_v34 = vld [vmem:[%s5595_s11 + $0xe8] sm:$0xff] }
 0x173   : > { %3199 = vmatprep.mubr.f32.mxu1 %v3044_v35  ;;  %4546 = vmatpush3.msra.mxu0 %v4071_v36  ;;  %v3068_v35 = vsel %vm1512_vm0, %v3066_v26, %v3067_v27  ;;  %v4046_v26 = vld [vmem:[%s5595_s11 + $0xe8] sm:$0xfc]  ;;  %v4048_v27 = vld [vmem:[%s5595_s11 + $0xf8] sm:$0x3] }
 0x174   : > { %4616 = vmatpush3.msra.mxu1 %v4071_v36  ;;  %2926 = vmatmul.mubr.f32.gmra.mxu0 %v3915_v5  ;;  %v4063_v36 = vld [vmem:[%s5539_s4 + $0x830] sm:$0xff]  ;;  %v3923_v5 = vld [vmem:[%s5595_s11 + $0xe0] sm:$0xff]  ;;  %v3340_v39 = vrot.slane %v4046_v26, 2  ;;  %v3341_v57 = vrot.slane %v4048_v27, 2 }
 0x175   : > { %3200 = vmatmul.mubr.f32.gmra.mxu1 %v3041_v40  ;;  %4547 = vmatprep.subr.mxu0 %v4086_v42  ;;  %v3065_v40 = vsel %vm1512_vm0, %v3063_v30, %v3064_v60  ;;  %v4045_v30 = vld [vmem:[%s5595_s11 + $0xe0] sm:$0xfc]  ;;  %v4047_v60 = vld [vmem:[%s5595_s11 + $0xf0] sm:$0x3] }
 0x176   : > { %4601 = vmatprep.subr.mxu1 %v4086_v42  ;;  %4548 = vmatpush3.msra.mxu0 %v4070_v0  ;;  %v4078_v42 = vld [vmem:[%s5539_s4 + $0x8a8] sm:$0xff] }
 0x177   : > { %4617 = vmatpush3.msra.mxu1 %v4070_v0  ;;  %4549 = vmatprep.subr.mxu0 %v4085_v47  ;;  %v4062_v0 = vld [vmem:[%s5539_s4 + $0x828] sm:$0xff] }
 0x178   : > { %4602 = vmatprep.subr.mxu1 %v4085_v47  ;;  %2930 = vmatprep.mubr.f32.mxu0 %v3918_v49  ;;  %v3990_v47 = vld [vmem:[%s5595_s11 + $0x128] sm:$0xfe]  ;;  %v3989_v49 = vld [vmem:[%s5595_s11 + $0x120] sm:$0xfe] }
 0x179   : > { %3204 = vmatprep.mubr.f32.mxu1 %v3050_v50  ;;  %4550 = vmatpush3.msra.mxu0 %v4069_v51  ;;  %v3991_v50 = vld [vmem:[%s5595_s11 + $0x130] sm:$0x1]  ;;  %v3078_v15 = vrot.slane %v3990_v47, 1  ;;  %v3075_v62 = vrot.slane %v3989_v49, 1 }
 0x17a   : > { %4618 = vmatpush3.msra.mxu1 %v4069_v51  ;;  %2931 = vmatmul.mubr.f32.gmra.mxu0 %v3917_v54  ;;  %v3926_v51 = vld [vmem:[%s5595_s11 + $0x108] sm:$0xff]  ;;  %v3925_v54 = vld [vmem:[%s5595_s11 + $0x100] sm:$0xff]  ;;  %v3076_v22 = vrot.slane %v3991_v50, 1 }
 0x17b   : > { %3205 = vmatmul.mubr.f32.gmra.mxu1 %v3047_v55  ;;  %4551 = vmatprep.subr.mxu0 %v4084_v58  ;;  %v4076_v55 = vld [vmem:[%s5539_s4 + $0x898] sm:$0xff]  ;;  %v3080_v38 = vsel %vm1512_vm0, %v3078_v15, %v3079_v56 }
 0x17c   : > { %4603 = vmatprep.subr.mxu1 %v4084_v58  ;;  %4552 = vmatpush3.msra.mxu0 %v4068_v59  ;;  %v3071_v58 = vsel %vm1512_vm0, %v3069_v44, %v3070_v46  ;;  %v3077_v24 = vsel %vm1512_vm0, %v3075_v62, %v3076_v22  ;;  %v3337_v44 = vrot.slane %v4045_v30, 2  ;;  %v3338_v46 = vrot.slane %v4047_v60, 2  ;;  %v4054_v62 = vld [vmem:[%s5595_s11 + $0x128] sm:$0xfc]  ;;  %v4056_v22 = vld [vmem:[%s5595_s11 + $0x138] sm:$0x3] }
 0x17d   : > { %4619 = vmatpush3.msra.mxu1 %v4068_v59  ;;  %4553 = vmatprep.subr.mxu0 %v4083_v17  ;;  %v4060_v59 = vld [vmem:[%s5539_s4 + $0x818] sm:$0xff] }
 0x17e   : > { %4604 = vmatprep.subr.mxu1 %v4083_v17  ;;  %2935 = vmatprep.mubr.f32.mxu0 %v3920_v2  ;;  %v4026_v17 = vld [vmem:[%s5595_s11 + $0x48] sm:$0xfc]  ;;  %v4044_v2 = vld [vmem:[%s5595_s11 + $0xd8] sm:$0x3] }
 0x17f   : > { %3209 = vmatprep.mubr.f32.mxu1 %v3056_v4  ;;  %4554 = vmatpush3.msra.mxu0 %v4067_v23  ;;  %v6166_v4 = vld [vmem:[%s5595_s11 + $0x40] sm:$0xfc] }
 0x180   : > { %4620 = vmatpush3.msra.mxu1 %v4067_v23  ;;  %2936 = vmatmul.mubr.f32.gmra.mxu0 %v3919_v8  ;;  %v6169_v23 = vld [vmem:[%s5595_s11 + $0x50] sm:$0x3]  ;;  %v3307_v18 = vrot.slane %v6166_v4, 2 }
 0x181   : > { %3210 = vmatmul.mubr.f32.gmra.mxu1 %v3053_v9  ;;  %4555 = vmatprep.subr.mxu0 %v4082_v11  ;;  %v4075_v8 = vld [vmem:[%s5539_s4 + $0x890] sm:$0xff]  ;;  %v3928_v9 = vld [vmem:[%s5595_s11 + $0x128] sm:$0xff] }
 0x182   : > { %4605 = vmatprep.subr.mxu1 %v4082_v11  ;;  %4556 = vmatpush3.msra.mxu0 %v4066_v12  ;;  %v3927_v11 = vld [vmem:[%s5595_s11 + $0x120] sm:$0xff] }
 0x183   : > { %4621 = vmatpush3.msra.mxu1 %v4066_v12  ;;  %4557 = vmatprep.subr.mxu0 %v4081_v16  ;;  %v3310_v12 = vrot.slane %v4026_v17, 2 }
 0x184   : > { %4606 = vmatprep.subr.mxu1 %v4081_v16  ;;  %2940 = vmatprep.mubr.f32.mxu0 %v3922_v19  ;;  %v3335_v16 = vrot.slane %v4044_v2, 2  ;;  %v3308_v19 = vrot.slane %v6169_v23, 2 }
 0x185   : > { %3214 = vmatprep.mubr.f32.mxu1 %v3062_v37  ;;  %4558 = vmatpush3.msra.mxu0 %v4065_v20  ;;  %v3331_v37 = vrot.slane %v6172_v6, 2 }
 0x186   : > { %4622 = vmatpush3.msra.mxu1 %v4065_v20  ;;  %2941 = vmatmul.mubr.f32.gmra.mxu0 %v3921_v25  ;;  %v3332_v20 = vrot.slane %v6175_v7, 2  ;;  %v4058_v25 = vld [vmem:[%s5539_s4 + $0x808] sm:$0xff]  ;;  %v3309_v49 = vsel %vm1884_vm1, %v3307_v18, %v3308_v19  ;;  %v3339_v7 = vsel %vm1884_vm1, %v3337_v44, %v3338_v46 }
 0x187   : > { %3215 = vmatmul.mubr.f32.gmra.mxu1 %v3059_v43  ;;  %4559 = vmatprep.subr.mxu0 %v4080_v28  ;;  %v4032_v43 = vld [vmem:[%s5595_s11 + $0x78] sm:$0x3] }
 0x188   : > { %4607 = vmatprep.subr.mxu1 %v4080_v28  ;;  %4560 = vmatpush3.msra.mxu0 %v4064_v29  ;;  %v4029_v28 = vld [vmem:[%s5595_s11 + $0x60] sm:$0xfc]  ;;  %v3333_v50 = vsel %vm1884_vm1, %v3331_v37, %v3332_v20 }
 0x189   : > { %4623 = vmatpush3.msra.mxu1 %v4064_v29  ;;  %4561 = vmatprep.subr.mxu0 %v4079_v31  ;;  %v4031_v29 = vld [vmem:[%s5595_s11 + $0x70] sm:$0x3]  ;;  %v3313_v41 = vrot.slane %v4029_v28, 2 }
 0x18a   : > { %4608 = vmatprep.subr.mxu1 %v4079_v31  ;;  %2945 = vmatprep.mubr.f32.mxu0 %v3924_v34  ;;  %v4034_v31 = vld [vmem:[%s5595_s11 + $0x88] sm:$0xfc]  ;;  %v4057_v34 = vld [vmem:[%s5539_s4 + $0x800] sm:$0xff]  ;;  %v3314_v61 = vrot.slane %v4031_v29, 2  ;;  %s6373_s4 = scalar_lea.vmem [#allocation3], %s3671_s29 }
 0x18b   : > { %3219 = vmatprep.mubr.f32.mxu1 %v3068_v35  ;;  %4562 = vmatpush3.msra.mxu0 %v4063_v36  ;;  %v3316_v35 = vrot.slane %v4030_v21, 2  ;;  %v3322_v47 = vrot.slane %v4034_v31, 2  ;;  %s3563_s5 = sshll.u32 %s6373_s4, 4  ;;  %s6390_s5 = int_to_ptr.vmem [resolvable:$true] %s3563_s5 }
 0x18c   : > { %4624 = vmatpush3.msra.mxu1 %v4063_v36  ;;  %2946 = vmatmul.mubr.f32.gmra.mxu0 %v3923_v5  ;;  %v3317_v36 = vrot.slane %v4032_v43, 2  ;;  %v3312_v5 = vsel %vm1884_vm1, %v3310_v12, %v3311_v13  ;;  %v3315_v6 = vsel %vm1884_vm1, %v3313_v41, %v3314_v61  ;;  %v3352_v13 = vrot.slane %v4054_v62, 2  ;;  %s4724_s26 = scalar_lea.vmem %s6390_s5, 1024 }
 0x18d   : > { %3220 = vmatmul.mubr.f32.gmra.mxu1 %v3065_v40  ;;  %4563 = vmatprep.subr.mxu0 %v4078_v42  ;;  %v3336_v40 = vsel %vm1884_vm1, %v3334_v14, %v3335_v16  ;;  %v3353_v14 = vrot.slane %v4056_v22, 2  ;;  %v4053_v16 = vld [vmem:[%s5595_s11 + $0x120] sm:$0xfc]  ;;  %p4725_p5 = scmp.ne.s32.totalorder %s6390_s5, %s4724_s26 }
 0x18e   : > { %4609 = vmatprep.subr.mxu1 %v4078_v42  ;;  %4564 = vmatpush3.msra.mxu0 %v4062_v0  ;;  %v4050_v42 = vld [vmem:[%s5595_s11 + $0x108] sm:$0xfc]  ;;  %v3349_v26 = vrot.slane %v4053_v16, 2 }
 0x18f   : > { %4625 = vmatpush3.msra.mxu1 %v4062_v0  ;;  %4565 = vmatprep.subr.mxu0 %v4077_v48  ;;  %v4052_v0 = vld [vmem:[%s5595_s11 + $0x118] sm:$0x3]  ;;  %v3346_v15 = vrot.slane %v4050_v42, 2  ;;  %v3354_v30 = vsel %vm1884_vm1, %v3352_v13, %v3353_v14  ;;  %p4726_p6 = pnand %p4725_p5, %p4937_p10 }
 0x190   : > { %4610 = vmatprep.subr.mxu1 %v4077_v48  ;;  %2950 = vmatprep.mubr.f32.mxu0 %v3926_v51  ;;  %v4033_v48 = vld [vmem:[%s5595_s11 + $0x80] sm:$0xfc]  ;;  %v4035_v51 = vld [vmem:[%s5595_s11 + $0x90] sm:$0x3]  ;;  %v3347_v56 = vrot.slane %v4052_v0, 2 }
 0x191   : > { %3224 = vmatprep.mubr.f32.mxu1 %v3074_v52  ;;  %4566 = vmatpush3.msra.mxu0 %v4061_v53  ;;  %v4049_v52 = vld [vmem:[%s5595_s11 + $0x100] sm:$0xfc]  ;;  %v3319_v17 = vrot.slane %v4033_v48, 2  ;;  %v3320_v63 = vrot.slane %v4035_v51, 2  ;;  %p4727_p7 = pneg %p4726_p6 }
 0x192   : > { %4626 = vmatpush3.msra.mxu1 %v4061_v53  ;;  %2951 = vmatmul.mubr.f32.gmra.mxu0 %v3925_v54  ;;  %v4051_v53 = vld [vmem:[%s5595_s11 + $0x110] sm:$0x3]  ;;  %v3318_v54 = vsel %vm1884_vm1, %v3316_v35, %v3317_v36  ;;  %v3343_v1 = vrot.slane %v4049_v52, 2  ;;  %v3348_v12 = vsel %vm1884_vm1, %v3346_v15, %v3347_v56 }
 0x193   : > { %3225 = vmatmul.mubr.f32.gmra.mxu1 %v3071_v58  ;;  %4567 = vmatprep.subr.mxu0 %v4076_v55  ;;  %v4038_v58 = vld [vmem:[%s5595_s11 + $0xa8] sm:$0xfc]  ;;  %v3344_v2 = vrot.slane %v4051_v53, 2  ;;  %v3321_v21 = vsel %vm1884_vm1, %v3319_v17, %v3320_v63 }
 0x194   : > { %4611 = vmatprep.subr.mxu1 %v4076_v55  ;;  %4568 = vmatpush3.msra.mxu0 %v4060_v59  ;;  %v3342_v55 = vsel %vm1884_vm1, %v3340_v39, %v3341_v57 }
 0x195   : > { %4627 = vmatpush3.msra.mxu1 %v4060_v59  ;;  %4569 = vmatprep.subr.mxu0 %v4075_v8  ;;  %v4040_v59 = vld [vmem:[%s5595_s11 + $0xb8] sm:$0x3]  ;;  %v3345_v43 = vsel %vm1884_vm1, %v3343_v1, %v3344_v2 }
 0x196   : > { %4612 = vmatprep.subr.mxu1 %v4075_v8  ;;  %2955 = vmatprep.mubr.f32.mxu0 %v3928_v9  ;;  %v3328_v8 = vrot.slane %v4038_v58, 2  ;;  %v3329_v9 = vrot.slane %v4040_v59, 2 }
 0x197   : > { %3229 = vmatprep.mubr.f32.mxu1 %v3080_v38  ;;  %4570 = vmatpush3.msra.mxu0 %v4059_v10  ;;  %v4037_v38 = vld [vmem:[%s5595_s11 + $0xa0] sm:$0xfc] }
 0x198   : > { %4628 = vmatpush3.msra.mxu1 %v4059_v10  ;;  %2956 = vmatmul.mubr.f32.gmra.mxu0 %v3927_v11  ;;  %v4039_v10 = vld [vmem:[%s5595_s11 + $0xb0] sm:$0x3]  ;;  %v3324_v11 = vsel %vm1884_vm1, %v3322_v47, %v3323_v3  ;;  %v3330_v29 = vsel %vm1884_vm1, %v3328_v8, %v3329_v9 }
 0x199   : > { %3230 = vmatmul.mubr.f32.gmra.mxu1 %v3077_v24  ;;  %4571 = vmatprep.subr.mxu0 %v4074_v45  ;;  %v3325_v24 = vrot.slane %v4037_v38, 2 }
 0x19a   : > { %4613 = vmatprep.subr.mxu1 %v4074_v45  ;;  %4572 = vmatpush3.msra.mxu0 %v4058_v25  ;;  %v4055_v45 = vld [vmem:[%s5595_s11 + $0x130] sm:$0x3]  ;;  %s6399_s11 = scalar_lea.hbm %s6465_s3, %s4092_s9 }
 0x19b   : > { %4629 = vmatpush3.msra.mxu1 %v4058_v25  ;;  %4573 = vmatprep.subr.mxu0 %v4073_v33  ;;  %v3326_v25 = vrot.slane %v4039_v10, 2  ;;  %v3350_v27 = vrot.slane %v4055_v45, 2 }
 0x19c   : > { %4614 = vmatprep.subr.mxu1 %v4073_v33  ;;  %4574 = vmatpush3.msra.mxu0 %v4057_v34 }
 0x19d   : > { %4630 = vmatpush3.msra.mxu1 %v4057_v34  ;;  %3468 = vmatprep.mubr.f32.mxu0 %v3312_v5  ;;  %v3327_v32 = vsel %vm1884_vm1, %v3325_v24, %v3326_v25  ;;  %v3351_v35 = vsel %vm1884_vm1, %v3349_v26, %v3350_v27 }
 0x19e   : > { %3488 = vmatprep.mubr.f32.mxu1 %v3336_v40  ;;  %3469 = vmatmul.mubr.f32.vlgmr.msra.gmra.mxu0 %v3309_v49  ;;  %v4127_v4 = vpop.f32.mrf.mxu0 }
 0x19f   : > { %3489 = vmatmul.mubr.f32.vlgmr.msra.gmra.mxu1 %v3333_v50  ;;  %v4183_v23 = vpop.f32.mrf.mxu1  ;;  %3473 = vmatprep.mubr.f32.mxu0 %v3318_v54 }
 0x1a0   : > { %3493 = vmatprep.mubr.f32.mxu1 %v3342_v55  ;;  %v4128_v18 = vpop.f32.mrf.mxu0 }
 0x1a1   : > { %v4184_v19 = vpop.f32.mrf.mxu1  ;;  %v4129_v37 = vadd.f32 %v4128_v18, %v4127_v4 }
 0x1a2   : > { %v4185_v20 = vadd.f32 %v4184_v19, %v4183_v23  ;;  %3474 = vmatmul.mubr.f32.gmra.mxu0 %v3315_v6 }
 0x1a3   : > { %3494 = vmatmul.mubr.f32.gmra.mxu1 %v3339_v7  ;;  %3478 = vmatprep.mubr.f32.mxu0 %v3324_v11 }
 0x1a4   : > { %3498 = vmatprep.mubr.f32.mxu1 %v3348_v12  ;;  %v6227_v28 = vadd.f32 %v4185_v20, %v4129_v37  ;;  %v4130_v60 = vpop.f32.mrf.mxu0 }
 0x1a5   : > { %v4186_v31 = vpop.f32.mrf.mxu1 }
 0x1a6   : > { %3479 = vmatmul.mubr.f32.gmra.mxu0 %v3321_v21  ;;  %v4131_v33 = vpop.f32.mrf.mxu0 }
 0x1a7   : > { %3499 = vmatmul.mubr.f32.gmra.mxu1 %v3345_v43  ;;  %v4187_v34 = vpop.f32.mrf.mxu1  ;;  %3483 = vmatprep.mubr.f32.mxu0 %v3330_v29  ;;  %v4132_v36 = vadd.f32 %v4131_v33, %v4130_v60 }
 0x1a8   : > { %3503 = vmatprep.mubr.f32.mxu1 %v3354_v30  ;;  %v4188_v39 = vadd.f32 %v4187_v34, %v4186_v31 }
 0x1aa   : > { %v1787_v57 = vadd.f32 %v4188_v39, %v4132_v36  ;;  %3484 = vmatmul.mubr.f32.gmra.mxu0 %v3327_v32  ;;  %v4133_v5 = vpop.f32.mrf.mxu0 }
 0x1ab   : > { %3504 = vmatmul.mubr.f32.gmra.mxu1 %v3351_v35  ;;  %v4189_v40 = vpop.f32.mrf.mxu1 }
 0x1ac   : > { %v4134_v41 = vpop.f32.mrf.mxu0 }
 0x1ad   : > { %v4190_v61 = vpop.f32.mrf.mxu1  ;;  %v4135_v42 = vadd.f32 %v4134_v41, %v4133_v5 }
 0x1ae   : > { %v4191_v0 = vadd.f32 %v4190_v61, %v4189_v40 }
 0x1b0   : > { %v1792_v44 = vadd.f32 %v4191_v0, %v4135_v42  ;;  %v4136_v46 = vpop.f32.mrf.mxu0 }
 0x1b1   : > { %v4192_v47 = vpop.f32.mrf.mxu1 }
 0x1b2   : > { %v4137_v3 = vpop.f32.mrf.mxu0 }
 0x1b3   : > { %v4193_v48 = vpop.f32.mrf.mxu1  ;;  %v4138_v49 = vadd.f32 %v4137_v3, %v4136_v46 }
 0x1b4   : > { %v4194_v50 = vadd.f32 %v4193_v48, %v4192_v47 }
 0x1b6   : > { %v1797_v51 = vadd.f32 %v4194_v50, %v4138_v49  ;;  %v4139_v52 = vpop.f32.mrf.mxu0 }
 0x1b7   : > { %v4195_v53 = vpop.f32.mrf.mxu1 }
 0x1b8   : > { %v4140_v54 = vpop.f32.mrf.mxu0 }
 0x1b9   : > { %v4196_v55 = vpop.f32.mrf.mxu1  ;;  %v4141_v15 = vadd.f32 %v4140_v54, %v4139_v52 }
 0x1ba   : > { %v4197_v56 = vadd.f32 %v4196_v55, %v4195_v53 }
 0x1bc   : > { %v1802_v58 = vadd.f32 %v4197_v56, %v4141_v15  ;;  %v4142_v59 = vpop.f32.mrf.mxu0 }
 0x1bd   : > { %v4198_v62 = vpop.f32.mrf.mxu1 }
 0x1be   : > { %v4143_v22 = vpop.f32.mrf.mxu0 }
 0x1bf   : > { %v4199_v17 = vpop.f32.mrf.mxu1  ;;  %v4144_v63 = vadd.f32 %v4143_v22, %v4142_v59 }
 0x1c0   : > { %v4200_v1 = vadd.f32 %v4199_v17, %v4198_v62 }
 0x1c2   : > { %v1807_v2 = vadd.f32 %v4200_v1, %v4144_v63  ;;  %v4145_v4 = vpop.f32.mrf.mxu0 }
 0x1c3   : > { %v4201_v23 = vpop.f32.mrf.mxu1 }
 0x1c4   : > { %v4146_v6 = vpop.f32.mrf.mxu0 }
 0x1c5   : > { %v4202_v7 = vpop.f32.mrf.mxu1  ;;  %v4147_v8 = vadd.f32 %v4146_v6, %v4145_v4 }
 0x1c6   : > { %v4203_v9 = vadd.f32 %v4202_v7, %v4201_v23 }
 0x1c8   : > { %v1812_v38 = vadd.f32 %v4203_v9, %v4147_v8  ;;  %v4148_v10 = vpop.f32.mrf.mxu0 }
 0x1c9   : > { %v4204_v11 = vpop.f32.mrf.mxu1 }
 0x1ca   : > { %v4149_v12 = vpop.f32.mrf.mxu0 }
 0x1cb   : > { %v4205_v13 = vpop.f32.mrf.mxu1  ;;  %v4150_v14 = vadd.f32 %v4149_v12, %v4148_v10 }
 0x1cc   : > { %v4206_v16 = vadd.f32 %v4205_v13, %v4204_v11 }
 0x1ce   : > { %v6233_v45 = vadd.f32 %v4206_v16, %v4150_v14  ;;  %v4239_v18 = vpop.f32.mrf.mxu0 }
 0x1cf   : > { %v4295_v19 = vpop.f32.mrf.mxu1 }
 0x1d0   : > { %v4240_v37 = vpop.f32.mrf.mxu0 }
 0x1d1   : > { %v4296_v20 = vpop.f32.mrf.mxu1  ;;  %v4241_v21 = vadd.f32 %v4240_v37, %v4239_v18 }
 0x1d2   : > { %v4297_v24 = vadd.f32 %v4296_v20, %v4295_v19 }
 0x1d3   : > { %v2087_v25 = vadd.f32 %v4241_v21, %v6227_v28 }
 0x1d4   : > { %v4242_v43 = vpop.f32.mrf.mxu0 }
 0x1d5   : > { %v4298_v26 = vpop.f32.mrf.mxu1  ;;  %v6236_v27 = vadd.f32 %v4297_v24, %v2087_v25 }
 0x1d6   : > { %v4243_v29 = vpop.f32.mrf.mxu0 }
 0x1d7   : > { %v4299_v30 = vpop.f32.mrf.mxu1  ;;  %v4244_v60 = vadd.f32 %v4243_v29, %v4242_v43 }
 0x1d8   : > { %v4300_v31 = vadd.f32 %v4299_v30, %v4298_v26 }
 0x1d9   : > { %v2088_v32 = vadd.f32 %v4244_v60, %v1787_v57 }
 0x1da   : > { %v4245_v33 = vpop.f32.mrf.mxu0 }
 0x1db   : > { %v4301_v34 = vpop.f32.mrf.mxu1  ;;  %v6238_v35 = vadd.f32 %v4300_v31, %v2088_v32 }
 0x1dc   : > { %v4246_v36 = vpop.f32.mrf.mxu0 }
 0x1dd   : > { %v4302_v39 = vpop.f32.mrf.mxu1  ;;  %v4247_v5 = vadd.f32 %v4246_v36, %v4245_v33 }
 0x1de   : > { %v4303_v40 = vadd.f32 %v4302_v39, %v4301_v34 }
 0x1df   : > { %v2089_v41 = vadd.f32 %v4247_v5, %v1792_v44 }
 0x1e0   : > { %v4248_v61 = vpop.f32.mrf.mxu0 }
 0x1e1   : > { %v4304_v28 = vpop.f32.mrf.mxu1  ;;  %v6240_v42 = vadd.f32 %v4303_v40, %v2089_v41 }
 0x1e2   : > { %v4249_v0 = vpop.f32.mrf.mxu0 }
 0x1e3   : > { %v4305_v46 = vpop.f32.mrf.mxu1  ;;  %v4250_v47 = vadd.f32 %v4249_v0, %v4248_v61 }
 0x1e4   : > { %v4306_v3 = vadd.f32 %v4305_v46, %v4304_v28 }
 0x1e5   : > { %v2090_v48 = vadd.f32 %v4250_v47, %v1797_v51 }
 0x1e6   : > { %v4251_v49 = vpop.f32.mrf.mxu0 }
 0x1e7   : > { %v4307_v57 = vpop.f32.mrf.mxu1  ;;  %v6242_v50 = vadd.f32 %v4306_v3, %v2090_v48 }
 0x1e8   : > { %v4252_v52 = vpop.f32.mrf.mxu0 }
 0x1e9   : > { %v4308_v53 = vpop.f32.mrf.mxu1  ;;  %v4253_v54 = vadd.f32 %v4252_v52, %v4251_v49 }
 0x1ea   : > { %v4309_v55 = vadd.f32 %v4308_v53, %v4307_v57 }
 0x1eb   : > { %v2091_v15 = vadd.f32 %v4253_v54, %v1802_v58 }
 0x1ec   : > { %v4254_v56 = vpop.f32.mrf.mxu0 }
 0x1ed   : > { %v4310_v44 = vpop.f32.mrf.mxu1  ;;  %v6244_v59 = vadd.f32 %v4309_v55, %v2091_v15 }
 0x1ee   : > { %v4255_v62 = vpop.f32.mrf.mxu0 }
 0x1ef   : > { %v4311_v22 = vpop.f32.mrf.mxu1  ;;  %v4256_v17 = vadd.f32 %v4255_v62, %v4254_v56 }
 0x1f0   : > { %v4312_v63 = vadd.f32 %v4311_v22, %v4310_v44 }
 0x1f1   : > { %v2092_v1 = vadd.f32 %v4256_v17, %v1807_v2 }
 0x1f2   : > { %v4257_v4 = vpop.f32.mrf.mxu0 }
 0x1f3   : > { %v4313_v51 = vpop.f32.mrf.mxu1  ;;  %v6246_v23 = vadd.f32 %v4312_v63, %v2092_v1 }
 0x1f4   : > { %v4258_v6 = vpop.f32.mrf.mxu0 }
 0x1f5   : > { %v4314_v7 = vpop.f32.mrf.mxu1  ;;  %v4259_v8 = vadd.f32 %v4258_v6, %v4257_v4 }
 0x1f6   : > { %v4315_v9 = vadd.f32 %v4314_v7, %v4313_v51 }
 0x1f7   : > { %v2093_v10 = vadd.f32 %v4259_v8, %v1812_v38 }
 0x1f8   : > { %v4260_v11 = vpop.f32.mrf.mxu0 }
 0x1f9   : > { %v4316_v58 = vpop.f32.mrf.mxu1  ;;  %v6248_v12 = vadd.f32 %v4315_v9, %v2093_v10 }
 0x1fa   : > { %v4261_v13 = vpop.f32.mrf.mxu0 }
 0x1fb   : > { %v4317_v14 = vpop.f32.mrf.mxu1  ;;  %v4262_v16 = vadd.f32 %v4261_v13, %v4260_v11 }
 0x1fc   : > { %v4318_v18 = vadd.f32 %v4317_v14, %v4316_v58 }
 0x1fd   : > { %v2094_v19 = vadd.f32 %v4262_v16, %v6233_v45 }
 0x1fe   : > { %v4351_v2 = vpop.f32.mrf.mxu0 }
 0x1ff   : > { %v6251_v37 = vpop.f32.mrf.mxu1  ;;  %v6253_v20 = vadd.f32 %v4318_v18, %v2094_v19 }
 0x200   : > { %v4352_v21 = vpop.f32.mrf.mxu0 }
 0x201   : > { %6469 = vst [vmem:[#allocation6_spill] sm:$0xff] %v6253_v20  ;;  %v6255_v24 = vpop.f32.mrf.mxu1 }
 0x204   : > { %v4354_v25 = vpop.f32.mrf.mxu0 }
 0x205   : > { %v6257_v38 = vpop.f32.mrf.mxu1 }
 0x206   : > { %v4355_v43 = vpop.f32.mrf.mxu0 }
 0x207   : > { %v6259_v26 = vpop.f32.mrf.mxu1 }
 0x20a   : > { %v4357_v29 = vpop.f32.mrf.mxu0 }
 0x20b   : > { %v6261_v30 = vpop.f32.mrf.mxu1 }
 0x20c   : > { %v4358_v60 = vpop.f32.mrf.mxu0 }
 0x20d   : > { %v6263_v31 = vpop.f32.mrf.mxu1 }
 0x210   : > { %v6265_v45 = vpop.f32.mrf.mxu0 }
 0x211   : > { %v6267_v32 = vpop.f32.mrf.mxu1 }
 0x212   : > { %v6269_v33 = vpop.f32.mrf.mxu0 }
 0x213   : > { %v6271_v34 = vpop.f32.mrf.mxu1 }
 0x216   : > { %v4363_v36 = vpop.f32.mrf.mxu0 }
 0x217   : > { %v4419_v39 = vpop.f32.mrf.mxu1 }
 0x218   : > { %v4364_v5 = vpop.f32.mrf.mxu0 }
 0x219   : > { %v4420_v40 = vpop.f32.mrf.mxu1 }
 0x21c   : > { %v4366_v41 = vpop.f32.mrf.mxu0 }
 0x21d   : > { %v6273_v61 = vpop.f32.mrf.mxu1 }
 0x21e   : > { %v4367_v28 = vpop.f32.mrf.mxu0 }
 0x21f   : > { %v6275_v0 = vpop.f32.mrf.mxu1 }
 0x222   : > { %v4369_v46 = vpop.f32.mrf.mxu0 }
 0x223   : > { %v6277_v47 = vpop.f32.mrf.mxu1 }
 0x224   : > { %v4370_v3 = vpop.f32.mrf.mxu0 }
 0x225   : > { %v6279_v48 = vpop.f32.mrf.mxu1 }
 0x228   : > { %v6281_v49 = vpop.f32.mrf.mxu0 }
 0x229   : > { %v6283_v57 = vpop.f32.mrf.mxu1 }
 0x22a   : > { %6470 = vst [vmem:[#allocation7_spill] sm:$0xff] %v6283_v57  ;;  %v6285_v52 = vpop.f32.mrf.mxu0  ;;  %v4359_v57 = vadd.f32 %v4358_v60, %v4357_v29 }
 0x22b   : > { %v6287_v53 = vpop.f32.mrf.mxu1 }
 0x22c   : > { %6471 = vst [vmem:[#allocation8_spill] sm:$0xff] %v6287_v53 }
 0x22e   : > { %v4463_v54 = vpop.f32.mrf.mxu0 }
 0x22f   : > { %v6289_v55 = vpop.f32.mrf.mxu1 }
 0x230   : > { %v4464_v15 = vpop.f32.mrf.mxu0 }
 0x231   : > { %v4520_v56 = vpop.f32.mrf.mxu1 }
 0x234   : > { %v4466_v44 = vpop.f32.mrf.mxu0 }
 0x235   : > { %v6291_v62 = vpop.f32.mrf.mxu1 }
 0x236   : > { %6472 = vst [vmem:[#allocation9_spill] sm:$0xff] %v6291_v62  ;;  %v4467_v22 = vpop.f32.mrf.mxu0 }
 0x237   : > { %v6293_v17 = vpop.f32.mrf.mxu1 }
 0x238   : > { %6473 = vst [vmem:[#allocation10_spill] sm:$0xff] %v6293_v17  ;;  %v4368_v17 = vadd.f32 %v4367_v28, %v4366_v41  ;;  %v4415_v41 = vadd.f32 %v6263_v31, %v6261_v30 }
 0x23a   : > { %v4469_v63 = vpop.f32.mrf.mxu0  ;;  %v2529_v60 = vadd.f32 %v4368_v17, %v6246_v23 }
 0x23b   : > { %v6295_v1 = vpop.f32.mrf.mxu1 }
 0x23c   : > { %6474 = vst [vmem:[#allocation11_spill] sm:$0xff] %v6295_v1  ;;  %v4470_v4 = vpop.f32.mrf.mxu0 }
 0x23d   : > { %v6297_v51 = vpop.f32.mrf.mxu1 }
 0x23e   : > { %6475 = vst [vmem:[#allocation12_spill] sm:$0xff] %v6297_v51  ;;  %v4353_v51 = vadd.f32 %v4352_v21, %v4351_v2 }
 0x240   : > { %v6299_v6 = vpop.f32.mrf.mxu0  ;;  %v2524_v20 = vadd.f32 %v4353_v51, %v6236_v27 }
 0x241   : > { %6476 = vst [vmem:[#allocation13_spill] sm:$0xff] %v6299_v6  ;;  %v6301_v7 = vpop.f32.mrf.mxu1 }
 0x242   : > { %6477 = vst [vmem:[#allocation14_spill] sm:$0xff] %v6301_v7  ;;  %v6303_v8 = vpop.f32.mrf.mxu0  ;;  %v4365_v7 = vadd.f32 %v4364_v5, %v4363_v36  ;;  %v4371_v5 = vadd.f32 %v4370_v3, %v4369_v46  ;;  %v4521_v46 = vadd.f32 %v4520_v56, %v6289_v55  ;;  %v6482_v55 = vld [vmem:[#allocation9_spill] sm:$0xff]  ;;  %v6483_v56 = vld [vmem:[#allocation10_spill] sm:$0xff] }
 0x243   : > { %6478 = vst [vmem:[#allocation15_spill] sm:$0xff] %v6303_v8  ;;  %v6305_v9 = vpop.f32.mrf.mxu1 }
 0x244   : > { %6479 = vst [vmem:[#allocation16_spill] sm:$0xff] %v6305_v9  ;;  %v4356_v9 = vadd.f32 %v4355_v43, %v4354_v25  ;;  %v2528_v62 = vadd.f32 %v4365_v7, %v6244_v59  ;;  %v2526_v25 = vadd.f32 %v4359_v57, %v6240_v42  ;;  %v4421_v43 = vadd.f32 %v4420_v40, %v4419_v39  ;;  %v6485_v7 = vld [vmem:[#allocation7_spill] sm:$0xff] }
 0x245   : > { %v4412_v59 = vadd.f32 %v6259_v26, %v6257_v38  ;;  %v4468_v42 = vadd.f32 %v4467_v22, %v4466_v44  ;;  %v4418_v40 = vadd.f32 %v6271_v34, %v6267_v32  ;;  %v4427_v32 = vadd.f32 %v6279_v48, %v6277_v47 }
 0x246   : > { %v4475_v10 = vpop.f32.mrf.mxu0  ;;  %v2525_v36 = vadd.f32 %v4356_v9, %v6238_v35  ;;  %v4362_v35 = vadd.f32 %v6269_v33, %v6265_v45  ;;  %v2802_v28 = vadd.f32 %v4421_v43, %v2528_v62  ;;  %v2800_v39 = vadd.f32 %v4415_v41, %v2526_v25  ;;  %v6486_v9 = vld [vmem:[#allocation8_spill] sm:$0xff] }
 0x247   : > { %v4531_v11 = vpop.f32.mrf.mxu1  ;;  %v2530_v45 = vadd.f32 %v4371_v5, %v6248_v12  ;;  %v4374_v33 = vadd.f32 %v6285_v52, %v6281_v49 }
 0x248   : > { %v4476_v58 = vpop.f32.mrf.mxu0  ;;  %v2799_v26 = vadd.f32 %v4412_v59, %v2525_v36 }
 0x249   : > { %v4532_v13 = vpop.f32.mrf.mxu1  ;;  %v4477_v29 = vadd.f32 %v4476_v58, %v4475_v10  ;;  %v4430_v10 = vadd.f32 %v6486_v9, %v6485_v7 }
 0x24a   : > { %v2962_v57 = vadd.f32 %v4468_v42, %v2799_v26  ;;  %v6490_v36 = vld [vmem:[#allocation15_spill] sm:$0xff] }
 0x24b   : > { %v2965_v30 = vadd.f32 %v4477_v29, %v2802_v28 }
 0x24c   : > { %v4478_v14 = vpop.f32.mrf.mxu0 }
 0x24d   : > { %v6307_v16 = vpop.f32.mrf.mxu1 }
 0x24e   : > { %6480 = vst [vmem:[#allocation17_spill] sm:$0xff] %v6307_v16  ;;  %v4479_v18 = vpop.f32.mrf.mxu0  ;;  %v4409_v16 = vadd.f32 %v6255_v24, %v6251_v37 }
 0x24f   : > { %v6309_v19 = vpop.f32.mrf.mxu1  ;;  %v4480_v23 = vadd.f32 %v4479_v18, %v4478_v14 }
 0x250   : > { %6481 = vst [vmem:[#allocation18_spill] sm:$0xff] %v6309_v19  ;;  %v4465_v19 = vadd.f32 %v4464_v15, %v4463_v54  ;;  %v2798_v27 = vadd.f32 %v4409_v16, %v2524_v20  ;;  %v4424_v20 = vadd.f32 %v6275_v0, %v6273_v61  ;;  %v2527_v0 = vadd.f32 %v4362_v35, %v6242_v50 }
 0x251   : > { %v4471_v54 = vadd.f32 %v4470_v4, %v4469_v63  ;;  %v4533_v15 = vadd.f32 %v4532_v13, %v4531_v11  ;;  %v4524_v50 = vadd.f32 %v6483_v56, %v6482_v55  ;;  %v2804_v63 = vadd.f32 %v4427_v32, %v2530_v45  ;;  %v6484_v4 = vld [vmem:[#allocation6_spill] sm:$0xff] }
 0x252   : > { %v4481_v1 = vpop.f32.mrf.mxu0  ;;  %v2961_v38 = vadd.f32 %v4465_v19, %v2798_v27  ;;  %v2803_v31 = vadd.f32 %v4424_v20, %v2529_v60  ;;  %v2531_v51 = vadd.f32 %v4374_v33, %v6484_v4  ;;  %v6489_v19 = vld [vmem:[#allocation13_spill] sm:$0xff]  ;;  %v2801_v42 = vadd.f32 %v4418_v40, %v2527_v0  ;;  %v6493_v32 = vld [vmem:[#allocation14_spill] sm:$0xff] }
 0x253   : > { %v6311_v6 = vpop.f32.mrf.mxu1  ;;  %v3239_v62 = vadd.f32 %v4533_v15, %v2965_v30  ;;  %v3236_v13 = vadd.f32 %v4524_v50, %v2962_v57  ;;  %v2963_v14 = vadd.f32 %v4471_v54, %v2800_v39  ;;  %v4474_v25 = vadd.f32 %v6490_v36, %v6489_v19 }
 0x254   : > { %v4482_v53 = vpop.f32.mrf.mxu0  ;;  %v3235_v12 = vadd.f32 %v4521_v46, %v2961_v38  ;;  %v2966_v34 = vadd.f32 %v4480_v23, %v2803_v31  ;;  %v2805_v20 = vadd.f32 %v4430_v10, %v2531_v51  ;;  %v6491_v38 = vld [vmem:[#allocation11_spill] sm:$0xff]  ;;  %v6492_v23 = vld [vmem:[#allocation12_spill] sm:$0xff] }
 0x255   : > { %v6313_v8 = vpop.f32.mrf.mxu1  ;;  %v4483_v44 = vadd.f32 %v4482_v53, %v4481_v1  ;;  %v6487_v47 = vld [vmem:[#allocation17_spill] sm:$0xff]  ;;  %v6361_v53 = vld [vmem:[%s1399_s27] ss:$0 sm:$0xff]  ;;  %v4527_v26 = vadd.f32 %v6492_v23, %v6491_v38  ;;  %s4728_s27 = sshll.u32 %s4834_s23, 4  ;;  %s4729_s27 = int_to_ptr.vmem [resolvable:$false] %s4728_s27 }
 0x256   : > { %v4539_v39 = vadd.f32 %v6313_v8, %v6311_v6  ;;  %s4730_s29 = scalar_lea.vmem %s4729_s27, 2048  ;;  %p4731_p8 = scmp.lt.s32.totalorder %s6390_s5, %s4729_s27 }
 0x257   : > { %v6488_v48 = vld [vmem:[#allocation18_spill] sm:$0xff]  ;;  %v2967_v29 = vadd.f32 %v4483_v44, %v2804_v63  ;;  %v3237_v46 = vadd.f32 %v4527_v26, %v2963_v14  ;;  %p4732_p9 = scmp.lt.s32.totalorder %s4730_s29, %s4724_s26 }
 0x258   : > { %v4484_v2 = vpop.f32.mrf.mxu0  ;;  %v4536_v11 = vadd.f32 %v6488_v48, %v6487_v47 }
 0x259   : > { %v6320_v21 = vpop.f32.mrf.mxu1  ;;  %p4733_p11 = por %p4732_p9, %p4731_p8 }
 0x25a   : > { %v4485_v37 = vpop.f32.mrf.mxu0  ;;  %v3240_v43 = vadd.f32 %v4536_v11, %v2966_v34 }
 0x25b   : > { %v6327_v24 = vpop.f32.mrf.mxu1  ;;  %v4486_v27 = vadd.f32 %v4485_v37, %v4484_v2  ;;  %p4734_p13 = pnand %p4733_p11, %p4727_p7 }
 0x25c   : > { %v4542_v44 = vadd.f32 %v6327_v24, %v6320_v21 }
 0x25d   : > { %v2968_v57 = vadd.f32 %v4486_v27, %v2805_v20 }
 0x25e   : > { %v4575_v3 = vpop.f32.mrf.mxu0 }
 0x25f   : > { %v4587_v61 = vpop.f32.mrf.mxu1 }
 0x260   : > { %v4576_v49 = vpop.f32.mrf.mxu0 }
 0x261   : > { %v4588_v52 = vpop.f32.mrf.mxu1  ;;  %v4577_v22 = vadd.f32 %v4576_v49, %v4575_v3  ;;  %v2964_v3 = vadd.f32 %v4474_v25, %v2801_v42 }
 0x262   : > { %v4589_v17 = vadd.f32 %v4588_v52, %v4587_v61  ;;  %v4578_v1 = vpop.f32.mrf.mxu0  ;;  %v3241_v61 = vadd.f32 %v4539_v39, %v2967_v29 }
 0x263   : > { %v4590_v58 = vpop.f32.mrf.mxu1  ;;  %v3509_v16 = vadd.f32 %v4577_v22, %v3235_v12  ;;  %v6494_v12 = vld [vmem:[#allocation16_spill] sm:$0xff] }
 0x264   : > { %v3513_v18 = vadd.f32 %v4589_v17, %v3239_v62  ;;  %v4579_v59 = vpop.f32.mrf.mxu0  ;;  %v4530_v34 = vadd.f32 %v6494_v12, %v6493_v32  ;;  %v3242_v17 = vadd.f32 %v4542_v44, %v2968_v57 }
 0x265   : > { %v4591_v60 = vpop.f32.mrf.mxu1  ;;  %v3524_v5 = vadd.f32 %v6361_v53, %v3509_v16  ;;  %v4580_v35 = vadd.f32 %v4579_v59, %v4578_v1 }
 0x266   : > { %v3528_v41 = vadd.f32 %v6361_v53, %v3513_v18  ;;  %v4592_v28 = vadd.f32 %v4591_v60, %v4590_v58  ;;  %v4581_v30 = vpop.f32.mrf.mxu0  ;;  %v3238_v22 = vadd.f32 %v4530_v34, %v2964_v3 }
 0x267   : > { %v4593_v31 = vpop.f32.mrf.mxu1  ;;  %v3532_v45 = vmax.f32 %v3524_v5, 0.0  ;;  %v3510_v37 = vadd.f32 %v4580_v35, %v3236_v13 }
 0x268   : > { %v3536_v2 = vmax.f32 %v3528_v41, 0.0  ;;  %v3514_v33 = vadd.f32 %v4592_v28, %v3240_v43  ;;  %v4582_v54 = vpop.f32.mrf.mxu0 }
 0x269   : > { %v4594_v40 = vpop.f32.mrf.mxu1  ;;  %3540 = vst [vmem:[%s6373_s4] sm:$0xff] %v3532_v45  ;;  %v3525_v6 = vadd.f32 %v6361_v53, %v3510_v37  ;;  %v4583_v0 = vadd.f32 %v4582_v54, %v4581_v30 }
 0x26a   : > { %3544 = vst [vmem:[%s6373_s4 + $0x20] sm:$0xff] %v3536_v2  ;;  %v3529_v8 = vadd.f32 %v6361_v53, %v3514_v33  ;;  %v4595_v15 = vadd.f32 %v4594_v40, %v4593_v31  ;;  %v4584_v49 = vpop.f32.mrf.mxu0 }
 0x26b   : > { %v4596_v52 = vpop.f32.mrf.mxu1  ;;  %v3533_v55 = vmax.f32 %v3525_v6, 0.0  ;;  %v3511_v50 = vadd.f32 %v4583_v0, %v3237_v46 }
 0x26c   : > { %v3537_v56 = vmax.f32 %v3529_v8, 0.0  ;;  %v3515_v62 = vadd.f32 %v4595_v15, %v3241_v61  ;;  %v4585_v63 = vpop.f32.mrf.mxu0 }
 0x26d   : > { %v4597_v4 = vpop.f32.mrf.mxu1  ;;  %3541 = vst [vmem:[%s6373_s4 + $0x8] sm:$0xff] %v3533_v55  ;;  %v3526_v51 = vadd.f32 %v6361_v53, %v3511_v50  ;;  %v4586_v24 = vadd.f32 %v4585_v63, %v4584_v49 }
 0x26e   : > { %3545 = vst [vmem:[%s6373_s4 + $0x28] sm:$0xff] %v3537_v56  ;;  %v3530_v21 = vadd.f32 %v6361_v53, %v3515_v62  ;;  %v4598_v7 = vadd.f32 %v4597_v4, %v4596_v52 }
 0x26f   : > { %v3534_v9 = vmax.f32 %v3526_v51, 0.0  ;;  %v3512_v47 = vadd.f32 %v4586_v24, %v3238_v22 }
 0x270   : > { %v3538_v10 = vmax.f32 %v3530_v21, 0.0  ;;  %v3516_v48 = vadd.f32 %v4598_v7, %v3242_v17 }
 0x271   : > { %3542 = vst [vmem:[%s6373_s4 + $0x10] sm:$0xff] %v3534_v9  ;;  %v3527_v11 = vadd.f32 %v6361_v53, %v3512_v47 }
 0x272   : > { %3546 = vst [vmem:[%s6373_s4 + $0x30] sm:$0xff] %v3538_v10  ;;  %v3531_v1 = vadd.f32 %v6361_v53, %v3516_v48 }
 0x273   : > { %v3535_v58 = vmax.f32 %v3527_v11, 0.0 }
 0x274   : > { %v3539_v13 = vmax.f32 %v3531_v1, 0.0 }
 0x275   : > { %3543 = vst [vmem:[%s6373_s4 + $0x18] sm:$0xff] %v3535_v58 }
 0x276   : > { %3547 = vst [vmem:[%s6373_s4 + $0x38] sm:$0xff] %v3539_v13 }
 0x277   : > { %4737 = shalt.err (!%p4734_p13)
}
 0x278   : > { %s4738_s28 = scalar_lea.hbm %s6399_s11, 1024  ;;  %s4742_s18 = scalar_lea.hbm %s6465_s3, 4096 }
 0x279   : > { %p4739_p0 = scmp.ne.s32.totalorder %s6399_s11, %s4738_s28  ;;  %p4743_p3 = scmp.lt.s32.totalorder %s6399_s11, %s6465_s3 }
 0x27a   : > { %p4744_p4 = scmp.lt.s32.totalorder %s4742_s18, %s4738_s28 }
 0x27b   : > { %p4740_p1 = pnand %p4739_p0, %p4937_p10 }
 0x27c   : > { %p4745_p5 = por %p4744_p4, %p4743_p3 }
 0x27d   : > { %p4741_p2 = pneg %p4740_p1 }
 0x27f   : > { %p4746_p6 = pnand %p4745_p5, %p4741_p2 }
 0x281   : > { %4749 = shalt.err (!%p4746_p6)
}
 0x282   : > { %s4835_s10 = smov 128   ;;  %s4836_s26 = smov 256  }
 0x283   : > { %s4837_s23 = smov 8  }
 0x284   : > { %4634 = dma.vmem_to_hbm [thread:$0]  (%p4937_p10), %s6390_s5, 1024, %s6399_s11, %s6405_s22, %s4835_s10, %s4836_s26, %s4837_s23  }
 0x285 PF: > { %p4640_p7 = scmp.ge.s32.totalorder %s4832_s21, 2  ;;  %s3578_s27 = sand.u32 1, %s4796_s12  }
 0x286   : > { %s3579_s29 = scalar_lea.sflag [#allocation4], %s3578_s27 }
 0x287   : > { %p4637_p8 = pnand %p4640_p7, %p4944_p12 }
 0x289   : > { %p4638_p9 = pneg %p4637_p8 }
 0x28b   : > { %4791 = dma.done.wait (%p4638_p9), %s3579_s29, 1024  }
 0x28c   : > { %4793 = vsyncadd (%p4638_p9), %s3579_s29, 4294966272  ;;  %s16_s21 = sadd.s32 1, %s4832_s21   ;;  %s6495_s12 = smov %s4800_s13 }
 0x28d   : > { %p13_p11 = scmp.ge.s32.totalorder %s16_s21, 6   ;;  %s6496_s13 = smov %s4804_s14 }
 0x28e   : > { %s6497_s14 = smov %s4942_s7  ;;  %s6498_s15 = smov %s4812_s16 }
 0x28f   : > { %s6499_s16 = smov %s4931_s30  ;;  %s6500_s17 = smov %s4824_s19 }
 0x290   : > { %s6501_s18 = smov %s4828_s20  ;;  %s6502_s19 = smov %s6505_s24 }
 0x291   : > { %s6503_s20 = smov %s6509_s25  ;;  %15 = sbr.rel (!%p13_p11) target bundleno = 6 (0x6), region = 126 }
 0x296   :  { %3584 = vsyncpa [#allocation4], 1 }
 0x297   :  { %3586 = vsyncpa [#allocation4 + $0x1], 1 }

</bundles_post_ra>
